<compile_context>
chip_gen: v7x
topology: tpu7x:2x2x1
jax: 0.10.0
libtpu: 0.0.40
codegen_flags: <defaults>
</compile_context>

<pallas_src>
import functools

import jax
import jax.numpy as jnp
from jax import lax
from jax.experimental import pallas as pl
from jax.experimental.pallas import tpu as pltpu

OBS_DIM = 5
OBS_PAD = 16                 # pad obs dim so packed bf16 weight rows stay (16,128)-tile aligned
ACTION_DIM = 3
HIDDEN_DIM = 256             # -> LSTM hidden = 128
LSTM_H = HIDDEN_DIM // 2
SEQ_LEN = 8
BATCH = 2
B_PAD = 8                    # batch rows padded to one sublane tile
LN_EPS = 1e-5

H, HD = LSTM_H, HIDDEN_DIM

# ---- packed small-vector parameter offsets (all multiples of 128 lanes) ----
_B0_OFF = 0                      # LSTM layer-0 bias (b_ih0 + b_hh0), 4H (gate order i,f,o,g)
_B1_OFF = _B0_OFF + 4 * H        # LSTM layer-1 bias,                 4H
_NF_B_OFF = _B1_OFF + 4 * H      # noise_filter linear bias,          H
_NF_G_OFF = _NF_B_OFF + H        # noise_filter LN gamma,             H
_NF_BE_OFF = _NF_G_OFF + H       # noise_filter LN beta,              H
_SR_B1_OFF = _NF_BE_OFF + H      # state_reconstructor lin1 bias,     HD
_SR_B2_OFF = _SR_B1_OFF + HD     # state_reconstructor lin2 bias,     HD
_SR_G_OFF = _SR_B2_OFF + HD      # state_reconstructor LN gamma,      HD
_SR_BE_OFF = _SR_G_OFF + HD      # state_reconstructor LN beta,       HD
_PH_B1_OFF = _SR_BE_OFF + HD     # policy_head lin1 bias,             HD
_PH_B2_OFF = _PH_B1_OFF + HD     # policy_head lin2 bias,             H
_PH_B3_OFF = _PH_B2_OFF + H      # policy_head lin3 bias (padded),    H
_VEC_LEN = _PH_B3_OFF + H        # 2944


# ----------------------------- Pallas kernel ------------------------------ #
def policy_kernel(
    x_ref,        # [S*B_PAD, OBS_PAD] bf16, time-major (row t*B_PAD + b), batch zero-padded
    lstm_w_ref,   # [OBS_PAD + 3H, 4H] bf16 : [wih0_pad ; whh0 ; wih1 ; whh1], gate cols i,f,o,g
    w256_hbm,     # [H + 2*HD, HD]     bf16 : [sr_w1 ; sr_w2 ; ph_w1]   (HBM, DMA'd in-kernel)
    w128_hbm,     # [H + HD + H, H]    bf16 : [nf_w ; ph_w2 ; ph_w3_pad] (HBM, DMA'd in-kernel)
    vec_ref,      # [1, _VEC_LEN] f32 : packed biases + LayerNorm params
    out_ref,      # [B_PAD, H] f32 (lane-dense; wrapper slices [:B, :ACTION_DIM])
    w256_vmem,    # VMEM scratch for w256
    w128_vmem,    # VMEM scratch for w128
    dma_sem,      # DMA semaphores (2,)
    *, seq_len,
):
    S = seq_len

    # -------- start head-weight DMA; it completes under the LSTM recurrence --------
    cp256 = pltpu.make_async_copy(w256_hbm, w256_vmem, dma_sem.at[0])
    cp128 = pltpu.make_async_copy(w128_hbm, w128_vmem, dma_sem.at[1])
    cp256.start()
    cp128.start()

    def vrow(off, n):                       # [1, n] f32 slice of packed vector
        return vec_ref[:, off:off + n]

    def mm(x_f32, w_bf16):                  # f32 activations -> bf16 MXU -> f32 acc
        return jnp.dot(x_f32.astype(jnp.bfloat16), w_bf16,
                       preferred_element_type=jnp.float32)

    # -------- LSTM weights (static, tile-aligned ref slices) --------
    wih0 = lstm_w_ref[0:OBS_PAD, :]                          # [OBS_PAD, 4H]
    whh0 = lstm_w_ref[OBS_PAD:OBS_PAD + H, :]                # [H, 4H]
    wih1 = lstm_w_ref[OBS_PAD + H:OBS_PAD + 2 * H, :]        # [H, 4H]
    whh1 = lstm_w_ref[OBS_PAD + 2 * H:OBS_PAD + 3 * H, :]    # [H, 4H]

    b0 = vrow(_B0_OFF, 4 * H)
    b1 = vrow(_B1_OFF, 4 * H)

    # -------- hoisted layer-0 input projection: all timesteps at once --------
    xg = jnp.dot(x_ref[...], wih0, preferred_element_type=jnp.float32) + b0  # [S*B_PAD, 4H] f32

    def gates_to_hc(gates, c):
        # packed gate order: i, f, o | g  -> one sigmoid over 3H lanes, one tanh over H
        sfo = jax.nn.sigmoid(gates[:, 0:3 * H])
        i = sfo[:, 0:H]
        f = sfo[:, H:2 * H]
        o = sfo[:, 2 * H:3 * H]
        g = jnp.tanh(gates[:, 3 * H:4 * H])
        c_new = f * c + i * g
        h_new = o * jnp.tanh(c_new)
        return h_new, c_new

    h0 = jnp.zeros((B_PAD, H), jnp.float32)
    c0 = jnp.zeros((B_PAD, H), jnp.float32)
    h1 = jnp.zeros((B_PAD, H), jnp.float32)
    c1 = jnp.zeros((B_PAD, H), jnp.float32)

    # -------- fully unrolled recurrence (S static) --------
    # TODO(synk): nn.LSTM dropout=0.1 between layers is identity in eval mode.
    for t in range(S):
        x_t = xg[t * B_PAD:(t + 1) * B_PAD, :]      # static tile-aligned slice, [B_PAD, 4H]
        rec1 = mm(h1, whh1)                         # depends only on h1 from t-1: off the chain
        gates0 = x_t + mm(h0, whh0)                 # single matmul on the serial chain
        h0, c0 = gates_to_hc(gates0, c0)
        gates1 = mm(h0, wih1) + rec1 + b1           # K=128 matmul on the chain
        h1, c1 = gates_to_hc(gates1, c1)

    last_hidden = h1                                # lstm_out[:, -1, :] of the top layer

    # -------- head-weight DMA must be complete by now --------
    cp256.wait()
    cp128.wait()

    nf_w = w128_vmem[0:H, :]                        # [H, H]
    ph_w2 = w128_vmem[H:H + HD, :]                  # [HD, H]
    ph_w3 = w128_vmem[H + HD:2 * H + HD, :]         # [H, H] (cols >= ACTION_DIM are zero)
    sr_w1 = w256_vmem[0:H, :]                       # [H, HD]
    sr_w2 = w256_vmem[H:H + HD, :]                  # [HD, HD]
    ph_w1 = w256_vmem[H + HD:H + 2 * HD, :]         # [HD, HD]

    def layernorm(x, gamma, beta):
        mu = jnp.mean(x, axis=-1, keepdims=True)
        var = jnp.mean(x * x, axis=-1, keepdims=True) - mu * mu
        return (x - mu) * lax.rsqrt(var + LN_EPS) * gamma + beta

    # noise_filter: Linear -> LayerNorm -> ReLU -> Dropout(identity)
    h = mm(last_hidden, nf_w) + vrow(_NF_B_OFF, H)
    h = jnp.maximum(layernorm(h, vrow(_NF_G_OFF, H), vrow(_NF_BE_OFF, H)), 0.0)

    # state_reconstructor: Linear -> ReLU -> Linear -> LayerNorm -> ReLU
    h = jnp.maximum(mm(h, sr_w1) + vrow(_SR_B1_OFF, HD), 0.0)
    h = mm(h, sr_w2) + vrow(_SR_B2_OFF, HD)
    h = jnp.maximum(layernorm(h, vrow(_SR_G_OFF, HD), vrow(_SR_BE_OFF, HD)), 0.0)

    # policy_head: Linear -> ReLU -> Dropout(identity) -> Linear -> ReLU -> Linear -> Tanh
    h = jnp.maximum(mm(h, ph_w1) + vrow(_PH_B1_OFF, HD), 0.0)
    h = jnp.maximum(mm(h, ph_w2) + vrow(_PH_B2_OFF, H), 0.0)
    a = jnp.tanh(mm(h, ph_w3) + vrow(_PH_B3_OFF, H))         # [B_PAD, H]; extra cols are tanh(0)=0

    # lane-dense store; wrapper slices [:B, :ACTION_DIM] (padded rows never leave the slab)
    out_ref[...] = a.astype(out_ref.dtype)


# ---------------------------- parameter setup ----------------------------- #
def _reorder_gates(w):
    """PyTorch LSTM gate columns [i, f, g, o] -> packed [i, f, o, g]. w: [in, 4H]."""
    return jnp.concatenate([w[:, 0:2 * H], w[:, 3 * H:4 * H], w[:, 2 * H:3 * H]], axis=1)


def init_params(key):
    """Deterministic init matching the module's _init_weights scheme, packed for the kernel."""
    ks = iter(jax.random.split(key, 12))

    def xav(out_f, in_f):
        # PyTorch stores Linear/LSTM weights as [out, in]; xavier over that shape,
        # then transpose so the kernel does (B, in) @ (in, out).
        limit = (6.0 / (in_f + out_f)) ** 0.5
        return jax.random.uniform(next(ks), (out_f, in_f), jnp.float32, -limit, limit).T

    wih0 = _reorder_gates(xav(4 * H, OBS_DIM))   # [OBS, 4H]
    whh0 = _reorder_gates(xav(4 * H, H))         # [H, 4H]
    wih1 = _reorder_gates(xav(4 * H, H))
    whh1 = _reorder_gates(xav(4 * H, H))

    nf_w = xav(H, H)
    sr_w1 = xav(HD, H)
    sr_w2 = xav(HD, HD)
    ph_w1 = xav(HD, HD)
    ph_w2 = xav(H, HD)
    ph_w3 = xav(ACTION_DIM, H)                   # [H, 3]

    wih0_pad = jnp.zeros((OBS_PAD, 4 * H), jnp.float32).at[:OBS_DIM].set(wih0)
    ph_w3_pad = jnp.zeros((H, H), jnp.float32).at[:, :ACTION_DIM].set(ph_w3)

    lstm_w = jnp.concatenate([wih0_pad, whh0, wih1, whh1], axis=0).astype(jnp.bfloat16)  # [400, 512]
    w256 = jnp.concatenate([sr_w1, sr_w2, ph_w1], axis=0).astype(jnp.bfloat16)           # [640, 256]
    w128 = jnp.concatenate([nf_w, ph_w2, ph_w3_pad], axis=0).astype(jnp.bfloat16)        # [512, 128]

    # Packed biases / LayerNorm params (all biases zero per _init_weights).
    # TODO(synk): if real PyTorch LSTM weights are loaded, each packed per-layer bias must be
    # b_ih + b_hh with the same [i,f,o,g] gate-column reorder applied.
    vec = jnp.concatenate([
        jnp.zeros((4 * H,)),   # b0 (gate order i,f,o,g)
        jnp.zeros((4 * H,)),   # b1
        jnp.zeros((H,)),       # nf_b
        jnp.ones((H,)),        # nf_gamma
        jnp.zeros((H,)),       # nf_beta
        jnp.zeros((HD,)),      # sr_b1
        jnp.zeros((HD,)),      # sr_b2
        jnp.ones((HD,)),       # sr_gamma
        jnp.zeros((HD,)),      # sr_beta
        jnp.zeros((HD,)),      # ph_b1
        jnp.zeros((H,)),       # ph_b2
        jnp.zeros((H,)),       # ph_b3 (padded to H lanes; only first ACTION_DIM used)
    ]).astype(jnp.float32)[None, :]                                                      # [1, 2944]
    assert vec.shape[1] == _VEC_LEN

    return lstm_w, w256, w128, vec


# ------------------------------- wrapper ----------------------------------- #
@jax.jit
def policy_forward(obs_sequence, params):
    lstm_w, w256, w128, vec = params

    squeeze_output = obs_sequence.ndim == 2
    if squeeze_output:
        obs_sequence = obs_sequence[None]
    B, S, D = obs_sequence.shape
    assert B <= B_PAD and D <= OBS_PAD

    # Time-major, batch zero-padded to one sublane tile, obs dim padded to 16, bf16 for the MXU.
    x = jnp.transpose(obs_sequence.astype(jnp.float32), (1, 0, 2))           # [S, B, D]
    x = jnp.pad(x, ((0, 0), (0, B_PAD - B), (0, OBS_PAD - D)))               # [S, B_PAD, OBS_PAD]
    x2d = x.reshape(S * B_PAD, OBS_PAD).astype(jnp.bfloat16)

    out = pl.pallas_call(
        functools.partial(policy_kernel, seq_len=S),
        out_shape=jax.ShapeDtypeStruct((B_PAD, H), jnp.float32),
        in_specs=[
            pl.BlockSpec(memory_space=pltpu.MemorySpace.VMEM),   # x (needed immediately)
            pl.BlockSpec(memory_space=pltpu.MemorySpace.VMEM),   # lstm weights (needed immediately)
            pl.BlockSpec(memory_space=pl.ANY),                   # w256: DMA'd under the recurrence
            pl.BlockSpec(memory_space=pl.ANY),                   # w128: DMA'd under the recurrence
            pl.BlockSpec(memory_space=pltpu.MemorySpace.VMEM),   # packed bias / LN vector
        ],
        out_specs=pl.BlockSpec(memory_space=pltpu.MemorySpace.VMEM),
        scratch_shapes=[
            pltpu.VMEM((H + 2 * HD, HD), jnp.bfloat16),          # w256 VMEM buffer
            pltpu.VMEM((2 * H + HD, H), jnp.bfloat16),           # w128 VMEM buffer
            pltpu.SemaphoreType.DMA((2,)),
        ],
    )(x2d, lstm_w, w256, w128, vec)

    action = out[:B, :ACTION_DIM]
    if squeeze_output:
        action = action[0]
    return action


if __name__ == "__main__":
    key = jax.random.PRNGKey(0)
    pkey, xkey = jax.random.split(key)
    params = init_params(pkey)

    obs = jax.random.normal(xkey, (BATCH, SEQ_LEN, OBS_DIM), jnp.float32)
    action = policy_forward(obs, params)
    jax.block_until_ready(action)
    assert action.shape == (BATCH, ACTION_DIM)
    assert bool(jnp.all(jnp.isfinite(action)))
    assert bool(jnp.all(jnp.abs(action) <= 1.0))  # tanh output range
    print("KERNEL_OK")
</pallas_src>

<mosaic_0001>
module attributes {stable_mosaic.version = 11 : i64} {
  func.func @policy_kernel(%arg0: memref<64x16xbf16, #tpu.memory_space<vmem>>, %arg1: memref<400x512xbf16, #tpu.memory_space<vmem>>, %arg2: memref<640x256xbf16, #tpu.memory_space<any>>, %arg3: memref<512x128xbf16, #tpu.memory_space<any>>, %arg4: memref<1x2944xf32, #tpu.memory_space<vmem>>, %arg5: memref<8x128xf32, #tpu.memory_space<vmem>>, %arg6: memref<640x256xbf16, #tpu.memory_space<vmem>>, %arg7: memref<512x128xbf16, #tpu.memory_space<vmem>>, %arg8: memref<2x!tpu.dma_semaphore, #tpu.memory_space<semaphore_mem>>) attributes {dimension_semantics = [], scalar_prefetch = 0 : i64, scratch_operands = 3 : i64, tpu.core_type = #tpu.core_type<tc>} {
    %c0_i32 = arith.constant 0 : i32
    %0 = tpu.memref_slice %arg8[%c0_i32] : memref<2x!tpu.dma_semaphore, #tpu.memory_space<semaphore_mem>> -> memref<1x!tpu.dma_semaphore, #tpu.memory_space<semaphore_mem>>
    %1 = tpu.memref_squeeze %0 : memref<1x!tpu.dma_semaphore, #tpu.memory_space<semaphore_mem>> -> memref<!tpu.dma_semaphore, #tpu.memory_space<semaphore_mem>>
    tpu.enqueue_dma source(%arg2 : memref<640x256xbf16, #tpu.memory_space<any>>) target(%arg6 : memref<640x256xbf16, #tpu.memory_space<vmem>>) target_semaphore(%1 : memref<!tpu.dma_semaphore, #tpu.memory_space<semaphore_mem>>)
    %c1_i32 = arith.constant 1 : i32
    %2 = tpu.memref_slice %arg8[%c1_i32] : memref<2x!tpu.dma_semaphore, #tpu.memory_space<semaphore_mem>> -> memref<1x!tpu.dma_semaphore, #tpu.memory_space<semaphore_mem>>
    %3 = tpu.memref_squeeze %2 : memref<1x!tpu.dma_semaphore, #tpu.memory_space<semaphore_mem>> -> memref<!tpu.dma_semaphore, #tpu.memory_space<semaphore_mem>>
    tpu.enqueue_dma source(%arg3 : memref<512x128xbf16, #tpu.memory_space<any>>) target(%arg7 : memref<512x128xbf16, #tpu.memory_space<vmem>>) target_semaphore(%3 : memref<!tpu.dma_semaphore, #tpu.memory_space<semaphore_mem>>)
    %c0 = arith.constant 0 : index
    %c0_0 = arith.constant 0 : index
    %4 = vector.load %arg1[%c0, %c0_0] : memref<400x512xbf16, #tpu.memory_space<vmem>>, vector<16x512xbf16>
    %c16 = arith.constant 16 : index
    %c0_1 = arith.constant 0 : index
    %5 = vector.load %arg1[%c16, %c0_1] : memref<400x512xbf16, #tpu.memory_space<vmem>>, vector<128x512xbf16>
    %c144 = arith.constant 144 : index
    %c0_2 = arith.constant 0 : index
    %6 = vector.load %arg1[%c144, %c0_2] : memref<400x512xbf16, #tpu.memory_space<vmem>>, vector<128x512xbf16>
    %c272 = arith.constant 272 : index
    %c0_3 = arith.constant 0 : index
    %7 = vector.load %arg1[%c272, %c0_3] : memref<400x512xbf16, #tpu.memory_space<vmem>>, vector<128x512xbf16>
    %c0_4 = arith.constant 0 : index
    %c0_5 = arith.constant 0 : index
    %8 = vector.load %arg4[%c0_4, %c0_5] : memref<1x2944xf32, #tpu.memory_space<vmem>>, vector<1x512xf32>
    %c0_6 = arith.constant 0 : index
    %c512 = arith.constant 512 : index
    %9 = vector.load %arg4[%c0_6, %c512] : memref<1x2944xf32, #tpu.memory_space<vmem>>, vector<1x512xf32>
    %c0_7 = arith.constant 0 : index
    %c0_8 = arith.constant 0 : index
    %10 = vector.load %arg0[%c0_7, %c0_8] : memref<64x16xbf16, #tpu.memory_space<vmem>>, vector<64x16xbf16>
    %cst = arith.constant dense<0.000000e+00> : vector<64x512xf32>
    %11 = tpu.matmul %10, %4, %cst {dimension_numbers = #tpu.dot_dimension_numbers<[1], [0], [0], [1], [0, 0, 1, 1], [], []>} : vector<64x16xbf16>, vector<16x512xbf16>, vector<64x512xf32> -> vector<64x512xf32>
    %12 = vector.broadcast %8 : vector<1x512xf32> to vector<64x512xf32>
    %13 = arith.addf %11, %12 : vector<64x512xf32>
    %cst_9 = arith.constant 0.000000e+00 : f32
    %14 = vector.broadcast %cst_9 : f32 to vector<8x128xf32>
    %cst_10 = arith.constant 0.000000e+00 : f32
    %15 = vector.broadcast %cst_10 : f32 to vector<8x128xf32>
    %cst_11 = arith.constant 0.000000e+00 : f32
    %16 = vector.broadcast %cst_11 : f32 to vector<8x128xf32>
    %cst_12 = arith.constant 0.000000e+00 : f32
    %17 = vector.broadcast %cst_12 : f32 to vector<8x128xf32>
    %18 = vector.extract_strided_slice %13 {offsets = [0, 0], sizes = [8, 512], strides = [1, 1]} : vector<64x512xf32> to vector<8x512xf32>
    %19 = arith.truncf %16 : vector<8x128xf32> to vector<8x128xbf16>
    %cst_13 = arith.constant dense<0.000000e+00> : vector<8x512xf32>
    %20 = tpu.matmul %19, %7, %cst_13 {dimension_numbers = #tpu.dot_dimension_numbers<[1], [0], [0], [1], [0, 0, 1, 1], [], []>} : vector<8x128xbf16>, vector<128x512xbf16>, vector<8x512xf32> -> vector<8x512xf32>
    %21 = arith.truncf %14 : vector<8x128xf32> to vector<8x128xbf16>
    %cst_14 = arith.constant dense<0.000000e+00> : vector<8x512xf32>
    %22 = tpu.matmul %21, %5, %cst_14 {dimension_numbers = #tpu.dot_dimension_numbers<[1], [0], [0], [1], [0, 0, 1, 1], [], []>} : vector<8x128xbf16>, vector<128x512xbf16>, vector<8x512xf32> -> vector<8x512xf32>
    %23 = arith.addf %18, %22 : vector<8x512xf32>
    %24 = vector.extract_strided_slice %23 {offsets = [0, 0], sizes = [8, 384], strides = [1, 1]} : vector<8x512xf32> to vector<8x384xf32>
    %25 = arith.negf %24 : vector<8x384xf32>
    %26 = math.exp %25 : vector<8x384xf32>
    %cst_15 = arith.constant 1.000000e+00 : f32
    %27 = vector.broadcast %cst_15 : f32 to vector<8x384xf32>
    %28 = arith.addf %27, %26 : vector<8x384xf32>
    %29 = arith.divf %27, %28 : vector<8x384xf32>
    %30 = vector.extract_strided_slice %29 {offsets = [0, 0], sizes = [8, 128], strides = [1, 1]} : vector<8x384xf32> to vector<8x128xf32>
    %31 = vector.extract_strided_slice %29 {offsets = [0, 128], sizes = [8, 128], strides = [1, 1]} : vector<8x384xf32> to vector<8x128xf32>
    %32 = vector.extract_strided_slice %29 {offsets = [0, 256], sizes = [8, 128], strides = [1, 1]} : vector<8x384xf32> to vector<8x128xf32>
    %33 = vector.extract_strided_slice %23 {offsets = [0, 384], sizes = [8, 128], strides = [1, 1]} : vector<8x512xf32> to vector<8x128xf32>
    %34 = math.tanh %33 : vector<8x128xf32>
    %35 = arith.mulf %31, %15 : vector<8x128xf32>
    %36 = arith.mulf %30, %34 : vector<8x128xf32>
    %37 = arith.addf %35, %36 : vector<8x128xf32>
    %38 = math.tanh %37 : vector<8x128xf32>
    %39 = arith.mulf %32, %38 : vector<8x128xf32>
    %40 = arith.truncf %39 : vector<8x128xf32> to vector<8x128xbf16>
    %cst_16 = arith.constant dense<0.000000e+00> : vector<8x512xf32>
    %41 = tpu.matmul %40, %6, %cst_16 {dimension_numbers = #tpu.dot_dimension_numbers<[1], [0], [0], [1], [0, 0, 1, 1], [], []>} : vector<8x128xbf16>, vector<128x512xbf16>, vector<8x512xf32> -> vector<8x512xf32>
    %42 = arith.addf %41, %20 : vector<8x512xf32>
    %43 = vector.broadcast %9 : vector<1x512xf32> to vector<8x512xf32>
    %44 = arith.addf %42, %43 : vector<8x512xf32>
    %45 = vector.extract_strided_slice %44 {offsets = [0, 0], sizes = [8, 384], strides = [1, 1]} : vector<8x512xf32> to vector<8x384xf32>
    %46 = arith.negf %45 : vector<8x384xf32>
    %47 = math.exp %46 : vector<8x384xf32>
    %cst_17 = arith.constant 1.000000e+00 : f32
    %48 = vector.broadcast %cst_17 : f32 to vector<8x384xf32>
    %49 = arith.addf %48, %47 : vector<8x384xf32>
    %50 = arith.divf %48, %49 : vector<8x384xf32>
    %51 = vector.extract_strided_slice %50 {offsets = [0, 0], sizes = [8, 128], strides = [1, 1]} : vector<8x384xf32> to vector<8x128xf32>
    %52 = vector.extract_strided_slice %50 {offsets = [0, 128], sizes = [8, 128], strides = [1, 1]} : vector<8x384xf32> to vector<8x128xf32>
    %53 = vector.extract_strided_slice %50 {offsets = [0, 256], sizes = [8, 128], strides = [1, 1]} : vector<8x384xf32> to vector<8x128xf32>
    %54 = vector.extract_strided_slice %44 {offsets = [0, 384], sizes = [8, 128], strides = [1, 1]} : vector<8x512xf32> to vector<8x128xf32>
    %55 = math.tanh %54 : vector<8x128xf32>
    %56 = arith.mulf %52, %17 : vector<8x128xf32>
    %57 = arith.mulf %51, %55 : vector<8x128xf32>
    %58 = arith.addf %56, %57 : vector<8x128xf32>
    %59 = math.tanh %58 : vector<8x128xf32>
    %60 = arith.mulf %53, %59 : vector<8x128xf32>
    %61 = vector.extract_strided_slice %13 {offsets = [8, 0], sizes = [8, 512], strides = [1, 1]} : vector<64x512xf32> to vector<8x512xf32>
    %62 = arith.truncf %60 : vector<8x128xf32> to vector<8x128xbf16>
    %cst_18 = arith.constant dense<0.000000e+00> : vector<8x512xf32>
    %63 = tpu.matmul %62, %7, %cst_18 {dimension_numbers = #tpu.dot_dimension_numbers<[1], [0], [0], [1], [0, 0, 1, 1], [], []>} : vector<8x128xbf16>, vector<128x512xbf16>, vector<8x512xf32> -> vector<8x512xf32>
    %64 = arith.truncf %39 : vector<8x128xf32> to vector<8x128xbf16>
    %cst_19 = arith.constant dense<0.000000e+00> : vector<8x512xf32>
    %65 = tpu.matmul %64, %5, %cst_19 {dimension_numbers = #tpu.dot_dimension_numbers<[1], [0], [0], [1], [0, 0, 1, 1], [], []>} : vector<8x128xbf16>, vector<128x512xbf16>, vector<8x512xf32> -> vector<8x512xf32>
    %66 = arith.addf %61, %65 : vector<8x512xf32>
    %67 = vector.extract_strided_slice %66 {offsets = [0, 0], sizes = [8, 384], strides = [1, 1]} : vector<8x512xf32> to vector<8x384xf32>
    %68 = arith.negf %67 : vector<8x384xf32>
    %69 = math.exp %68 : vector<8x384xf32>
    %cst_20 = arith.constant 1.000000e+00 : f32
    %70 = vector.broadcast %cst_20 : f32 to vector<8x384xf32>
    %71 = arith.addf %70, %69 : vector<8x384xf32>
    %72 = arith.divf %70, %71 : vector<8x384xf32>
    %73 = vector.extract_strided_slice %72 {offsets = [0, 0], sizes = [8, 128], strides = [1, 1]} : vector<8x384xf32> to vector<8x128xf32>
    %74 = vector.extract_strided_slice %72 {offsets = [0, 128], sizes = [8, 128], strides = [1, 1]} : vector<8x384xf32> to vector<8x128xf32>
    %75 = vector.extract_strided_slice %72 {offsets = [0, 256], sizes = [8, 128], strides = [1, 1]} : vector<8x384xf32> to vector<8x128xf32>
    %76 = vector.extract_strided_slice %66 {offsets = [0, 384], sizes = [8, 128], strides = [1, 1]} : vector<8x512xf32> to vector<8x128xf32>
    %77 = math.tanh %76 : vector<8x128xf32>
    %78 = arith.mulf %74, %37 : vector<8x128xf32>
    %79 = arith.mulf %73, %77 : vector<8x128xf32>
    %80 = arith.addf %78, %79 : vector<8x128xf32>
    %81 = math.tanh %80 : vector<8x128xf32>
    %82 = arith.mulf %75, %81 : vector<8x128xf32>
    %83 = arith.truncf %82 : vector<8x128xf32> to vector<8x128xbf16>
    %cst_21 = arith.constant dense<0.000000e+00> : vector<8x512xf32>
    %84 = tpu.matmul %83, %6, %cst_21 {dimension_numbers = #tpu.dot_dimension_numbers<[1], [0], [0], [1], [0, 0, 1, 1], [], []>} : vector<8x128xbf16>, vector<128x512xbf16>, vector<8x512xf32> -> vector<8x512xf32>
    %85 = arith.addf %84, %63 : vector<8x512xf32>
    %86 = vector.broadcast %9 : vector<1x512xf32> to vector<8x512xf32>
    %87 = arith.addf %85, %86 : vector<8x512xf32>
    %88 = vector.extract_strided_slice %87 {offsets = [0, 0], sizes = [8, 384], strides = [1, 1]} : vector<8x512xf32> to vector<8x384xf32>
    %89 = arith.negf %88 : vector<8x384xf32>
    %90 = math.exp %89 : vector<8x384xf32>
    %cst_22 = arith.constant 1.000000e+00 : f32
    %91 = vector.broadcast %cst_22 : f32 to vector<8x384xf32>
    %92 = arith.addf %91, %90 : vector<8x384xf32>
    %93 = arith.divf %91, %92 : vector<8x384xf32>
    %94 = vector.extract_strided_slice %93 {offsets = [0, 0], sizes = [8, 128], strides = [1, 1]} : vector<8x384xf32> to vector<8x128xf32>
    %95 = vector.extract_strided_slice %93 {offsets = [0, 128], sizes = [8, 128], strides = [1, 1]} : vector<8x384xf32> to vector<8x128xf32>
    %96 = vector.extract_strided_slice %93 {offsets = [0, 256], sizes = [8, 128], strides = [1, 1]} : vector<8x384xf32> to vector<8x128xf32>
    %97 = vector.extract_strided_slice %87 {offsets = [0, 384], sizes = [8, 128], strides = [1, 1]} : vector<8x512xf32> to vector<8x128xf32>
    %98 = math.tanh %97 : vector<8x128xf32>
    %99 = arith.mulf %95, %58 : vector<8x128xf32>
    %100 = arith.mulf %94, %98 : vector<8x128xf32>
    %101 = arith.addf %99, %100 : vector<8x128xf32>
    %102 = math.tanh %101 : vector<8x128xf32>
    %103 = arith.mulf %96, %102 : vector<8x128xf32>
    %104 = vector.extract_strided_slice %13 {offsets = [16, 0], sizes = [8, 512], strides = [1, 1]} : vector<64x512xf32> to vector<8x512xf32>
    %105 = arith.truncf %103 : vector<8x128xf32> to vector<8x128xbf16>
    %cst_23 = arith.constant dense<0.000000e+00> : vector<8x512xf32>
    %106 = tpu.matmul %105, %7, %cst_23 {dimension_numbers = #tpu.dot_dimension_numbers<[1], [0], [0], [1], [0, 0, 1, 1], [], []>} : vector<8x128xbf16>, vector<128x512xbf16>, vector<8x512xf32> -> vector<8x512xf32>
    %107 = arith.truncf %82 : vector<8x128xf32> to vector<8x128xbf16>
    %cst_24 = arith.constant dense<0.000000e+00> : vector<8x512xf32>
    %108 = tpu.matmul %107, %5, %cst_24 {dimension_numbers = #tpu.dot_dimension_numbers<[1], [0], [0], [1], [0, 0, 1, 1], [], []>} : vector<8x128xbf16>, vector<128x512xbf16>, vector<8x512xf32> -> vector<8x512xf32>
    %109 = arith.addf %104, %108 : vector<8x512xf32>
    %110 = vector.extract_strided_slice %109 {offsets = [0, 0], sizes = [8, 384], strides = [1, 1]} : vector<8x512xf32> to vector<8x384xf32>
    %111 = arith.negf %110 : vector<8x384xf32>
    %112 = math.exp %111 : vector<8x384xf32>
    %cst_25 = arith.constant 1.000000e+00 : f32
    %113 = vector.broadcast %cst_25 : f32 to vector<8x384xf32>
    %114 = arith.addf %113, %112 : vector<8x384xf32>
    %115 = arith.divf %113, %114 : vector<8x384xf32>
    %116 = vector.extract_strided_slice %115 {offsets = [0, 0], sizes = [8, 128], strides = [1, 1]} : vector<8x384xf32> to vector<8x128xf32>
    %117 = vector.extract_strided_slice %115 {offsets = [0, 128], sizes = [8, 128], strides = [1, 1]} : vector<8x384xf32> to vector<8x128xf32>
    %118 = vector.extract_strided_slice %115 {offsets = [0, 256], sizes = [8, 128], strides = [1, 1]} : vector<8x384xf32> to vector<8x128xf32>
    %119 = vector.extract_strided_slice %109 {offsets = [0, 384], sizes = [8, 128], strides = [1, 1]} : vector<8x512xf32> to vector<8x128xf32>
    %120 = math.tanh %119 : vector<8x128xf32>
    %121 = arith.mulf %117, %80 : vector<8x128xf32>
    %122 = arith.mulf %116, %120 : vector<8x128xf32>
    %123 = arith.addf %121, %122 : vector<8x128xf32>
    %124 = math.tanh %123 : vector<8x128xf32>
    %125 = arith.mulf %118, %124 : vector<8x128xf32>
    %126 = arith.truncf %125 : vector<8x128xf32> to vector<8x128xbf16>
    %cst_26 = arith.constant dense<0.000000e+00> : vector<8x512xf32>
    %127 = tpu.matmul %126, %6, %cst_26 {dimension_numbers = #tpu.dot_dimension_numbers<[1], [0], [0], [1], [0, 0, 1, 1], [], []>} : vector<8x128xbf16>, vector<128x512xbf16>, vector<8x512xf32> -> vector<8x512xf32>
    %128 = arith.addf %127, %106 : vector<8x512xf32>
    %129 = vector.broadcast %9 : vector<1x512xf32> to vector<8x512xf32>
    %130 = arith.addf %128, %129 : vector<8x512xf32>
    %131 = vector.extract_strided_slice %130 {offsets = [0, 0], sizes = [8, 384], strides = [1, 1]} : vector<8x512xf32> to vector<8x384xf32>
    %132 = arith.negf %131 : vector<8x384xf32>
    %133 = math.exp %132 : vector<8x384xf32>
    %cst_27 = arith.constant 1.000000e+00 : f32
    %134 = vector.broadcast %cst_27 : f32 to vector<8x384xf32>
    %135 = arith.addf %134, %133 : vector<8x384xf32>
    %136 = arith.divf %134, %135 : vector<8x384xf32>
    %137 = vector.extract_strided_slice %136 {offsets = [0, 0], sizes = [8, 128], strides = [1, 1]} : vector<8x384xf32> to vector<8x128xf32>
    %138 = vector.extract_strided_slice %136 {offsets = [0, 128], sizes = [8, 128], strides = [1, 1]} : vector<8x384xf32> to vector<8x128xf32>
    %139 = vector.extract_strided_slice %136 {offsets = [0, 256], sizes = [8, 128], strides = [1, 1]} : vector<8x384xf32> to vector<8x128xf32>
    %140 = vector.extract_strided_slice %130 {offsets = [0, 384], sizes = [8, 128], strides = [1, 1]} : vector<8x512xf32> to vector<8x128xf32>
    %141 = math.tanh %140 : vector<8x128xf32>
    %142 = arith.mulf %138, %101 : vector<8x128xf32>
    %143 = arith.mulf %137, %141 : vector<8x128xf32>
    %144 = arith.addf %142, %143 : vector<8x128xf32>
    %145 = math.tanh %144 : vector<8x128xf32>
    %146 = arith.mulf %139, %145 : vector<8x128xf32>
    %147 = vector.extract_strided_slice %13 {offsets = [24, 0], sizes = [8, 512], strides = [1, 1]} : vector<64x512xf32> to vector<8x512xf32>
    %148 = arith.truncf %146 : vector<8x128xf32> to vector<8x128xbf16>
    %cst_28 = arith.constant dense<0.000000e+00> : vector<8x512xf32>
    %149 = tpu.matmul %148, %7, %cst_28 {dimension_numbers = #tpu.dot_dimension_numbers<[1], [0], [0], [1], [0, 0, 1, 1], [], []>} : vector<8x128xbf16>, vector<128x512xbf16>, vector<8x512xf32> -> vector<8x512xf32>
    %150 = arith.truncf %125 : vector<8x128xf32> to vector<8x128xbf16>
    %cst_29 = arith.constant dense<0.000000e+00> : vector<8x512xf32>
    %151 = tpu.matmul %150, %5, %cst_29 {dimension_numbers = #tpu.dot_dimension_numbers<[1], [0], [0], [1], [0, 0, 1, 1], [], []>} : vector<8x128xbf16>, vector<128x512xbf16>, vector<8x512xf32> -> vector<8x512xf32>
    %152 = arith.addf %147, %151 : vector<8x512xf32>
    %153 = vector.extract_strided_slice %152 {offsets = [0, 0], sizes = [8, 384], strides = [1, 1]} : vector<8x512xf32> to vector<8x384xf32>
    %154 = arith.negf %153 : vector<8x384xf32>
    %155 = math.exp %154 : vector<8x384xf32>
    %cst_30 = arith.constant 1.000000e+00 : f32
    %156 = vector.broadcast %cst_30 : f32 to vector<8x384xf32>
    %157 = arith.addf %156, %155 : vector<8x384xf32>
    %158 = arith.divf %156, %157 : vector<8x384xf32>
    %159 = vector.extract_strided_slice %158 {offsets = [0, 0], sizes = [8, 128], strides = [1, 1]} : vector<8x384xf32> to vector<8x128xf32>
    %160 = vector.extract_strided_slice %158 {offsets = [0, 128], sizes = [8, 128], strides = [1, 1]} : vector<8x384xf32> to vector<8x128xf32>
    %161 = vector.extract_strided_slice %158 {offsets = [0, 256], sizes = [8, 128], strides = [1, 1]} : vector<8x384xf32> to vector<8x128xf32>
    %162 = vector.extract_strided_slice %152 {offsets = [0, 384], sizes = [8, 128], strides = [1, 1]} : vector<8x512xf32> to vector<8x128xf32>
    %163 = math.tanh %162 : vector<8x128xf32>
    %164 = arith.mulf %160, %123 : vector<8x128xf32>
    %165 = arith.mulf %159, %163 : vector<8x128xf32>
    %166 = arith.addf %164, %165 : vector<8x128xf32>
    %167 = math.tanh %166 : vector<8x128xf32>
    %168 = arith.mulf %161, %167 : vector<8x128xf32>
    %169 = arith.truncf %168 : vector<8x128xf32> to vector<8x128xbf16>
    %cst_31 = arith.constant dense<0.000000e+00> : vector<8x512xf32>
    %170 = tpu.matmul %169, %6, %cst_31 {dimension_numbers = #tpu.dot_dimension_numbers<[1], [0], [0], [1], [0, 0, 1, 1], [], []>} : vector<8x128xbf16>, vector<128x512xbf16>, vector<8x512xf32> -> vector<8x512xf32>
    %171 = arith.addf %170, %149 : vector<8x512xf32>
    %172 = vector.broadcast %9 : vector<1x512xf32> to vector<8x512xf32>
    %173 = arith.addf %171, %172 : vector<8x512xf32>
    %174 = vector.extract_strided_slice %173 {offsets = [0, 0], sizes = [8, 384], strides = [1, 1]} : vector<8x512xf32> to vector<8x384xf32>
    %175 = arith.negf %174 : vector<8x384xf32>
    %176 = math.exp %175 : vector<8x384xf32>
    %cst_32 = arith.constant 1.000000e+00 : f32
    %177 = vector.broadcast %cst_32 : f32 to vector<8x384xf32>
    %178 = arith.addf %177, %176 : vector<8x384xf32>
    %179 = arith.divf %177, %178 : vector<8x384xf32>
    %180 = vector.extract_strided_slice %179 {offsets = [0, 0], sizes = [8, 128], strides = [1, 1]} : vector<8x384xf32> to vector<8x128xf32>
    %181 = vector.extract_strided_slice %179 {offsets = [0, 128], sizes = [8, 128], strides = [1, 1]} : vector<8x384xf32> to vector<8x128xf32>
    %182 = vector.extract_strided_slice %179 {offsets = [0, 256], sizes = [8, 128], strides = [1, 1]} : vector<8x384xf32> to vector<8x128xf32>
    %183 = vector.extract_strided_slice %173 {offsets = [0, 384], sizes = [8, 128], strides = [1, 1]} : vector<8x512xf32> to vector<8x128xf32>
    %184 = math.tanh %183 : vector<8x128xf32>
    %185 = arith.mulf %181, %144 : vector<8x128xf32>
    %186 = arith.mulf %180, %184 : vector<8x128xf32>
    %187 = arith.addf %185, %186 : vector<8x128xf32>
    %188 = math.tanh %187 : vector<8x128xf32>
    %189 = arith.mulf %182, %188 : vector<8x128xf32>
    %190 = vector.extract_strided_slice %13 {offsets = [32, 0], sizes = [8, 512], strides = [1, 1]} : vector<64x512xf32> to vector<8x512xf32>
    %191 = arith.truncf %189 : vector<8x128xf32> to vector<8x128xbf16>
    %cst_33 = arith.constant dense<0.000000e+00> : vector<8x512xf32>
    %192 = tpu.matmul %191, %7, %cst_33 {dimension_numbers = #tpu.dot_dimension_numbers<[1], [0], [0], [1], [0, 0, 1, 1], [], []>} : vector<8x128xbf16>, vector<128x512xbf16>, vector<8x512xf32> -> vector<8x512xf32>
    %193 = arith.truncf %168 : vector<8x128xf32> to vector<8x128xbf16>
    %cst_34 = arith.constant dense<0.000000e+00> : vector<8x512xf32>
    %194 = tpu.matmul %193, %5, %cst_34 {dimension_numbers = #tpu.dot_dimension_numbers<[1], [0], [0], [1], [0, 0, 1, 1], [], []>} : vector<8x128xbf16>, vector<128x512xbf16>, vector<8x512xf32> -> vector<8x512xf32>
    %195 = arith.addf %190, %194 : vector<8x512xf32>
    %196 = vector.extract_strided_slice %195 {offsets = [0, 0], sizes = [8, 384], strides = [1, 1]} : vector<8x512xf32> to vector<8x384xf32>
    %197 = arith.negf %196 : vector<8x384xf32>
    %198 = math.exp %197 : vector<8x384xf32>
    %cst_35 = arith.constant 1.000000e+00 : f32
    %199 = vector.broadcast %cst_35 : f32 to vector<8x384xf32>
    %200 = arith.addf %199, %198 : vector<8x384xf32>
    %201 = arith.divf %199, %200 : vector<8x384xf32>
    %202 = vector.extract_strided_slice %201 {offsets = [0, 0], sizes = [8, 128], strides = [1, 1]} : vector<8x384xf32> to vector<8x128xf32>
    %203 = vector.extract_strided_slice %201 {offsets = [0, 128], sizes = [8, 128], strides = [1, 1]} : vector<8x384xf32> to vector<8x128xf32>
    %204 = vector.extract_strided_slice %201 {offsets = [0, 256], sizes = [8, 128], strides = [1, 1]} : vector<8x384xf32> to vector<8x128xf32>
    %205 = vector.extract_strided_slice %195 {offsets = [0, 384], sizes = [8, 128], strides = [1, 1]} : vector<8x512xf32> to vector<8x128xf32>
    %206 = math.tanh %205 : vector<8x128xf32>
    %207 = arith.mulf %203, %166 : vector<8x128xf32>
    %208 = arith.mulf %202, %206 : vector<8x128xf32>
    %209 = arith.addf %207, %208 : vector<8x128xf32>
    %210 = math.tanh %209 : vector<8x128xf32>
    %211 = arith.mulf %204, %210 : vector<8x128xf32>
    %212 = arith.truncf %211 : vector<8x128xf32> to vector<8x128xbf16>
    %cst_36 = arith.constant dense<0.000000e+00> : vector<8x512xf32>
    %213 = tpu.matmul %212, %6, %cst_36 {dimension_numbers = #tpu.dot_dimension_numbers<[1], [0], [0], [1], [0, 0, 1, 1], [], []>} : vector<8x128xbf16>, vector<128x512xbf16>, vector<8x512xf32> -> vector<8x512xf32>
    %214 = arith.addf %213, %192 : vector<8x512xf32>
    %215 = vector.broadcast %9 : vector<1x512xf32> to vector<8x512xf32>
    %216 = arith.addf %214, %215 : vector<8x512xf32>
    %217 = vector.extract_strided_slice %216 {offsets = [0, 0], sizes = [8, 384], strides = [1, 1]} : vector<8x512xf32> to vector<8x384xf32>
    %218 = arith.negf %217 : vector<8x384xf32>
    %219 = math.exp %218 : vector<8x384xf32>
    %cst_37 = arith.constant 1.000000e+00 : f32
    %220 = vector.broadcast %cst_37 : f32 to vector<8x384xf32>
    %221 = arith.addf %220, %219 : vector<8x384xf32>
    %222 = arith.divf %220, %221 : vector<8x384xf32>
    %223 = vector.extract_strided_slice %222 {offsets = [0, 0], sizes = [8, 128], strides = [1, 1]} : vector<8x384xf32> to vector<8x128xf32>
    %224 = vector.extract_strided_slice %222 {offsets = [0, 128], sizes = [8, 128], strides = [1, 1]} : vector<8x384xf32> to vector<8x128xf32>
    %225 = vector.extract_strided_slice %222 {offsets = [0, 256], sizes = [8, 128], strides = [1, 1]} : vector<8x384xf32> to vector<8x128xf32>
    %226 = vector.extract_strided_slice %216 {offsets = [0, 384], sizes = [8, 128], strides = [1, 1]} : vector<8x512xf32> to vector<8x128xf32>
    %227 = math.tanh %226 : vector<8x128xf32>
    %228 = arith.mulf %224, %187 : vector<8x128xf32>
    %229 = arith.mulf %223, %227 : vector<8x128xf32>
    %230 = arith.addf %228, %229 : vector<8x128xf32>
    %231 = math.tanh %230 : vector<8x128xf32>
    %232 = arith.mulf %225, %231 : vector<8x128xf32>
    %233 = vector.extract_strided_slice %13 {offsets = [40, 0], sizes = [8, 512], strides = [1, 1]} : vector<64x512xf32> to vector<8x512xf32>
    %234 = arith.truncf %232 : vector<8x128xf32> to vector<8x128xbf16>
    %cst_38 = arith.constant dense<0.000000e+00> : vector<8x512xf32>
    %235 = tpu.matmul %234, %7, %cst_38 {dimension_numbers = #tpu.dot_dimension_numbers<[1], [0], [0], [1], [0, 0, 1, 1], [], []>} : vector<8x128xbf16>, vector<128x512xbf16>, vector<8x512xf32> -> vector<8x512xf32>
    %236 = arith.truncf %211 : vector<8x128xf32> to vector<8x128xbf16>
    %cst_39 = arith.constant dense<0.000000e+00> : vector<8x512xf32>
    %237 = tpu.matmul %236, %5, %cst_39 {dimension_numbers = #tpu.dot_dimension_numbers<[1], [0], [0], [1], [0, 0, 1, 1], [], []>} : vector<8x128xbf16>, vector<128x512xbf16>, vector<8x512xf32> -> vector<8x512xf32>
    %238 = arith.addf %233, %237 : vector<8x512xf32>
    %239 = vector.extract_strided_slice %238 {offsets = [0, 0], sizes = [8, 384], strides = [1, 1]} : vector<8x512xf32> to vector<8x384xf32>
    %240 = arith.negf %239 : vector<8x384xf32>
    %241 = math.exp %240 : vector<8x384xf32>
    %cst_40 = arith.constant 1.000000e+00 : f32
    %242 = vector.broadcast %cst_40 : f32 to vector<8x384xf32>
    %243 = arith.addf %242, %241 : vector<8x384xf32>
    %244 = arith.divf %242, %243 : vector<8x384xf32>
    %245 = vector.extract_strided_slice %244 {offsets = [0, 0], sizes = [8, 128], strides = [1, 1]} : vector<8x384xf32> to vector<8x128xf32>
    %246 = vector.extract_strided_slice %244 {offsets = [0, 128], sizes = [8, 128], strides = [1, 1]} : vector<8x384xf32> to vector<8x128xf32>
    %247 = vector.extract_strided_slice %244 {offsets = [0, 256], sizes = [8, 128], strides = [1, 1]} : vector<8x384xf32> to vector<8x128xf32>
    %248 = vector.extract_strided_slice %238 {offsets = [0, 384], sizes = [8, 128], strides = [1, 1]} : vector<8x512xf32> to vector<8x128xf32>
    %249 = math.tanh %248 : vector<8x128xf32>
    %250 = arith.mulf %246, %209 : vector<8x128xf32>
    %251 = arith.mulf %245, %249 : vector<8x128xf32>
    %252 = arith.addf %250, %251 : vector<8x128xf32>
    %253 = math.tanh %252 : vector<8x128xf32>
    %254 = arith.mulf %247, %253 : vector<8x128xf32>
    %255 = arith.truncf %254 : vector<8x128xf32> to vector<8x128xbf16>
    %cst_41 = arith.constant dense<0.000000e+00> : vector<8x512xf32>
    %256 = tpu.matmul %255, %6, %cst_41 {dimension_numbers = #tpu.dot_dimension_numbers<[1], [0], [0], [1], [0, 0, 1, 1], [], []>} : vector<8x128xbf16>, vector<128x512xbf16>, vector<8x512xf32> -> vector<8x512xf32>
    %257 = arith.addf %256, %235 : vector<8x512xf32>
    %258 = vector.broadcast %9 : vector<1x512xf32> to vector<8x512xf32>
    %259 = arith.addf %257, %258 : vector<8x512xf32>
    %260 = vector.extract_strided_slice %259 {offsets = [0, 0], sizes = [8, 384], strides = [1, 1]} : vector<8x512xf32> to vector<8x384xf32>
    %261 = arith.negf %260 : vector<8x384xf32>
    %262 = math.exp %261 : vector<8x384xf32>
    %cst_42 = arith.constant 1.000000e+00 : f32
    %263 = vector.broadcast %cst_42 : f32 to vector<8x384xf32>
    %264 = arith.addf %263, %262 : vector<8x384xf32>
    %265 = arith.divf %263, %264 : vector<8x384xf32>
    %266 = vector.extract_strided_slice %265 {offsets = [0, 0], sizes = [8, 128], strides = [1, 1]} : vector<8x384xf32> to vector<8x128xf32>
    %267 = vector.extract_strided_slice %265 {offsets = [0, 128], sizes = [8, 128], strides = [1, 1]} : vector<8x384xf32> to vector<8x128xf32>
    %268 = vector.extract_strided_slice %265 {offsets = [0, 256], sizes = [8, 128], strides = [1, 1]} : vector<8x384xf32> to vector<8x128xf32>
    %269 = vector.extract_strided_slice %259 {offsets = [0, 384], sizes = [8, 128], strides = [1, 1]} : vector<8x512xf32> to vector<8x128xf32>
    %270 = math.tanh %269 : vector<8x128xf32>
    %271 = arith.mulf %267, %230 : vector<8x128xf32>
    %272 = arith.mulf %266, %270 : vector<8x128xf32>
    %273 = arith.addf %271, %272 : vector<8x128xf32>
    %274 = math.tanh %273 : vector<8x128xf32>
    %275 = arith.mulf %268, %274 : vector<8x128xf32>
    %276 = vector.extract_strided_slice %13 {offsets = [48, 0], sizes = [8, 512], strides = [1, 1]} : vector<64x512xf32> to vector<8x512xf32>
    %277 = arith.truncf %275 : vector<8x128xf32> to vector<8x128xbf16>
    %cst_43 = arith.constant dense<0.000000e+00> : vector<8x512xf32>
    %278 = tpu.matmul %277, %7, %cst_43 {dimension_numbers = #tpu.dot_dimension_numbers<[1], [0], [0], [1], [0, 0, 1, 1], [], []>} : vector<8x128xbf16>, vector<128x512xbf16>, vector<8x512xf32> -> vector<8x512xf32>
    %279 = arith.truncf %254 : vector<8x128xf32> to vector<8x128xbf16>
    %cst_44 = arith.constant dense<0.000000e+00> : vector<8x512xf32>
    %280 = tpu.matmul %279, %5, %cst_44 {dimension_numbers = #tpu.dot_dimension_numbers<[1], [0], [0], [1], [0, 0, 1, 1], [], []>} : vector<8x128xbf16>, vector<128x512xbf16>, vector<8x512xf32> -> vector<8x512xf32>
    %281 = arith.addf %276, %280 : vector<8x512xf32>
    %282 = vector.extract_strided_slice %281 {offsets = [0, 0], sizes = [8, 384], strides = [1, 1]} : vector<8x512xf32> to vector<8x384xf32>
    %283 = arith.negf %282 : vector<8x384xf32>
    %284 = math.exp %283 : vector<8x384xf32>
    %cst_45 = arith.constant 1.000000e+00 : f32
    %285 = vector.broadcast %cst_45 : f32 to vector<8x384xf32>
    %286 = arith.addf %285, %284 : vector<8x384xf32>
    %287 = arith.divf %285, %286 : vector<8x384xf32>
    %288 = vector.extract_strided_slice %287 {offsets = [0, 0], sizes = [8, 128], strides = [1, 1]} : vector<8x384xf32> to vector<8x128xf32>
    %289 = vector.extract_strided_slice %287 {offsets = [0, 128], sizes = [8, 128], strides = [1, 1]} : vector<8x384xf32> to vector<8x128xf32>
    %290 = vector.extract_strided_slice %287 {offsets = [0, 256], sizes = [8, 128], strides = [1, 1]} : vector<8x384xf32> to vector<8x128xf32>
    %291 = vector.extract_strided_slice %281 {offsets = [0, 384], sizes = [8, 128], strides = [1, 1]} : vector<8x512xf32> to vector<8x128xf32>
    %292 = math.tanh %291 : vector<8x128xf32>
    %293 = arith.mulf %289, %252 : vector<8x128xf32>
    %294 = arith.mulf %288, %292 : vector<8x128xf32>
    %295 = arith.addf %293, %294 : vector<8x128xf32>
    %296 = math.tanh %295 : vector<8x128xf32>
    %297 = arith.mulf %290, %296 : vector<8x128xf32>
    %298 = arith.truncf %297 : vector<8x128xf32> to vector<8x128xbf16>
    %cst_46 = arith.constant dense<0.000000e+00> : vector<8x512xf32>
    %299 = tpu.matmul %298, %6, %cst_46 {dimension_numbers = #tpu.dot_dimension_numbers<[1], [0], [0], [1], [0, 0, 1, 1], [], []>} : vector<8x128xbf16>, vector<128x512xbf16>, vector<8x512xf32> -> vector<8x512xf32>
    %300 = arith.addf %299, %278 : vector<8x512xf32>
    %301 = vector.broadcast %9 : vector<1x512xf32> to vector<8x512xf32>
    %302 = arith.addf %300, %301 : vector<8x512xf32>
    %303 = vector.extract_strided_slice %302 {offsets = [0, 0], sizes = [8, 384], strides = [1, 1]} : vector<8x512xf32> to vector<8x384xf32>
    %304 = arith.negf %303 : vector<8x384xf32>
    %305 = math.exp %304 : vector<8x384xf32>
    %cst_47 = arith.constant 1.000000e+00 : f32
    %306 = vector.broadcast %cst_47 : f32 to vector<8x384xf32>
    %307 = arith.addf %306, %305 : vector<8x384xf32>
    %308 = arith.divf %306, %307 : vector<8x384xf32>
    %309 = vector.extract_strided_slice %308 {offsets = [0, 0], sizes = [8, 128], strides = [1, 1]} : vector<8x384xf32> to vector<8x128xf32>
    %310 = vector.extract_strided_slice %308 {offsets = [0, 128], sizes = [8, 128], strides = [1, 1]} : vector<8x384xf32> to vector<8x128xf32>
    %311 = vector.extract_strided_slice %308 {offsets = [0, 256], sizes = [8, 128], strides = [1, 1]} : vector<8x384xf32> to vector<8x128xf32>
    %312 = vector.extract_strided_slice %302 {offsets = [0, 384], sizes = [8, 128], strides = [1, 1]} : vector<8x512xf32> to vector<8x128xf32>
    %313 = math.tanh %312 : vector<8x128xf32>
    %314 = arith.mulf %310, %273 : vector<8x128xf32>
    %315 = arith.mulf %309, %313 : vector<8x128xf32>
    %316 = arith.addf %314, %315 : vector<8x128xf32>
    %317 = math.tanh %316 : vector<8x128xf32>
    %318 = arith.mulf %311, %317 : vector<8x128xf32>
    %319 = vector.extract_strided_slice %13 {offsets = [56, 0], sizes = [8, 512], strides = [1, 1]} : vector<64x512xf32> to vector<8x512xf32>
    %320 = arith.truncf %318 : vector<8x128xf32> to vector<8x128xbf16>
    %cst_48 = arith.constant dense<0.000000e+00> : vector<8x512xf32>
    %321 = tpu.matmul %320, %7, %cst_48 {dimension_numbers = #tpu.dot_dimension_numbers<[1], [0], [0], [1], [0, 0, 1, 1], [], []>} : vector<8x128xbf16>, vector<128x512xbf16>, vector<8x512xf32> -> vector<8x512xf32>
    %322 = arith.truncf %297 : vector<8x128xf32> to vector<8x128xbf16>
    %cst_49 = arith.constant dense<0.000000e+00> : vector<8x512xf32>
    %323 = tpu.matmul %322, %5, %cst_49 {dimension_numbers = #tpu.dot_dimension_numbers<[1], [0], [0], [1], [0, 0, 1, 1], [], []>} : vector<8x128xbf16>, vector<128x512xbf16>, vector<8x512xf32> -> vector<8x512xf32>
    %324 = arith.addf %319, %323 : vector<8x512xf32>
    %325 = vector.extract_strided_slice %324 {offsets = [0, 0], sizes = [8, 384], strides = [1, 1]} : vector<8x512xf32> to vector<8x384xf32>
    %326 = arith.negf %325 : vector<8x384xf32>
    %327 = math.exp %326 : vector<8x384xf32>
    %cst_50 = arith.constant 1.000000e+00 : f32
    %328 = vector.broadcast %cst_50 : f32 to vector<8x384xf32>
    %329 = arith.addf %328, %327 : vector<8x384xf32>
    %330 = arith.divf %328, %329 : vector<8x384xf32>
    %331 = vector.extract_strided_slice %330 {offsets = [0, 0], sizes = [8, 128], strides = [1, 1]} : vector<8x384xf32> to vector<8x128xf32>
    %332 = vector.extract_strided_slice %330 {offsets = [0, 128], sizes = [8, 128], strides = [1, 1]} : vector<8x384xf32> to vector<8x128xf32>
    %333 = vector.extract_strided_slice %330 {offsets = [0, 256], sizes = [8, 128], strides = [1, 1]} : vector<8x384xf32> to vector<8x128xf32>
    %334 = vector.extract_strided_slice %324 {offsets = [0, 384], sizes = [8, 128], strides = [1, 1]} : vector<8x512xf32> to vector<8x128xf32>
    %335 = math.tanh %334 : vector<8x128xf32>
    %336 = arith.mulf %332, %295 : vector<8x128xf32>
    %337 = arith.mulf %331, %335 : vector<8x128xf32>
    %338 = arith.addf %336, %337 : vector<8x128xf32>
    %339 = math.tanh %338 : vector<8x128xf32>
    %340 = arith.mulf %333, %339 : vector<8x128xf32>
    %341 = arith.truncf %340 : vector<8x128xf32> to vector<8x128xbf16>
    %cst_51 = arith.constant dense<0.000000e+00> : vector<8x512xf32>
    %342 = tpu.matmul %341, %6, %cst_51 {dimension_numbers = #tpu.dot_dimension_numbers<[1], [0], [0], [1], [0, 0, 1, 1], [], []>} : vector<8x128xbf16>, vector<128x512xbf16>, vector<8x512xf32> -> vector<8x512xf32>
    %343 = arith.addf %342, %321 : vector<8x512xf32>
    %344 = vector.broadcast %9 : vector<1x512xf32> to vector<8x512xf32>
    %345 = arith.addf %343, %344 : vector<8x512xf32>
    %346 = vector.extract_strided_slice %345 {offsets = [0, 0], sizes = [8, 384], strides = [1, 1]} : vector<8x512xf32> to vector<8x384xf32>
    %347 = arith.negf %346 : vector<8x384xf32>
    %348 = math.exp %347 : vector<8x384xf32>
    %cst_52 = arith.constant 1.000000e+00 : f32
    %349 = vector.broadcast %cst_52 : f32 to vector<8x384xf32>
    %350 = arith.addf %349, %348 : vector<8x384xf32>
    %351 = arith.divf %349, %350 : vector<8x384xf32>
    %352 = vector.extract_strided_slice %351 {offsets = [0, 0], sizes = [8, 128], strides = [1, 1]} : vector<8x384xf32> to vector<8x128xf32>
    %353 = vector.extract_strided_slice %351 {offsets = [0, 128], sizes = [8, 128], strides = [1, 1]} : vector<8x384xf32> to vector<8x128xf32>
    %354 = vector.extract_strided_slice %351 {offsets = [0, 256], sizes = [8, 128], strides = [1, 1]} : vector<8x384xf32> to vector<8x128xf32>
    %355 = vector.extract_strided_slice %345 {offsets = [0, 384], sizes = [8, 128], strides = [1, 1]} : vector<8x512xf32> to vector<8x128xf32>
    %356 = math.tanh %355 : vector<8x128xf32>
    %357 = arith.mulf %353, %316 : vector<8x128xf32>
    %358 = arith.mulf %352, %356 : vector<8x128xf32>
    %359 = arith.addf %357, %358 : vector<8x128xf32>
    %360 = math.tanh %359 : vector<8x128xf32>
    %361 = arith.mulf %354, %360 : vector<8x128xf32>
    %c0_i32_53 = arith.constant 0 : i32
    %362 = tpu.memref_slice %arg8[%c0_i32_53] : memref<2x!tpu.dma_semaphore, #tpu.memory_space<semaphore_mem>> -> memref<1x!tpu.dma_semaphore, #tpu.memory_space<semaphore_mem>>
    %363 = tpu.memref_squeeze %362 : memref<1x!tpu.dma_semaphore, #tpu.memory_space<semaphore_mem>> -> memref<!tpu.dma_semaphore, #tpu.memory_space<semaphore_mem>>
    tpu.wait_dma2 semaphore(%363 : memref<!tpu.dma_semaphore, #tpu.memory_space<semaphore_mem>>) src(%arg2 : memref<640x256xbf16, #tpu.memory_space<any>>) dst(%arg6 : memref<640x256xbf16, #tpu.memory_space<vmem>>)
    %c1_i32_54 = arith.constant 1 : i32
    %364 = tpu.memref_slice %arg8[%c1_i32_54] : memref<2x!tpu.dma_semaphore, #tpu.memory_space<semaphore_mem>> -> memref<1x!tpu.dma_semaphore, #tpu.memory_space<semaphore_mem>>
    %365 = tpu.memref_squeeze %364 : memref<1x!tpu.dma_semaphore, #tpu.memory_space<semaphore_mem>> -> memref<!tpu.dma_semaphore, #tpu.memory_space<semaphore_mem>>
    tpu.wait_dma2 semaphore(%365 : memref<!tpu.dma_semaphore, #tpu.memory_space<semaphore_mem>>) src(%arg3 : memref<512x128xbf16, #tpu.memory_space<any>>) dst(%arg7 : memref<512x128xbf16, #tpu.memory_space<vmem>>)
    %c0_55 = arith.constant 0 : index
    %c0_56 = arith.constant 0 : index
    %366 = vector.load %arg7[%c0_55, %c0_56] : memref<512x128xbf16, #tpu.memory_space<vmem>>, vector<128x128xbf16>
    %c128 = arith.constant 128 : index
    %c0_57 = arith.constant 0 : index
    %367 = vector.load %arg7[%c128, %c0_57] : memref<512x128xbf16, #tpu.memory_space<vmem>>, vector<256x128xbf16>
    %c384 = arith.constant 384 : index
    %c0_58 = arith.constant 0 : index
    %368 = vector.load %arg7[%c384, %c0_58] : memref<512x128xbf16, #tpu.memory_space<vmem>>, vector<128x128xbf16>
    %c0_59 = arith.constant 0 : index
    %c0_60 = arith.constant 0 : index
    %369 = vector.load %arg6[%c0_59, %c0_60] : memref<640x256xbf16, #tpu.memory_space<vmem>>, vector<128x256xbf16>
    %c128_61 = arith.constant 128 : index
    %c0_62 = arith.constant 0 : index
    %370 = vector.load %arg6[%c128_61, %c0_62] : memref<640x256xbf16, #tpu.memory_space<vmem>>, vector<256x256xbf16>
    %c384_63 = arith.constant 384 : index
    %c0_64 = arith.constant 0 : index
    %371 = vector.load %arg6[%c384_63, %c0_64] : memref<640x256xbf16, #tpu.memory_space<vmem>>, vector<256x256xbf16>
    %372 = arith.truncf %361 : vector<8x128xf32> to vector<8x128xbf16>
    %cst_65 = arith.constant dense<0.000000e+00> : vector<8x128xf32>
    %373 = tpu.matmul %372, %366, %cst_65 {dimension_numbers = #tpu.dot_dimension_numbers<[1], [0], [0], [1], [0, 0, 1, 1], [], []>} : vector<8x128xbf16>, vector<128x128xbf16>, vector<8x128xf32> -> vector<8x128xf32>
    %c0_66 = arith.constant 0 : index
    %c1024 = arith.constant 1024 : index
    %374 = vector.load %arg4[%c0_66, %c1024] : memref<1x2944xf32, #tpu.memory_space<vmem>>, vector<1x128xf32>
    %375 = vector.broadcast %374 : vector<1x128xf32> to vector<8x128xf32>
    %376 = arith.addf %373, %375 : vector<8x128xf32>
    %c0_67 = arith.constant 0 : index
    %c1152 = arith.constant 1152 : index
    %377 = vector.load %arg4[%c0_67, %c1152] : memref<1x2944xf32, #tpu.memory_space<vmem>>, vector<1x128xf32>
    %c0_68 = arith.constant 0 : index
    %c1280 = arith.constant 1280 : index
    %378 = vector.load %arg4[%c0_68, %c1280] : memref<1x2944xf32, #tpu.memory_space<vmem>>, vector<1x128xf32>
    %cst_69 = arith.constant dense<0.000000e+00> : vector<8xf32>
    %379 = vector.multi_reduction <add>, %376, %cst_69 [1] : vector<8x128xf32> to vector<8xf32>
    %380 = vector.shape_cast %379 : vector<8xf32> to vector<8x1xf32>
    %cst_70 = arith.constant 1.280000e+02 : f32
    %381 = vector.broadcast %cst_70 : f32 to vector<8x1xf32>
    %382 = arith.divf %380, %381 : vector<8x1xf32>
    %383 = arith.mulf %376, %376 : vector<8x128xf32>
    %cst_71 = arith.constant dense<0.000000e+00> : vector<8xf32>
    %384 = vector.multi_reduction <add>, %383, %cst_71 [1] : vector<8x128xf32> to vector<8xf32>
    %385 = vector.shape_cast %384 : vector<8xf32> to vector<8x1xf32>
    %cst_72 = arith.constant 1.280000e+02 : f32
    %386 = vector.broadcast %cst_72 : f32 to vector<8x1xf32>
    %387 = arith.divf %385, %386 : vector<8x1xf32>
    %388 = arith.mulf %382, %382 : vector<8x1xf32>
    %389 = arith.subf %387, %388 : vector<8x1xf32>
    %390 = vector.broadcast %382 : vector<8x1xf32> to vector<8x128xf32>
    %391 = arith.subf %376, %390 : vector<8x128xf32>
    %cst_73 = arith.constant 9.99999974E-6 : f32
    %392 = vector.broadcast %cst_73 : f32 to vector<8x1xf32>
    %393 = arith.addf %389, %392 : vector<8x1xf32>
    %394 = math.rsqrt %393 : vector<8x1xf32>
    %395 = vector.broadcast %394 : vector<8x1xf32> to vector<8x128xf32>
    %396 = arith.mulf %391, %395 : vector<8x128xf32>
    %397 = vector.broadcast %377 : vector<1x128xf32> to vector<8x128xf32>
    %398 = arith.mulf %396, %397 : vector<8x128xf32>
    %399 = vector.broadcast %378 : vector<1x128xf32> to vector<8x128xf32>
    %400 = arith.addf %398, %399 : vector<8x128xf32>
    %cst_74 = arith.constant 0.000000e+00 : f32
    %401 = vector.broadcast %cst_74 : f32 to vector<8x128xf32>
    %402 = arith.maximumf %400, %401 : vector<8x128xf32>
    %403 = arith.truncf %402 : vector<8x128xf32> to vector<8x128xbf16>
    %cst_75 = arith.constant dense<0.000000e+00> : vector<8x256xf32>
    %404 = tpu.matmul %403, %369, %cst_75 {dimension_numbers = #tpu.dot_dimension_numbers<[1], [0], [0], [1], [0, 0, 1, 1], [], []>} : vector<8x128xbf16>, vector<128x256xbf16>, vector<8x256xf32> -> vector<8x256xf32>
    %c0_76 = arith.constant 0 : index
    %c1408 = arith.constant 1408 : index
    %405 = vector.load %arg4[%c0_76, %c1408] : memref<1x2944xf32, #tpu.memory_space<vmem>>, vector<1x256xf32>
    %406 = vector.broadcast %405 : vector<1x256xf32> to vector<8x256xf32>
    %407 = arith.addf %404, %406 : vector<8x256xf32>
    %cst_77 = arith.constant 0.000000e+00 : f32
    %408 = vector.broadcast %cst_77 : f32 to vector<8x256xf32>
    %409 = arith.maximumf %407, %408 : vector<8x256xf32>
    %410 = arith.truncf %409 : vector<8x256xf32> to vector<8x256xbf16>
    %cst_78 = arith.constant dense<0.000000e+00> : vector<8x256xf32>
    %411 = tpu.matmul %410, %370, %cst_78 {dimension_numbers = #tpu.dot_dimension_numbers<[1], [0], [0], [1], [0, 0, 1, 1], [], []>} : vector<8x256xbf16>, vector<256x256xbf16>, vector<8x256xf32> -> vector<8x256xf32>
    %c0_79 = arith.constant 0 : index
    %c1664 = arith.constant 1664 : index
    %412 = vector.load %arg4[%c0_79, %c1664] : memref<1x2944xf32, #tpu.memory_space<vmem>>, vector<1x256xf32>
    %413 = vector.broadcast %412 : vector<1x256xf32> to vector<8x256xf32>
    %414 = arith.addf %411, %413 : vector<8x256xf32>
    %c0_80 = arith.constant 0 : index
    %c1920 = arith.constant 1920 : index
    %415 = vector.load %arg4[%c0_80, %c1920] : memref<1x2944xf32, #tpu.memory_space<vmem>>, vector<1x256xf32>
    %c0_81 = arith.constant 0 : index
    %c2176 = arith.constant 2176 : index
    %416 = vector.load %arg4[%c0_81, %c2176] : memref<1x2944xf32, #tpu.memory_space<vmem>>, vector<1x256xf32>
    %cst_82 = arith.constant dense<0.000000e+00> : vector<8xf32>
    %417 = vector.multi_reduction <add>, %414, %cst_82 [1] : vector<8x256xf32> to vector<8xf32>
    %418 = vector.shape_cast %417 : vector<8xf32> to vector<8x1xf32>
    %cst_83 = arith.constant 2.560000e+02 : f32
    %419 = vector.broadcast %cst_83 : f32 to vector<8x1xf32>
    %420 = arith.divf %418, %419 : vector<8x1xf32>
    %421 = arith.mulf %414, %414 : vector<8x256xf32>
    %cst_84 = arith.constant dense<0.000000e+00> : vector<8xf32>
    %422 = vector.multi_reduction <add>, %421, %cst_84 [1] : vector<8x256xf32> to vector<8xf32>
    %423 = vector.shape_cast %422 : vector<8xf32> to vector<8x1xf32>
    %cst_85 = arith.constant 2.560000e+02 : f32
    %424 = vector.broadcast %cst_85 : f32 to vector<8x1xf32>
    %425 = arith.divf %423, %424 : vector<8x1xf32>
    %426 = arith.mulf %420, %420 : vector<8x1xf32>
    %427 = arith.subf %425, %426 : vector<8x1xf32>
    %428 = vector.broadcast %420 : vector<8x1xf32> to vector<8x256xf32>
    %429 = arith.subf %414, %428 : vector<8x256xf32>
    %cst_86 = arith.constant 9.99999974E-6 : f32
    %430 = vector.broadcast %cst_86 : f32 to vector<8x1xf32>
    %431 = arith.addf %427, %430 : vector<8x1xf32>
    %432 = math.rsqrt %431 : vector<8x1xf32>
    %433 = vector.broadcast %432 : vector<8x1xf32> to vector<8x256xf32>
    %434 = arith.mulf %429, %433 : vector<8x256xf32>
    %435 = vector.broadcast %415 : vector<1x256xf32> to vector<8x256xf32>
    %436 = arith.mulf %434, %435 : vector<8x256xf32>
    %437 = vector.broadcast %416 : vector<1x256xf32> to vector<8x256xf32>
    %438 = arith.addf %436, %437 : vector<8x256xf32>
    %cst_87 = arith.constant 0.000000e+00 : f32
    %439 = vector.broadcast %cst_87 : f32 to vector<8x256xf32>
    %440 = arith.maximumf %438, %439 : vector<8x256xf32>
    %441 = arith.truncf %440 : vector<8x256xf32> to vector<8x256xbf16>
    %cst_88 = arith.constant dense<0.000000e+00> : vector<8x256xf32>
    %442 = tpu.matmul %441, %371, %cst_88 {dimension_numbers = #tpu.dot_dimension_numbers<[1], [0], [0], [1], [0, 0, 1, 1], [], []>} : vector<8x256xbf16>, vector<256x256xbf16>, vector<8x256xf32> -> vector<8x256xf32>
    %c0_89 = arith.constant 0 : index
    %c2432 = arith.constant 2432 : index
    %443 = vector.load %arg4[%c0_89, %c2432] : memref<1x2944xf32, #tpu.memory_space<vmem>>, vector<1x256xf32>
    %444 = vector.broadcast %443 : vector<1x256xf32> to vector<8x256xf32>
    %445 = arith.addf %442, %444 : vector<8x256xf32>
    %cst_90 = arith.constant 0.000000e+00 : f32
    %446 = vector.broadcast %cst_90 : f32 to vector<8x256xf32>
    %447 = arith.maximumf %445, %446 : vector<8x256xf32>
    %448 = arith.truncf %447 : vector<8x256xf32> to vector<8x256xbf16>
    %cst_91 = arith.constant dense<0.000000e+00> : vector<8x128xf32>
    %449 = tpu.matmul %448, %367, %cst_91 {dimension_numbers = #tpu.dot_dimension_numbers<[1], [0], [0], [1], [0, 0, 1, 1], [], []>} : vector<8x256xbf16>, vector<256x128xbf16>, vector<8x128xf32> -> vector<8x128xf32>
    %c0_92 = arith.constant 0 : index
    %c2688 = arith.constant 2688 : index
    %450 = vector.load %arg4[%c0_92, %c2688] : memref<1x2944xf32, #tpu.memory_space<vmem>>, vector<1x128xf32>
    %451 = vector.broadcast %450 : vector<1x128xf32> to vector<8x128xf32>
    %452 = arith.addf %449, %451 : vector<8x128xf32>
    %cst_93 = arith.constant 0.000000e+00 : f32
    %453 = vector.broadcast %cst_93 : f32 to vector<8x128xf32>
    %454 = arith.maximumf %452, %453 : vector<8x128xf32>
    %455 = arith.truncf %454 : vector<8x128xf32> to vector<8x128xbf16>
    %cst_94 = arith.constant dense<0.000000e+00> : vector<8x128xf32>
    %456 = tpu.matmul %455, %368, %cst_94 {dimension_numbers = #tpu.dot_dimension_numbers<[1], [0], [0], [1], [0, 0, 1, 1], [], []>} : vector<8x128xbf16>, vector<128x128xbf16>, vector<8x128xf32> -> vector<8x128xf32>
    %c0_95 = arith.constant 0 : index
    %c2816 = arith.constant 2816 : index
    %457 = vector.load %arg4[%c0_95, %c2816] : memref<1x2944xf32, #tpu.memory_space<vmem>>, vector<1x128xf32>
    %458 = vector.broadcast %457 : vector<1x128xf32> to vector<8x128xf32>
    %459 = arith.addf %456, %458 : vector<8x128xf32>
    %460 = math.tanh %459 : vector<8x128xf32>
    %c0_96 = arith.constant 0 : index
    %c0_97 = arith.constant 0 : index
    %461 = vector.load %arg5[%c0_96, %c0_97] : memref<8x128xf32, #tpu.memory_space<vmem>>, vector<8x128xf32>
    tpu.vector_store %arg5[%c0_96, %c0_97], %460 {strides = array<i32>} : memref<8x128xf32, #tpu.memory_space<vmem>>, vector<8x128xf32>,
    return
  }
}

</mosaic_0001>

<bundles_post_ra>
// kernel: policy_forward.1
= control target key start
LH: loop header
LB: loop body
LE: loop exit
PB: predicated region body
PF: predicated region fallthrough
CT: control target
= control target key end

     0   :  { %10 = vsyncpa [#allocation6], 0  ;;  %s4795_s18 = smov [#allocation5]   ;;  %s6770_s0 = inlined_call_operand.vmem [shape: bf16[64,16], index: 0, kind: input, shape index: {}]   ;;  %s6771_s1 = inlined_call_operand.hbm [shape: bf16[400,512], index: 1, kind: input, shape index: {}]   ;;  %s6772_s2 = inlined_call_operand.hbm [shape: bf16[640,256], index: 2, kind: input, shape index: {}]   ;;  %s6773_s3 = inlined_call_operand.hbm [shape: bf16[512,128], index: 3, kind: input, shape index: {}]   ;;  %s6774_s4 = inlined_call_operand.vmem [shape: f32[1,2944], index: 4, kind: input, shape index: {}]   ;;  %s6775_s5 = inlined_call_operand.vmem [shape: f32[8,128], index: 5, kind: output, shape index: {}]  }
   0x1   :  { %s18_s19 = sshll.u32 %s4795_s18, 4  ;;  %s4745_s22 = scalar_lea.hbm %s6771_s1, 12800  ;;  %s19_s19 = int_to_ptr.vmem [resolvable:$true] %s18_s19 }
   0x2   :  { %p4746_p0 = scmp.ne.s32.totalorder %s6771_s1, %s4745_s22  ;;  %p4749_p1 = scmp.lt.u32.totalorder %s4745_s22, %s6771_s1 }
   0x4   :  { %p4751_p2 = pnand %p4749_p1, %p4746_p0 }
   0x6   :  { %4754 = shalt.err (!%p4751_p2)
}
   0x7   :  { %s4755_s27 = scalar_lea.vmem %s19_s19, 12800  ;;  %p4760_p4 = scmp.lt.s32.totalorder %s19_s19, %s19_s19 }
   0x8   :  { %p4756_p3 = scmp.ne.s32.totalorder %s19_s19, %s4755_s27  ;;  %p4761_p5 = scmp.lt.s32.totalorder %s4755_s27, %s4755_s27 }
   0xa   :  { %p4762_p6 = por %p4761_p5, %p4760_p4 }
   0xc   :  { %p4763_p7 = pnand %p4762_p6, %p4756_p3 }
   0xe   :  { %4766 = shalt.err (!%p4763_p7)
}
   0xf   :  { %s4796_s28 = smov 256   ;;  %s4797_s29 = smov 16  }
  0x10   :  { %24 = dma.hbm_to_vmem [thread:$0]  %s6771_s1, 12800, %s19_s19, [#allocation6], %s4796_s28, %s4796_s28, %s4797_s29  }
  0x11   :  { %4789 = dma.done.wait [#allocation6], 12800  }
  0x12   :  { %4790 = vsyncadd [#allocation6], 4294954496  ;;  %s35_s7 = sld [smem:[#allocation0]]   ;;  %47 = sst [smem:[#allocation8]] %s4796_s28  ;;  %v6776_v0 = vmov 0   ;;  %vm249_vm0 = vcmask 130048  }
  0x13   :  { %294 = vmatprep.mubr.bf16.mxu0 %v6776_v0  ;;  %367 = vmatprep.mubr.bf16.mxu1 %v6776_v0  ;;  %49 = sst [smem:[#allocation8 + $0x1]] %s4796_s28  ;;  %s4799_s8 = smov 2  }
  0x14   :  { %51 = sst [smem:[#allocation8 + $0x2]] %s4799_s8  ;;  %s4800_s9 = smov 64  }
  0x15   :  { %53 = sst [smem:[#allocation8 + $0x3]] %s4800_s9  ;;  %s4801_s10 = smov 128  }
  0x16   :  { %55 = sst [smem:[#allocation8 + $0x4]] %s4801_s10  ;;  %s4802_s11 = smov [#allocation2]  }
  0x17   :  { %s43_s12 = sshll.u32 %s4802_s11, 4  ;;  %57 = sst [smem:[#allocation8 + $0x5]] %s4799_s8  ;;  %s44_s12 = int_to_ptr.vmem [resolvable:$true] %s43_s12 }
  0x18   :  { %s3874_s1 = sshll.u32 %s35_s7, 26  ;;  %59 = sst [smem:[#allocation8 + $0x6]] %s4801_s10 }
  0x19   :  { %s3875_s13 = sadd.s32 134217728, %s3874_s1  ;;  %61 = sst [smem:[#allocation8 + $0x7]] %s4800_s9 }
  0x1a   :  { %s4803_s14 = smov 4   ;;  %s4804_s15 = smov [#allocation4]  }
  0x1b   :  { %63 = sst [smem:[#allocation8 + $0x8]] %s4803_s14  ;;  %s4805_s16 = smov [#allocation7]  }
  0x1c   :  { %65 = dma.general %s6772_s2, 10240, %s44_s12, %s4804_s15, %s4805_s16, [#allocation8], %s3875_s13, 0  }
  0x1d   :  { %v4137_v1 = vld [vmem:[#allocation5 + $0x4] ss:$16 sps:$4 sm:$0xff]   ;;  %v4139_v2 = vld [vmem:[#allocation5 + $0xc] ss:$16 sps:$4 sm:$0xff]   ;;  %v4141_v3 = vld [vmem:[#allocation5] ss:$16 sps:$4 sm:$0xff]  }
  0x1e   :  { %262 = vmatprep.subr.bf16.mxu0 %v4137_v1  ;;  %v4142_v4 = vld [vmem:[#allocation5 + $0x8] ss:$16 sps:$4 sm:$0xff]   ;;  %335 = vmatprep.subr.bf16.mxu1 %v4139_v2  ;;  %v4143_v5 = vld [vmem:[%s6770_s0] sm:$0xff]   ;;  %v4861_v7 = vld [vmem:[#allocation5 + $0x22c] ss:$16 sps:$4 sm:$0xff]   ;;  %s4806_s29 = smov [#allocation3]  }
  0x1f   :  { %263 = vmatpush1.bf16.msra.mxu0 %v4141_v3  ;;  %336 = vmatpush1.bf16.msra.mxu1 %v4142_v4  ;;  %v4859_v6 = vld [vmem:[#allocation5 + $0x224] ss:$16 sps:$4 sm:$0xff]   ;;  %v4863_v8 = vld [vmem:[#allocation5 + $0x220] ss:$16 sps:$4 sm:$0xff]   ;;  %v4866_v9 = vld [vmem:[#allocation5 + $0x228] ss:$16 sps:$4 sm:$0xff]  }
  0x20   :  { %568 = vmatprep.subr.bf16.mxu0 %v4859_v6  ;;  %609 = vmatprep.subr.bf16.mxu1 %v4861_v7  ;;  %v4870_v10 = vld [vmem:[#allocation5 + $0x244] ss:$16 sps:$4 sm:$0xff]   ;;  %v4874_v11 = vld [vmem:[#allocation5 + $0x24c] ss:$16 sps:$4 sm:$0xff]   ;;  %v4876_v12 = vld [vmem:[#allocation5 + $0x240] ss:$16 sps:$4 sm:$0xff]  }
  0x21   :  { %v4878_v13 = vld [vmem:[#allocation5 + $0x248] ss:$16 sps:$4 sm:$0xff]   ;;  %v4887_v15 = vld [vmem:[#allocation5 + $0x264] ss:$16 sps:$4 sm:$0xff]   ;;  %v4890_v16 = vld [vmem:[#allocation5 + $0x26c] ss:$16 sps:$4 sm:$0xff]  }
  0x22   :  { %3884 = vmatmul.mubr.msk.bf16.vlgmr.msra.gmra.mrb[0].mxu0 %vm249_vm0, %v4143_v5  ;;  %3888 = vmatmul.mubr.msk.bf16.vlgmr.msra.gmra.mrb[0].mxu1 %vm249_vm0, %v4143_v5  ;;  %v4156_v14 = vld [vmem:[%s6770_s0 + $0x8] sm:$0xff]   ;;  %v4893_v17 = vld [vmem:[#allocation5 + $0x260] ss:$16 sps:$4 sm:$0xff]   ;;  %v4899_v19 = vld [vmem:[#allocation5 + $0x284] ss:$16 sps:$4 sm:$0xff]   ;;  %s74_s30 = sshll.u32 %s4806_s29, 4  ;;  %s75_s30 = int_to_ptr.vmem [resolvable:$true] %s74_s30 }
  0x23   :  { %569 = vmatpush1.bf16.msra.mxu0 %v4863_v8  ;;  %610 = vmatpush1.bf16.msra.mxu1 %v4866_v9  ;;  %v4895_v18 = vld [vmem:[#allocation5 + $0x268] ss:$16 sps:$4 sm:$0xff]   ;;  %v4902_v20 = vld [vmem:[#allocation5 + $0x28c] ss:$16 sps:$4 sm:$0xff]   ;;  %v4905_v21 = vld [vmem:[#allocation5 + $0x280] ss:$16 sps:$4 sm:$0xff]  }
  0x24   :  { %570 = vmatprep.subr.bf16.mxu0 %v4870_v10  ;;  %611 = vmatprep.subr.bf16.mxu1 %v4874_v11  ;;  %v4909_v22 = vld [vmem:[#allocation5 + $0x288] ss:$16 sps:$4 sm:$0xff]   ;;  %v4913_v23 = vld [vmem:[#allocation5 + $0x2a4] ss:$16 sps:$4 sm:$0xff]   ;;  %v4917_v24 = vld [vmem:[#allocation5 + $0x2ac] ss:$16 sps:$4 sm:$0xff]  }
  0x25   :  { %304 = vmatprep.mubr.bf16.mxu0 %v6776_v0  ;;  %377 = vmatprep.mubr.bf16.mxu1 %v6776_v0  ;;  %v4169_v25 = vld [vmem:[%s6770_s0 + $0x10] sm:$0xff]   ;;  %v4928_v27 = vld [vmem:[#allocation5 + $0x2a8] ss:$16 sps:$4 sm:$0xff]   ;;  %v4933_v29 = vld [vmem:[#allocation5 + $0x2cc] ss:$16 sps:$4 sm:$0xff]   ;;  %s4767_s8 = scalar_lea.hbm %s6773_s3, 4096 }
  0x26   :  { %v4924_v26 = vld [vmem:[#allocation5 + $0x2a0] ss:$16 sps:$4 sm:$0xff]   ;;  %v4930_v28 = vld [vmem:[#allocation5 + $0x2c4] ss:$16 sps:$4 sm:$0xff]   ;;  %v4940_v31 = vld [vmem:[#allocation5 + $0x2c8] ss:$16 sps:$4 sm:$0xff]   ;;  %p4768_p8 = scmp.ne.s32.totalorder %s6773_s3, %s4767_s8  ;;  %p4771_p9 = scmp.lt.u32.totalorder %s4767_s8, %s6773_s3 }
  0x27   :  { %571 = vmatpush1.bf16.msra.mxu0 %v4876_v12  ;;  %612 = vmatpush1.bf16.msra.mxu1 %v4878_v13  ;;  %v4938_v30 = vld [vmem:[#allocation5 + $0x2c0] ss:$16 sps:$4 sm:$0xff]   ;;  %v4944_v32 = vld [vmem:[#allocation5 + $0x2e4] ss:$16 sps:$4 sm:$0xff]   ;;  %v4948_v33 = vld [vmem:[#allocation5 + $0x2ec] ss:$16 sps:$4 sm:$0xff]  }
  0x28   :  { %572 = vmatprep.subr.bf16.mxu0 %v4887_v15  ;;  %613 = vmatprep.subr.bf16.mxu1 %v4890_v16  ;;  %v4182_v34 = vld [vmem:[%s6770_s0 + $0x18] sm:$0xff]   ;;  %v4954_v35 = vld [vmem:[#allocation5 + $0x2e0] ss:$16 sps:$4 sm:$0xff]   ;;  %v4961_v37 = vld [vmem:[#allocation5 + $0x304] ss:$16 sps:$4 sm:$0xff]   ;;  %p4773_p10 = pnand %p4771_p9, %p4768_p8 }
  0x29   :  { %v4957_v36 = vld [vmem:[#allocation5 + $0x2e8] ss:$16 sps:$4 sm:$0xff]   ;;  %v4964_v38 = vld [vmem:[#allocation5 + $0x30c] ss:$16 sps:$4 sm:$0xff]   ;;  %v4969_v39 = vld [vmem:[#allocation5 + $0x300] ss:$16 sps:$4 sm:$0xff]  }
  0x2a   :  { %3885 = vmatmul.mubr.msk.bf16.gmra.mrb[4].mxu0 %vm249_vm0, %v4156_v14  ;;  %3889 = vmatmul.mubr.msk.bf16.gmra.mrb[4].mxu1 %vm249_vm0, %v4156_v14  ;;  %v4971_v40 = vld [vmem:[#allocation5 + $0x308] ss:$16 sps:$4 sm:$0xff]   ;;  %v4975_v41 = vld [vmem:[#allocation5 + $0x24] ss:$16 sps:$4 sm:$0xff]   ;;  %v4979_v42 = vld [vmem:[#allocation5 + $0x2c] ss:$16 sps:$4 sm:$0xff]  }
  0x2b   :  { %573 = vmatpush1.bf16.msra.mxu0 %v4893_v17  ;;  %614 = vmatpush1.bf16.msra.mxu1 %v4895_v18  ;;  %v4982_v43 = vld [vmem:[#allocation5 + $0x20] ss:$16 sps:$4 sm:$0xff]   ;;  %v4985_v44 = vld [vmem:[#allocation5 + $0x28] ss:$16 sps:$4 sm:$0xff]   ;;  %v4989_v45 = vld [vmem:[#allocation5 + $0x44] ss:$16 sps:$4 sm:$0xff]  }
  0x2c   :  { %574 = vmatprep.subr.bf16.mxu0 %v4899_v19  ;;  %615 = vmatprep.subr.bf16.mxu1 %v4902_v20  ;;  %7145 = vst [vmem:[#allocation16_spill] sm:$0xff] %v4985_v44  ;;  %7146 = vst [vmem:[#allocation17_spill] sm:$0xff] %v4989_v45  ;;  %v4992_v46 = vld [vmem:[#allocation5 + $0x4c] ss:$16 sps:$4 sm:$0xff]   ;;  %v4997_v47 = vld [vmem:[#allocation5 + $0x40] ss:$16 sps:$4 sm:$0xff]  }
  0x2d   :  { %314 = vmatprep.mubr.bf16.mxu0 %v6776_v0  ;;  %387 = vmatprep.mubr.bf16.mxu1 %v6776_v0  ;;  %7147 = vst [vmem:[#allocation18_spill] sm:$0xff] %v4992_v46  ;;  %7148 = vst [vmem:[#allocation19_spill] sm:$0xff] %v4997_v47  ;;  %v4999_v48 = vld [vmem:[#allocation5 + $0x48] ss:$16 sps:$4 sm:$0xff]   ;;  %v5003_v49 = vld [vmem:[#allocation5 + $0x64] ss:$16 sps:$4 sm:$0xff]  }
  0x2e   :  { %7149 = vst [vmem:[#allocation20_spill] sm:$0xff] %v4999_v48  ;;  %7150 = vst [vmem:[#allocation21_spill] sm:$0xff] %v5003_v49  ;;  %v5006_v50 = vld [vmem:[#allocation5 + $0x6c] ss:$16 sps:$4 sm:$0xff]   ;;  %v5009_v51 = vld [vmem:[#allocation5 + $0x60] ss:$16 sps:$4 sm:$0xff]  }
  0x2f   :  { %575 = vmatpush1.bf16.msra.mxu0 %v4905_v21  ;;  %616 = vmatpush1.bf16.msra.mxu1 %v4909_v22  ;;  %7151 = vst [vmem:[#allocation22_spill] sm:$0xff] %v5006_v50  ;;  %7152 = vst [vmem:[#allocation23_spill] sm:$0xff] %v5009_v51  ;;  %v5013_v52 = vld [vmem:[#allocation5 + $0x68] ss:$16 sps:$4 sm:$0xff]   ;;  %v5017_v53 = vld [vmem:[#allocation5 + $0x84] ss:$16 sps:$4 sm:$0xff]  }
  0x30   :  { %576 = vmatprep.subr.bf16.mxu0 %v4913_v23  ;;  %617 = vmatprep.subr.bf16.mxu1 %v4917_v24  ;;  %7153 = vst [vmem:[#allocation24_spill] sm:$0xff] %v5013_v52  ;;  %7154 = vst [vmem:[#allocation25_spill] sm:$0xff] %v5017_v53  ;;  %v5020_v54 = vld [vmem:[#allocation5 + $0x8c] ss:$16 sps:$4 sm:$0xff]   ;;  %v5023_v55 = vld [vmem:[#allocation5 + $0x80] ss:$16 sps:$4 sm:$0xff]  }
  0x31   :  { %7155 = vst [vmem:[#allocation26_spill] sm:$0xff] %v5020_v54  ;;  %7156 = vst [vmem:[#allocation27_spill] sm:$0xff] %v5023_v55  ;;  %v5025_v56 = vld [vmem:[#allocation5 + $0x88] ss:$16 sps:$4 sm:$0xff]   ;;  %v5029_v57 = vld [vmem:[#allocation5 + $0xa4] ss:$16 sps:$4 sm:$0xff]  }
  0x32   :  { %3886 = vmatmul.mubr.msk.bf16.gmra.mrb[8].mxu0 %vm249_vm0, %v4169_v25  ;;  %3890 = vmatmul.mubr.msk.bf16.gmra.mrb[8].mxu1 %vm249_vm0, %v4169_v25  ;;  %7157 = vst [vmem:[#allocation28_spill] sm:$0xff] %v5025_v56  ;;  %7158 = vst [vmem:[#allocation29_spill] sm:$0xff] %v5029_v57  ;;  %v5031_v58 = vld [vmem:[#allocation5 + $0xac] ss:$16 sps:$4 sm:$0xff]   ;;  %v5034_v59 = vld [vmem:[#allocation5 + $0xa0] ss:$16 sps:$4 sm:$0xff]  }
  0x33   :  { %577 = vmatpush1.bf16.msra.mxu0 %v4924_v26  ;;  %618 = vmatpush1.bf16.msra.mxu1 %v4928_v27  ;;  %7159 = vst [vmem:[#allocation30_spill] sm:$0xff] %v5031_v58  ;;  %7160 = vst [vmem:[#allocation31_spill] sm:$0xff] %v5034_v59  ;;  %v5036_v60 = vld [vmem:[#allocation5 + $0xa8] ss:$16 sps:$4 sm:$0xff]   ;;  %v5038_v61 = vld [vmem:[#allocation5 + $0xc4] ss:$16 sps:$4 sm:$0xff]  }
  0x34   :  { %578 = vmatprep.subr.bf16.mxu0 %v4930_v28  ;;  %619 = vmatprep.subr.bf16.mxu1 %v4933_v29  ;;  %7161 = vst [vmem:[#allocation32_spill] sm:$0xff] %v5036_v60  ;;  %7162 = vst [vmem:[#allocation33_spill] sm:$0xff] %v5038_v61  ;;  %v5041_v62 = vld [vmem:[#allocation5 + $0xcc] ss:$16 sps:$4 sm:$0xff]   ;;  %v5046_v63 = vld [vmem:[#allocation5 + $0xc0] ss:$16 sps:$4 sm:$0xff]  }
  0x35   :  { %324 = vmatprep.mubr.bf16.mxu0 %v6776_v0  ;;  %397 = vmatprep.mubr.bf16.mxu1 %v6776_v0  ;;  %7163 = vst [vmem:[#allocation34_spill] sm:$0xff] %v5041_v62  ;;  %7164 = vst [vmem:[#allocation35_spill] sm:$0xff] %v5046_v63  ;;  %v5048_v1 = vld [vmem:[#allocation5 + $0xc8] ss:$16 sps:$4 sm:$0xff]   ;;  %v5050_v2 = vld [vmem:[#allocation5 + $0xe4] ss:$16 sps:$4 sm:$0xff]  }
  0x36   :  { %7165 = vst [vmem:[#allocation36_spill] sm:$0xff] %v5048_v1  ;;  %7166 = vst [vmem:[#allocation37_spill] sm:$0xff] %v5050_v2  ;;  %v5053_v3 = vld [vmem:[#allocation5 + $0xec] ss:$16 sps:$4 sm:$0xff]   ;;  %v5059_v4 = vld [vmem:[#allocation5 + $0xe0] ss:$16 sps:$4 sm:$0xff]  }
  0x37   :  { %579 = vmatpush1.bf16.msra.mxu0 %v4938_v30  ;;  %620 = vmatpush1.bf16.msra.mxu1 %v4940_v31  ;;  %7167 = vst [vmem:[#allocation38_spill] sm:$0xff] %v5053_v3  ;;  %7168 = vst [vmem:[#allocation39_spill] sm:$0xff] %v5059_v4  ;;  %v5063_v5 = vld [vmem:[#allocation5 + $0xe8] ss:$16 sps:$4 sm:$0xff]   ;;  %v5065_v14 = vld [vmem:[#allocation5 + $0x104] ss:$16 sps:$4 sm:$0xff]  }
  0x38   :  { %580 = vmatprep.subr.bf16.mxu0 %v4944_v32  ;;  %621 = vmatprep.subr.bf16.mxu1 %v4948_v33  ;;  %7169 = vst [vmem:[#allocation40_spill] sm:$0xff] %v5063_v5  ;;  %7170 = vst [vmem:[#allocation41_spill] sm:$0xff] %v5065_v14  ;;  %v5068_v25 = vld [vmem:[#allocation5 + $0x10c] ss:$16 sps:$4 sm:$0xff]  }
  0x39   :  { %7171 = vst [vmem:[#allocation42_spill] sm:$0xff] %v5068_v25 }
  0x3a   :  { %3887 = vmatmul.mubr.msk.bf16.gmra.mrb[12].mxu0 %vm249_vm0, %v4182_v34  ;;  %3891 = vmatmul.mubr.msk.bf16.gmra.mrb[12].mxu1 %vm249_vm0, %v4182_v34  ;;  %v5071_v34 = vld [vmem:[#allocation5 + $0x100] ss:$16 sps:$4 sm:$0xff]  }
  0x3b   :  { %581 = vmatpush1.bf16.msra.mxu0 %v4954_v35  ;;  %622 = vmatpush1.bf16.msra.mxu1 %v4957_v36  ;;  %7172 = vst [vmem:[#allocation43_spill] sm:$0xff] %v5071_v34 }
  0x3c   :  { %582 = vmatprep.subr.bf16.mxu0 %v4961_v37  ;;  %623 = vmatprep.subr.bf16.mxu1 %v4964_v38 }
  0x3d   :  { %600 = vmatprep.mubr.bf16.mxu0 %v6776_v0  ;;  %641 = vmatprep.mubr.bf16.mxu1 %v6776_v0 }
  0x3f   :  { %583 = vmatpush1.bf16.msra.mxu0 %v4969_v39  ;;  %624 = vmatpush1.bf16.msra.mxu1 %v4971_v40 }
  0x40   :  { %810 = vmatprep.subr.bf16.mxu0 %v4975_v41  ;;  %851 = vmatprep.subr.bf16.mxu1 %v4979_v42 }
  0x42   :  { %601 = vmatmul.mubr.bf16.vlgmr.msra.gmra.mrb[16].mxu0 %v6776_v0  ;;  %642 = vmatmul.mubr.bf16.vlgmr.msra.gmra.mrb[16].mxu1 %v6776_v0 }
  0x43   :  { %811 = vmatpush1.bf16.msra.mxu0 %v4982_v43  ;;  %852 = vmatpush1.bf16.msra.mxu1 %v4985_v44 }
  0x44   :  { %812 = vmatprep.subr.bf16.mxu0 %v4989_v45  ;;  %853 = vmatprep.subr.bf16.mxu1 %v4992_v46 }
  0x45   :  { %842 = vmatprep.mubr.bf16.mxu0 %v6776_v0  ;;  %883 = vmatprep.mubr.bf16.mxu1 %v6776_v0  ;;  %v5075_v0 = vld [vmem:[#allocation5 + $0x108] ss:$16 sps:$4 sm:$0xff]  }
  0x46   :  { %7173 = vst [vmem:[#allocation44_spill] sm:$0xff] %v5075_v0 }
  0x47   :  { %813 = vmatpush1.bf16.msra.mxu0 %v4997_v47  ;;  %854 = vmatpush1.bf16.msra.mxu1 %v4999_v48 }
  0x48   :  { %814 = vmatprep.subr.bf16.mxu0 %v5003_v49  ;;  %855 = vmatprep.subr.bf16.mxu1 %v5006_v50 }
  0x4b   :  { %815 = vmatpush1.bf16.msra.mxu0 %v5009_v51  ;;  %856 = vmatpush1.bf16.msra.mxu1 %v5013_v52 }
  0x4c   :  { %816 = vmatprep.subr.bf16.mxu0 %v5017_v53  ;;  %857 = vmatprep.subr.bf16.mxu1 %v5020_v54 }
  0x4f   :  { %817 = vmatpush1.bf16.msra.mxu0 %v5023_v55  ;;  %858 = vmatpush1.bf16.msra.mxu1 %v5025_v56 }
  0x50   :  { %818 = vmatprep.subr.bf16.mxu0 %v5029_v57  ;;  %859 = vmatprep.subr.bf16.mxu1 %v5031_v58 }
  0x53   :  { %819 = vmatpush1.bf16.msra.mxu0 %v5034_v59  ;;  %860 = vmatpush1.bf16.msra.mxu1 %v5036_v60 }
  0x54   :  { %820 = vmatprep.subr.bf16.mxu0 %v5038_v61  ;;  %861 = vmatprep.subr.bf16.mxu1 %v5041_v62  ;;  %v5142_v62 = vld [vmem:[#allocation5 + $0x1cc] ss:$16 sps:$4 sm:$0xff]  }
  0x55   :  { %7196 = vst [vmem:[#allocation66_spill] sm:$0xff] %v5142_v62 }
  0x57   :  { %821 = vmatpush1.bf16.msra.mxu0 %v5046_v63  ;;  %862 = vmatpush1.bf16.msra.mxu1 %v5048_v1  ;;  %v5102_v1 = vld [vmem:[#allocation5 + $0x148] ss:$16 sps:$4 sm:$0xff]   ;;  %v5140_v63 = vld [vmem:[#allocation5 + $0x1c4] ss:$16 sps:$4 sm:$0xff]  }
  0x58   :  { %822 = vmatprep.subr.bf16.mxu0 %v5050_v2  ;;  %863 = vmatprep.subr.bf16.mxu1 %v5053_v3  ;;  %v7174_v2 = vmov 0   ;;  %v5090_v3 = vld [vmem:[#allocation5 + $0x128] ss:$16 sps:$4 sm:$0xff]   ;;  %7182 = vst [vmem:[#allocation52_spill] sm:$0xff] %v5102_v1  ;;  %7195 = vst [vmem:[#allocation65_spill] sm:$0xff] %v5140_v63 }
  0x59   :  { %7178 = vst [vmem:[#allocation48_spill] sm:$0xff] %v5090_v3 }
  0x5b   :  { %823 = vmatpush1.bf16.msra.mxu0 %v5059_v4  ;;  %864 = vmatpush1.bf16.msra.mxu1 %v5063_v5  ;;  %v5084_v4 = vld [vmem:[#allocation5 + $0x124] ss:$16 sps:$4 sm:$0xff]   ;;  %v5086_v5 = vld [vmem:[#allocation5 + $0x12c] ss:$16 sps:$4 sm:$0xff]  }
  0x5c   :  { %824 = vmatprep.subr.bf16.mxu0 %v5065_v14  ;;  %865 = vmatprep.subr.bf16.mxu1 %v5068_v25  ;;  %7175 = vst [vmem:[#allocation45_spill] sm:$0xff] %v5084_v4  ;;  %7176 = vst [vmem:[#allocation46_spill] sm:$0xff] %v5086_v5  ;;  %v5088_v14 = vld [vmem:[#allocation5 + $0x120] ss:$16 sps:$4 sm:$0xff]  }
  0x5d   :  { %7177 = vst [vmem:[#allocation47_spill] sm:$0xff] %v5088_v14  ;;  %v5100_v25 = vld [vmem:[#allocation5 + $0x140] ss:$16 sps:$4 sm:$0xff]  }
  0x5e   :  { %7181 = vst [vmem:[#allocation51_spill] sm:$0xff] %v5100_v25 }
  0x5f   :  { %825 = vmatpush1.bf16.msra.mxu0 %v5071_v34  ;;  %866 = vmatpush1.bf16.msra.mxu1 %v5075_v0  ;;  %v5096_v0 = vld [vmem:[#allocation5 + $0x144] ss:$16 sps:$4 sm:$0xff]   ;;  %v5098_v34 = vld [vmem:[#allocation5 + $0x14c] ss:$16 sps:$4 sm:$0xff]  }
  0x60   :  { %1081 = vmatprep.subr.bf16.mxu0 %v5084_v4  ;;  %1122 = vmatprep.subr.bf16.mxu1 %v5086_v5  ;;  %7179 = vst [vmem:[#allocation49_spill] sm:$0xff] %v5096_v0  ;;  %7180 = vst [vmem:[#allocation50_spill] sm:$0xff] %v5098_v34  ;;  %v5108_v5 = vld [vmem:[#allocation5 + $0x164] ss:$16 sps:$4 sm:$0xff]   ;;  %v5114_v4 = vld [vmem:[#allocation5 + $0x168] ss:$16 sps:$4 sm:$0xff]  }
  0x61   :  { %7183 = vst [vmem:[#allocation53_spill] sm:$0xff] %v5108_v5  ;;  %7186 = vst [vmem:[#allocation56_spill] sm:$0xff] %v5114_v4 }
  0x62   :  { %843 = vmatmul.mubr.bf16.vlgmr.msra.gmra.mrb[20].mxu0 %v7174_v2  ;;  %884 = vmatmul.mubr.bf16.vlgmr.msra.gmra.mrb[20].mxu1 %v7174_v2 }
  0x63   :  { %1113 = vmatprep.mubr.bf16.mxu0 %v7174_v2  ;;  %1154 = vmatprep.mubr.bf16.mxu1 %v7174_v2 }
  0x64   :  { %1082 = vmatpush1.bf16.msra.mxu0 %v5088_v14  ;;  %1123 = vmatpush1.bf16.msra.mxu1 %v5090_v3  ;;  %v5110_v14 = vld [vmem:[#allocation5 + $0x16c] ss:$16 sps:$4 sm:$0xff]   ;;  %v5112_v3 = vld [vmem:[#allocation5 + $0x160] ss:$16 sps:$4 sm:$0xff]  }
  0x65   :  { %1083 = vmatprep.subr.bf16.mxu0 %v5096_v0  ;;  %1124 = vmatprep.subr.bf16.mxu1 %v5098_v34  ;;  %7184 = vst [vmem:[#allocation54_spill] sm:$0xff] %v5110_v14  ;;  %7185 = vst [vmem:[#allocation55_spill] sm:$0xff] %v5112_v3  ;;  %v5120_v34 = vld [vmem:[#allocation5 + $0x184] ss:$16 sps:$4 sm:$0xff]   ;;  %v5126_v0 = vld [vmem:[#allocation5 + $0x188] ss:$16 sps:$4 sm:$0xff]  }
  0x66   :  { %7187 = vst [vmem:[#allocation57_spill] sm:$0xff] %v5120_v34  ;;  %7190 = vst [vmem:[#allocation60_spill] sm:$0xff] %v5126_v0 }
  0x68   :  { %1084 = vmatpush1.bf16.msra.mxu0 %v5100_v25  ;;  %1125 = vmatpush1.bf16.msra.mxu1 %v5102_v1  ;;  %v5122_v25 = vld [vmem:[#allocation5 + $0x18c] ss:$16 sps:$4 sm:$0xff]   ;;  %v5124_v1 = vld [vmem:[#allocation5 + $0x180] ss:$16 sps:$4 sm:$0xff]  }
  0x69   :  { %1085 = vmatprep.subr.bf16.mxu0 %v5108_v5  ;;  %1126 = vmatprep.subr.bf16.mxu1 %v5110_v14  ;;  %7188 = vst [vmem:[#allocation58_spill] sm:$0xff] %v5122_v25  ;;  %7189 = vst [vmem:[#allocation59_spill] sm:$0xff] %v5124_v1  ;;  %v5132_v14 = vld [vmem:[#allocation5 + $0x1a4] ss:$16 sps:$4 sm:$0xff]   ;;  %v5138_v5 = vld [vmem:[#allocation5 + $0x1a8] ss:$16 sps:$4 sm:$0xff]  }
  0x6a   :  { %7191 = vst [vmem:[#allocation61_spill] sm:$0xff] %v5132_v14  ;;  %7194 = vst [vmem:[#allocation64_spill] sm:$0xff] %v5138_v5 }
  0x6c   :  { %1086 = vmatpush1.bf16.msra.mxu0 %v5112_v3  ;;  %1127 = vmatpush1.bf16.msra.mxu1 %v5114_v4  ;;  %v5134_v3 = vld [vmem:[#allocation5 + $0x1ac] ss:$16 sps:$4 sm:$0xff]   ;;  %v5136_v4 = vld [vmem:[#allocation5 + $0x1a0] ss:$16 sps:$4 sm:$0xff]  }
  0x6d   :  { %1087 = vmatprep.subr.bf16.mxu0 %v5120_v34  ;;  %1128 = vmatprep.subr.bf16.mxu1 %v5122_v25  ;;  %7192 = vst [vmem:[#allocation62_spill] sm:$0xff] %v5134_v3  ;;  %7193 = vst [vmem:[#allocation63_spill] sm:$0xff] %v5136_v4  ;;  %v5154_v25 = vld [vmem:[#allocation5 + $0x1e4] ss:$16 sps:$4 sm:$0xff]   ;;  %v5156_v34 = vld [vmem:[#allocation5 + $0x1ec] ss:$16 sps:$4 sm:$0xff]  }
  0x6e   :  { %7199 = vst [vmem:[#allocation69_spill] sm:$0xff] %v5154_v25  ;;  %7200 = vst [vmem:[#allocation70_spill] sm:$0xff] %v5156_v34 }
  0x70   :  { %1088 = vmatpush1.bf16.msra.mxu0 %v5124_v1  ;;  %1129 = vmatpush1.bf16.msra.mxu1 %v5126_v0  ;;  %v5148_v0 = vld [vmem:[#allocation5 + $0x1c0] ss:$16 sps:$4 sm:$0xff]   ;;  %v5150_v1 = vld [vmem:[#allocation5 + $0x1c8] ss:$16 sps:$4 sm:$0xff]  }
  0x71   :  { %1089 = vmatprep.subr.bf16.mxu0 %v5132_v14  ;;  %1130 = vmatprep.subr.bf16.mxu1 %v5134_v3  ;;  %7197 = vst [vmem:[#allocation67_spill] sm:$0xff] %v5148_v0  ;;  %7198 = vst [vmem:[#allocation68_spill] sm:$0xff] %v5150_v1  ;;  %v5160_v3 = vld [vmem:[#allocation5 + $0x1e0] ss:$16 sps:$4 sm:$0xff]  }
  0x72   :  { %7201 = vst [vmem:[#allocation71_spill] sm:$0xff] %v5160_v3 }
  0x74   :  { %1090 = vmatpush1.bf16.msra.mxu0 %v5136_v4  ;;  %1131 = vmatpush1.bf16.msra.mxu1 %v5138_v5  ;;  %v5162_v4 = vld [vmem:[#allocation5 + $0x1e8] ss:$16 sps:$4 sm:$0xff]   ;;  %v5166_v5 = vld [vmem:[#allocation5 + $0x204] ss:$16 sps:$4 sm:$0xff]  }
  0x75   :  { %1091 = vmatprep.subr.bf16.mxu0 %v5140_v63  ;;  %1132 = vmatprep.subr.bf16.mxu1 %v5142_v62  ;;  %7202 = vst [vmem:[#allocation72_spill] sm:$0xff] %v5162_v4  ;;  %7203 = vst [vmem:[#allocation73_spill] sm:$0xff] %v5166_v5  ;;  %v5168_v63 = vld [vmem:[#allocation5 + $0x20c] ss:$16 sps:$4 sm:$0xff]   ;;  %v5172_v62 = vld [vmem:[#allocation5 + $0x200] ss:$16 sps:$4 sm:$0xff]  }
  0x76   :  { %7204 = vst [vmem:[#allocation74_spill] sm:$0xff] %v5168_v63  ;;  %7205 = vst [vmem:[#allocation75_spill] sm:$0xff] %v5172_v62 }
  0x78   :  { %1092 = vmatpush1.bf16.msra.mxu0 %v5148_v0  ;;  %1133 = vmatpush1.bf16.msra.mxu1 %v5150_v1  ;;  %v5174_v0 = vld [vmem:[#allocation5 + $0x208] ss:$16 sps:$4 sm:$0xff]  }
  0x79   :  { %1093 = vmatprep.subr.bf16.mxu0 %v5154_v25  ;;  %1134 = vmatprep.subr.bf16.mxu1 %v5156_v34  ;;  %7206 = vst [vmem:[#allocation76_spill] sm:$0xff] %v5174_v0  ;;  %v189_v34 = vlaneseq }
  0x7c   :  { %1094 = vmatpush1.bf16.msra.mxu0 %v5160_v3  ;;  %1135 = vmatpush1.bf16.msra.mxu1 %v5162_v4  ;;  %v5182_v3 = vshrl.u32 %v189_v34, 7 }
  0x7d   :  { %1095 = vmatprep.subr.bf16.mxu0 %v5166_v5  ;;  %1136 = vmatprep.subr.bf16.mxu1 %v5168_v63  ;;  %v178_v5 = vld [vmem:[%s6774_s4] sm:$0xf] }
  0x7e   :  { %v5185_v4 = vsub.s32 0, %v5182_v3  ;;  %v6859_v63 = vsub.s32 2, %v5182_v3 }
  0x80   :  { %1096 = vmatpush1.bf16.msra.mxu0 %v5172_v62  ;;  %1137 = vmatpush1.bf16.msra.mxu1 %v5174_v0  ;;  %7207 = vst [vmem:[#allocation77_spill] sm:$0xff] %v5185_v4  ;;  %v6863_v62 = vsub.s32 3, %v5182_v3  ;;  %v5193_v0 = vsub.s32 1, %v5182_v3  ;;  %v5202_v34 = vrot.slane %v178_v5, %v6859_v63 }
  0x81   :  { %1213 = vmatprep.subr.bf16.mxu0 %v4859_v6  ;;  %1254 = vmatprep.subr.bf16.mxu1 %v4861_v7  ;;  %v5196_v6 = vrot.slane %v178_v5, %v5185_v4 }
  0x82   :  { %7208 = vst [vmem:[#allocation78_spill] sm:$0xff] %v5193_v0  ;;  %v5210_v14 = vrot.slane %v178_v5, %v6863_v62  ;;  %v5213_v61 = vrot.slane %v178_v5, %v5193_v0 }
  0xf5   :  { %v5198_v7 = vpop.f32.mrb[0].mxu0  ;;  %v5206_v1 = vpop.f32.mrb[0].mxu1 }
  0xf6   :  { %v5204_v25 = vpop.f32.mrb[1].mxu0  ;;  %v5215_v59 = vpop.f32.mrb[1].mxu1 }
  0xf7   :  { %v300_v60 = vpop.f32.mrb[2].mxu0  ;;  %v373_v63 = vpop.f32.mrb[2].mxu1 }
  0xf8   :  { %v5218_v58 = vadd.f32 %v300_v60, %v5196_v6  ;;  %v302_v57 = vpop.f32.mrb[3].mxu0  ;;  %v5224_v55 = vadd.f32 %v373_v63, %v5202_v34  ;;  %v375_v54 = vpop.f32.mrb[3].mxu1 }
  0xf9   :  { %v5221_v56 = vadd.f32 %v302_v57, %v5213_v61  ;;  %v5227_v62 = vadd.f32 %v375_v54, %v5210_v14 }
  0xfa   :  { %7209 = vst [vmem:[#allocation79_spill] sm:$0xff] %v5218_v58  ;;  %7211 = vst [vmem:[#allocation81_spill] sm:$0xff] %v5224_v55 }
  0xfb   :  { %7210 = vst [vmem:[#allocation80_spill] sm:$0xff] %v5221_v56  ;;  %7212 = vst [vmem:[#allocation82_spill] sm:$0xff] %v5227_v62 }
  0xfd   :  { %v306_v5 = vpop.f32.mrb[4].mxu0  ;;  %v379_v51 = vpop.f32.mrb[4].mxu1 }
  0xfe   :  { %v5230_v53 = vadd.f32 %v306_v5, %v5196_v6  ;;  %v308_v52 = vpop.f32.mrb[5].mxu0  ;;  %v5236_v57 = vadd.f32 %v379_v51, %v5202_v34  ;;  %v381_v56 = vpop.f32.mrb[5].mxu1 }
  0xff   :  { %v5233_v60 = vadd.f32 %v308_v52, %v5213_v61  ;;  %v310_v58 = vpop.f32.mrb[6].mxu0  ;;  %v5242_v54 = vadd.f32 %v381_v56, %v5210_v14  ;;  %v383_v62 = vpop.f32.mrb[6].mxu1 }
 0x100   :  { %7213 = vst [vmem:[#allocation83_spill] sm:$0xff] %v5230_v53  ;;  %7215 = vst [vmem:[#allocation85_spill] sm:$0xff] %v5236_v57  ;;  %v5239_v63 = vadd.f32 %v310_v58, %v5196_v6  ;;  %v312_v55 = vpop.f32.mrb[7].mxu0  ;;  %v5248_v53 = vadd.f32 %v383_v62, %v5202_v34  ;;  %v385_v52 = vpop.f32.mrb[7].mxu1 }
 0x101   :  { %7214 = vst [vmem:[#allocation84_spill] sm:$0xff] %v5233_v60  ;;  %7217 = vst [vmem:[#allocation87_spill] sm:$0xff] %v5242_v54  ;;  %v5245_v5 = vadd.f32 %v312_v55, %v5213_v61  ;;  %v5251_v60 = vadd.f32 %v385_v52, %v5210_v14 }
 0x102   :  { %7216 = vst [vmem:[#allocation86_spill] sm:$0xff] %v5239_v63  ;;  %7219 = vst [vmem:[#allocation89_spill] sm:$0xff] %v5248_v53 }
 0x103   :  { %7218 = vst [vmem:[#allocation88_spill] sm:$0xff] %v5245_v5  ;;  %7220 = vst [vmem:[#allocation90_spill] sm:$0xff] %v5251_v60 }
 0x105   :  { %v316_v51 = vpop.f32.mrb[8].mxu0  ;;  %v389_v63 = vpop.f32.mrb[8].mxu1 }
 0x106   :  { %v5254_v57 = vadd.f32 %v316_v51, %v5196_v6  ;;  %v318_v58 = vpop.f32.mrb[9].mxu0  ;;  %v5260_v55 = vadd.f32 %v389_v63, %v5202_v34  ;;  %v391_v5 = vpop.f32.mrb[9].mxu1 }
 0x107   :  { %v5257_v56 = vadd.f32 %v318_v58, %v5213_v61  ;;  %v320_v54 = vpop.f32.mrb[10].mxu0  ;;  %v5266_v52 = vadd.f32 %v391_v5, %v5210_v14  ;;  %v393_v60 = vpop.f32.mrb[10].mxu1 }
 0x108   :  { %7221 = vst [vmem:[#allocation91_spill] sm:$0xff] %v5254_v57  ;;  %7223 = vst [vmem:[#allocation93_spill] sm:$0xff] %v5260_v55  ;;  %v5263_v62 = vadd.f32 %v320_v54, %v5196_v6  ;;  %v322_v53 = vpop.f32.mrb[11].mxu0  ;;  %v5272_v57 = vadd.f32 %v393_v60, %v5202_v34  ;;  %v395_v58 = vpop.f32.mrb[11].mxu1 }
 0x109   :  { %7222 = vst [vmem:[#allocation92_spill] sm:$0xff] %v5257_v56  ;;  %7225 = vst [vmem:[#allocation95_spill] sm:$0xff] %v5266_v52  ;;  %v5269_v51 = vadd.f32 %v322_v53, %v5213_v61  ;;  %v5275_v56 = vadd.f32 %v395_v58, %v5210_v14 }
 0x10a   :  { %7224 = vst [vmem:[#allocation94_spill] sm:$0xff] %v5263_v62  ;;  %7227 = vst [vmem:[#allocation97_spill] sm:$0xff] %v5272_v57 }
 0x10b   :  { %7226 = vst [vmem:[#allocation96_spill] sm:$0xff] %v5269_v51  ;;  %7228 = vst [vmem:[#allocation98_spill] sm:$0xff] %v5275_v56 }
 0x10d   :  { %v326_v63 = vpop.f32.mrb[12].mxu0  ;;  %v399_v62 = vpop.f32.mrb[12].mxu1 }
 0x10e   :  { %v5278_v55 = vadd.f32 %v326_v63, %v5196_v6  ;;  %v328_v54 = vpop.f32.mrb[13].mxu0  ;;  %v5284_v53 = vadd.f32 %v399_v62, %v5202_v34  ;;  %v401_v51 = vpop.f32.mrb[13].mxu1 }
 0x10f   :  { %v5281_v5 = vadd.f32 %v328_v54, %v5213_v61  ;;  %v330_v52 = vpop.f32.mrb[14].mxu0  ;;  %v5290_v58 = vadd.f32 %v401_v51, %v5210_v14  ;;  %v403_v56 = vpop.f32.mrb[14].mxu1 }
 0x110   :  { %7229 = vst [vmem:[#allocation99_spill] sm:$0xff] %v5278_v55  ;;  %7231 = vst [vmem:[#allocation101_spill] sm:$0xff] %v5284_v53  ;;  %v5287_v60 = vadd.f32 %v330_v52, %v5196_v6  ;;  %v332_v57 = vpop.f32.mrb[15].mxu0  ;;  %v5296_v55 = vadd.f32 %v403_v56, %v5202_v34  ;;  %v405_v54 = vpop.f32.mrb[15].mxu1  ;;  %v297_v56 = vadd.f32 %v5198_v7, %v5196_v6 }
 0x111   :  { %7230 = vst [vmem:[#allocation100_spill] sm:$0xff] %v5281_v5  ;;  %7233 = vst [vmem:[#allocation103_spill] sm:$0xff] %v5290_v58  ;;  %v5293_v63 = vadd.f32 %v332_v57, %v5213_v61  ;;  %v5299_v5 = vadd.f32 %v405_v54, %v5210_v14  ;;  %v370_v54 = vadd.f32 %v5206_v1, %v5202_v34 }
 0x112   :  { %7232 = vst [vmem:[#allocation102_spill] sm:$0xff] %v5287_v60  ;;  %7235 = vst [vmem:[#allocation105_spill] sm:$0xff] %v5296_v55  ;;  %v372_v55 = vadd.f32 %v5215_v59, %v5210_v14 }
 0x113   :  { %7234 = vst [vmem:[#allocation104_spill] sm:$0xff] %v5293_v63  ;;  %7236 = vst [vmem:[#allocation106_spill] sm:$0xff] %v5299_v5  ;;  %v299_v63 = vadd.f32 %v5204_v25, %v5213_v61 }
 0x115   :  { %v5301_v62 = vpop.f32.mrb[16].mxu0  ;;  %v5305_v52 = vpop.f32.mrb[16].mxu1 }
 0x116   :  { %v5303_v53 = vpop.f32.mrb[17].mxu0  ;;  %v5307_v51 = vpop.f32.mrb[17].mxu1 }
 0x117   :  { %v606_v60 = vpop.f32.mrb[18].mxu0  ;;  %v647_v50 = vpop.f32.mrb[18].mxu1 }
 0x118   :  { %v607_v58 = vpop.f32.mrb[19].mxu0  ;;  %v648_v57 = vpop.f32.mrb[19].mxu1 }
 0x135   :  { %v844_v5 = vpop.f32.mrb[20].mxu0  ;;  %v885_v60 = vpop.f32.mrb[20].mxu1 }
 0x136   :  { %v892_v49 = vadd.f32 %v844_v5, %v297_v56  ;;  %v846_v48 = vpop.f32.mrb[21].mxu0  ;;  %v894_v47 = vadd.f32 %v885_v60, %v370_v54  ;;  %v887_v50 = vpop.f32.mrb[21].mxu1 }
 0x137   :  { %v893_v58 = vadd.f32 %v846_v48, %v299_v63  ;;  %v848_v57 = vpop.f32.mrb[22].mxu0  ;;  %v895_v45 = vadd.f32 %v887_v50, %v372_v55  ;;  %v889_v7 = vpop.f32.mrb[22].mxu1 }
 0x138   :  { %v3956_v46 = vmul.f32 -1.442695, %v892_v49  ;;  %v849_v6 = vpop.f32.mrb[23].mxu0  ;;  %v890_v61 = vpop.f32.mrb[23].mxu1  ;;  %v3958_v1 = vmul.f32 -1.442695, %v894_v47 }
 0x139   :  { %v3957_v44 = vmul.f32 -1.442695, %v893_v58  ;;  %v7239_v61 = vld [vmem:[#allocation16_spill] sm:$0xff] }
 0x13a   :  { %4291 = vpow2.f32 %v3956_v46 }
 0x13b   :  { %4293 = vpow2.f32 %v3957_v44 }
 0x13c   :  { %4295 = vpow2.f32 %v3958_v1  ;;  %v7240_v1 = vld [vmem:[#allocation17_spill] sm:$0xff] }
 0x13d   :  { %4297 = vtanh.f32 %v895_v45 }
 0x144   :  { %v4292_v25 = vpop.eup %4291 }
 0x145   :  { %v905_v34 = vadd.f32 1.0, %v4292_v25  ;;  %v4294_v59 = vpop.eup %4293  ;;  %v7241_v25 = vld [vmem:[#allocation18_spill] sm:$0xff] }
 0x146   :  { %v906_v14 = vadd.f32 1.0, %v4294_v59  ;;  %v4296_v48 = vpop.eup %4295  ;;  %v7243_v59 = vld [vmem:[#allocation20_spill] sm:$0xff] }
 0x147   :  { %4299 = vrcp.f32 %v905_v34  ;;  %v4298_v5 = vpop.eup %4297  ;;  %v907_v56 = vadd.f32 1.0, %v4296_v48  ;;  %v7242_v34 = vld [vmem:[#allocation19_spill] sm:$0xff]  ;;  %v7245_v48 = vld [vmem:[#allocation22_spill] sm:$0xff] }
 0x148   :  { %4301 = vrcp.f32 %v906_v14  ;;  %v7244_v14 = vld [vmem:[#allocation21_spill] sm:$0xff] }
 0x149   :  { %4303 = vrcp.f32 %v907_v56  ;;  %v7251_v56 = vld [vmem:[#allocation28_spill] sm:$0xff] }
 0x151   :  { %v4300_v63 = vpop.eup %4299 }
 0x152   :  { %v916_v49 = vmul.f32 %v4300_v63, %v4298_v5  ;;  %v4302_v55 = vpop.eup %4301  ;;  %v7246_v5 = vld [vmem:[#allocation23_spill] sm:$0xff]  ;;  %v7248_v63 = vld [vmem:[#allocation25_spill] sm:$0xff] }
 0x153   :  { %v915_v54 = vmul.f32 0.0, %v4302_v55  ;;  %v4304_v44 = vpop.eup %4303  ;;  %v7250_v55 = vld [vmem:[#allocation27_spill] sm:$0xff] }
 0x155   :  { %v5317_v60 = vadd.f32 %v916_v49, %v915_v54  ;;  %v7249_v49 = vld [vmem:[#allocation26_spill] sm:$0xff]  ;;  %v7252_v54 = vld [vmem:[#allocation29_spill] sm:$0xff] }
 0x157   :  { %4305 = vtanh.f32 %v5317_v60 }
 0x161   :  { %v4306_v46 = vpop.eup %4305 }
 0x162   :  { %v919_v47 = vmul.f32 %v4306_v46, %v4304_v44  ;;  %v7253_v44 = vld [vmem:[#allocation30_spill] sm:$0xff]  ;;  %v7254_v46 = vld [vmem:[#allocation31_spill] sm:$0xff] }
 0x164   :  { %v5320_v58 = vpack.c.bf16 %v919_v47, %v919_v47  ;;  %v7255_v47 = vld [vmem:[#allocation32_spill] sm:$0xff] }
 0x166   :  { %1114 = vmatmul.mubr.bf16.vlgmr.msra.gmra.mrb[24].mxu0 %v5320_v58  ;;  %1155 = vmatmul.mubr.bf16.vlgmr.msra.gmra.mrb[24].mxu1 %v5320_v58 }
 0x167   :  { %1214 = vmatpush1.bf16.msra.mxu0 %v4863_v8  ;;  %1255 = vmatpush1.bf16.msra.mxu1 %v4866_v9  ;;  %v179_v8 = vld [vmem:[%s6774_s4 + $0x4] sm:$0xf] }
 0x168   :  { %1215 = vmatprep.subr.bf16.mxu0 %v4870_v10  ;;  %1256 = vmatprep.subr.bf16.mxu1 %v4874_v11  ;;  %v5362_v9 = vrot.slane %v179_v8, %v5185_v4 }
 0x169   :  { %1245 = vmatprep.mubr.bf16.mxu0 %v7174_v2  ;;  %1286 = vmatprep.mubr.bf16.mxu1 %v7174_v2 }
 0x16b   :  { %1216 = vmatpush1.bf16.msra.mxu0 %v4876_v12  ;;  %1257 = vmatpush1.bf16.msra.mxu1 %v4878_v13  ;;  %v5365_v12 = vrot.slane %v179_v8, %v5193_v0 }
 0x16c   :  { %1217 = vmatprep.subr.bf16.mxu0 %v4887_v15  ;;  %1258 = vmatprep.subr.bf16.mxu1 %v4890_v16 }
 0x16f   :  { %1218 = vmatpush1.bf16.msra.mxu0 %v4893_v17  ;;  %1259 = vmatpush1.bf16.msra.mxu1 %v4895_v18 }
 0x170   :  { %1219 = vmatprep.subr.bf16.mxu0 %v4899_v19  ;;  %1260 = vmatprep.subr.bf16.mxu1 %v4902_v20 }
 0x173   :  { %1220 = vmatpush1.bf16.msra.mxu0 %v4905_v21  ;;  %1261 = vmatpush1.bf16.msra.mxu1 %v4909_v22 }
 0x174   :  { %1221 = vmatprep.subr.bf16.mxu0 %v4913_v23  ;;  %1262 = vmatprep.subr.bf16.mxu1 %v4917_v24 }
 0x177   :  { %1222 = vmatpush1.bf16.msra.mxu0 %v4924_v26  ;;  %1263 = vmatpush1.bf16.msra.mxu1 %v4928_v27 }
 0x178   :  { %1223 = vmatprep.subr.bf16.mxu0 %v4930_v28  ;;  %1264 = vmatprep.subr.bf16.mxu1 %v4933_v29  ;;  %v7237_v29 = vsub.s32 2, %v5182_v3 }
 0x17b   :  { %1224 = vmatpush1.bf16.msra.mxu0 %v4938_v30  ;;  %1265 = vmatpush1.bf16.msra.mxu1 %v4940_v31  ;;  %v5375_v30 = vrot.slane %v179_v8, %v7237_v29  ;;  %v7238_v31 = vsub.s32 3, %v5182_v3  ;;  %v7273_v29 = vld [vmem:[#allocation50_spill] sm:$0xff] }
 0x17c   :  { %1225 = vmatprep.subr.bf16.mxu0 %v4944_v32  ;;  %1266 = vmatprep.subr.bf16.mxu1 %v4948_v33 }
 0x17d   :  { %v5379_v32 = vrot.slane %v179_v8, %v7238_v31  ;;  %v7256_v8 = vld [vmem:[#allocation33_spill] sm:$0xff]  ;;  %v7274_v31 = vld [vmem:[#allocation51_spill] sm:$0xff] }
 0x17f   :  { %1226 = vmatpush1.bf16.msra.mxu0 %v4954_v35  ;;  %1267 = vmatpush1.bf16.msra.mxu1 %v4957_v36 }
 0x180   :  { %1227 = vmatprep.subr.bf16.mxu0 %v4961_v37  ;;  %1268 = vmatprep.subr.bf16.mxu1 %v4964_v38 }
 0x183   :  { %1228 = vmatpush1.bf16.msra.mxu0 %v4969_v39  ;;  %1269 = vmatpush1.bf16.msra.mxu1 %v4971_v40 }
 0x184   :  { %1295 = vmatprep.subr.bf16.mxu0 %v4975_v41  ;;  %1336 = vmatprep.subr.bf16.mxu1 %v4979_v42 }
 0x239   :  { %v1115_v10 = vpop.f32.mrb[24].mxu0  ;;  %v1156_v11 = vpop.f32.mrb[24].mxu1 }
 0x23a   :  { %v1116_v13 = vadd.f32 %v1115_v10, %v5301_v62  ;;  %v1157_v15 = vadd.f32 %v1156_v11, %v5305_v52  ;;  %v1117_v16 = vpop.f32.mrb[25].mxu0  ;;  %v1158_v17 = vpop.f32.mrb[25].mxu1  ;;  %v7257_v10 = vld [vmem:[#allocation34_spill] sm:$0xff]  ;;  %v7258_v11 = vld [vmem:[#allocation35_spill] sm:$0xff] }
 0x23b   :  { %v1118_v18 = vadd.f32 %v1117_v16, %v5303_v53  ;;  %v1159_v19 = vadd.f32 %v1158_v17, %v5307_v51  ;;  %v1119_v20 = vpop.f32.mrb[26].mxu0  ;;  %v1160_v21 = vpop.f32.mrb[26].mxu1  ;;  %v7261_v16 = vld [vmem:[#allocation38_spill] sm:$0xff]  ;;  %v7262_v17 = vld [vmem:[#allocation39_spill] sm:$0xff] }
 0x23c   :  { %v1184_v22 = vadd.f32 %v5362_v9, %v1116_v13  ;;  %v1120_v23 = vpop.f32.mrb[27].mxu0  ;;  %v1161_v24 = vpop.f32.mrb[27].mxu1  ;;  %v1186_v33 = vadd.f32 %v5375_v30, %v1157_v15  ;;  %v7259_v13 = vld [vmem:[#allocation36_spill] sm:$0xff]  ;;  %v7260_v15 = vld [vmem:[#allocation37_spill] sm:$0xff]  ;;  %v7265_v20 = vld [vmem:[#allocation42_spill] sm:$0xff] }
 0x23d   :  { %v1185_v26 = vadd.f32 %v5365_v12, %v1118_v18  ;;  %v1187_v35 = vadd.f32 %v5379_v32, %v1159_v19  ;;  %v7263_v18 = vld [vmem:[#allocation40_spill] sm:$0xff]  ;;  %v7264_v19 = vld [vmem:[#allocation41_spill] sm:$0xff]  ;;  %v7266_v21 = vld [vmem:[#allocation43_spill] sm:$0xff] }
 0x23e   :  { %v3991_v27 = vmul.f32 -1.442695, %v1184_v22  ;;  %v3993_v36 = vmul.f32 -1.442695, %v1186_v33  ;;  %v7267_v22 = vld [vmem:[#allocation44_spill] sm:$0xff]  ;;  %v7268_v23 = vld [vmem:[#allocation45_spill] sm:$0xff] }
 0x23f   :  { %v3992_v28 = vmul.f32 -1.442695, %v1185_v26  ;;  %v7269_v24 = vld [vmem:[#allocation46_spill] sm:$0xff]  ;;  %v7270_v26 = vld [vmem:[#allocation47_spill] sm:$0xff]  ;;  %v7275_v33 = vld [vmem:[#allocation52_spill] sm:$0xff] }
 0x240   :  { %4307 = vpow2.f32 %v3991_v27  ;;  %v7271_v27 = vld [vmem:[#allocation48_spill] sm:$0xff] }
 0x241   :  { %4309 = vpow2.f32 %v3992_v28  ;;  %v7272_v28 = vld [vmem:[#allocation49_spill] sm:$0xff] }
 0x242   :  { %4311 = vtanh.f32 %v1187_v35  ;;  %v7276_v35 = vld [vmem:[#allocation53_spill] sm:$0xff] }
 0x243   :  { %4313 = vpow2.f32 %v3993_v36  ;;  %v7277_v36 = vld [vmem:[#allocation54_spill] sm:$0xff] }
 0x24a   :  { %v4308_v37 = vpop.eup %4307 }
 0x24b   :  { %v1197_v38 = vadd.f32 1.0, %v4308_v37  ;;  %v4310_v39 = vpop.eup %4309  ;;  %v7279_v37 = vld [vmem:[#allocation56_spill] sm:$0xff] }
 0x24c   :  { %v1198_v40 = vadd.f32 1.0, %v4310_v39  ;;  %v4312_v41 = vpop.eup %4311  ;;  %v7281_v39 = vld [vmem:[#allocation58_spill] sm:$0xff] }
 0x24d   :  { %4315 = vrcp.f32 %v1197_v38  ;;  %v4314_v42 = vpop.eup %4313  ;;  %v7280_v38 = vld [vmem:[#allocation57_spill] sm:$0xff] }
 0x24e   :  { %4317 = vrcp.f32 %v1198_v40  ;;  %v1199_v62 = vadd.f32 1.0, %v4314_v42  ;;  %v7282_v40 = vld [vmem:[#allocation59_spill] sm:$0xff]  ;;  %v7284_v42 = vld [vmem:[#allocation61_spill] sm:$0xff] }
 0x250   :  { %4319 = vrcp.f32 %v1199_v62  ;;  %v7288_v62 = vld [vmem:[#allocation65_spill] sm:$0xff] }
 0x257   :  { %v4316_v45 = vpop.eup %4315 }
 0x258   :  { %v1208_v53 = vmul.f32 %v4316_v45, %v4312_v41  ;;  %v4318_v3 = vpop.eup %4317  ;;  %v7283_v41 = vld [vmem:[#allocation60_spill] sm:$0xff]  ;;  %v7285_v45 = vld [vmem:[#allocation62_spill] sm:$0xff] }
 0x259   :  { %v1207_v52 = vmul.f32 0.0, %v4318_v3  ;;  %v7287_v3 = vld [vmem:[#allocation64_spill] sm:$0xff] }
 0x25a   :  { %v4320_v50 = vpop.eup %4319 }
 0x25b   :  { %v5383_v51 = vadd.f32 %v1208_v53, %v1207_v52  ;;  %v7286_v53 = vld [vmem:[#allocation63_spill] sm:$0xff]  ;;  %v7289_v52 = vld [vmem:[#allocation66_spill] sm:$0xff] }
 0x25d   :  { %4321 = vtanh.f32 %v5383_v51 }
 0x267   :  { %v4322_v57 = vpop.eup %4321 }
 0x268   :  { %v1211_v6 = vmul.f32 %v4322_v57, %v4320_v50  ;;  %v7290_v50 = vld [vmem:[#allocation67_spill] sm:$0xff]  ;;  %v7291_v57 = vld [vmem:[#allocation68_spill] sm:$0xff] }
 0x26a   :  { %v1212_v7 = vpack.c.bf16 %v1211_v6, %v1211_v6  ;;  %v7292_v6 = vld [vmem:[#allocation69_spill] sm:$0xff] }
 0x26c   :  { %1246 = vmatmul.mubr.bf16.vlgmr.msra.gmra.mrb[28].mxu0 %v1212_v7  ;;  %1287 = vmatmul.mubr.bf16.vlgmr.msra.gmra.mrb[28].mxu1 %v1212_v7  ;;  %v7293_v7 = vld [vmem:[#allocation70_spill] sm:$0xff] }
 0x26d   :  { %1296 = vmatpush1.bf16.msra.mxu0 %v4982_v43  ;;  %1337 = vmatpush1.bf16.msra.mxu1 %v7239_v61  ;;  %v7247_v43 = vld [vmem:[#allocation24_spill] sm:$0xff]  ;;  %v7294_v61 = vld [vmem:[#allocation71_spill] sm:$0xff] }
 0x26e   :  { %1297 = vmatprep.subr.bf16.mxu0 %v7240_v1  ;;  %1338 = vmatprep.subr.bf16.mxu1 %v7241_v25  ;;  %v7295_v1 = vld [vmem:[#allocation72_spill] sm:$0xff]  ;;  %v7296_v25 = vld [vmem:[#allocation73_spill] sm:$0xff] }
 0x26f   :  { %1327 = vmatprep.mubr.bf16.mxu0 %v7174_v2  ;;  %1368 = vmatprep.mubr.bf16.mxu1 %v7174_v2 }
 0x271   :  { %1298 = vmatpush1.bf16.msra.mxu0 %v7242_v34  ;;  %1339 = vmatpush1.bf16.msra.mxu1 %v7243_v59  ;;  %v7297_v34 = vld [vmem:[#allocation74_spill] sm:$0xff]  ;;  %v7298_v59 = vld [vmem:[#allocation75_spill] sm:$0xff] }
 0x272   :  { %1299 = vmatprep.subr.bf16.mxu0 %v7244_v14  ;;  %1340 = vmatprep.subr.bf16.mxu1 %v7245_v48  ;;  %v7299_v14 = vld [vmem:[#allocation76_spill] sm:$0xff] }
 0x273   :  { %v5454_v48 = vld [vmem:[#allocation5 + $0x224] ss:$16 sps:$4 sm:$0xff]  }
 0x274   :  { %7300 = vst [vmem:[#allocation16_spill] sm:$0xff] %v5454_v48 }
 0x275   :  { %1300 = vmatpush1.bf16.msra.mxu0 %v7246_v5  ;;  %1341 = vmatpush1.bf16.msra.mxu1 %v7247_v43  ;;  %v5457_v5 = vld [vmem:[#allocation5 + $0x22c] ss:$16 sps:$4 sm:$0xff]  }
 0x276   :  { %1301 = vmatprep.subr.bf16.mxu0 %v7248_v63  ;;  %1342 = vmatprep.subr.bf16.mxu1 %v7249_v49  ;;  %7301 = vst [vmem:[#allocation17_spill] sm:$0xff] %v5457_v5 }
 0x279   :  { %1302 = vmatpush1.bf16.msra.mxu0 %v7250_v55  ;;  %1343 = vmatpush1.bf16.msra.mxu1 %v7251_v56 }
 0x27a   :  { %1303 = vmatprep.subr.bf16.mxu0 %v7252_v54  ;;  %1344 = vmatprep.subr.bf16.mxu1 %v7253_v44 }
 0x27d   :  { %1304 = vmatpush1.bf16.msra.mxu0 %v7254_v46  ;;  %1345 = vmatpush1.bf16.msra.mxu1 %v7255_v47 }
 0x27e   :  { %1305 = vmatprep.subr.bf16.mxu0 %v7256_v8  ;;  %1346 = vmatprep.subr.bf16.mxu1 %v7257_v10  ;;  %v7302_v10 = vld [vmem:[#allocation79_spill] sm:$0xff] }
 0x281   :  { %1306 = vmatpush1.bf16.msra.mxu0 %v7258_v11  ;;  %1347 = vmatpush1.bf16.msra.mxu1 %v7259_v13  ;;  %v7303_v13 = vld [vmem:[#allocation81_spill] sm:$0xff] }
 0x282   :  { %1307 = vmatprep.subr.bf16.mxu0 %v7260_v15  ;;  %1348 = vmatprep.subr.bf16.mxu1 %v7261_v16 }
 0x285   :  { %1308 = vmatpush1.bf16.msra.mxu0 %v7262_v17  ;;  %1349 = vmatpush1.bf16.msra.mxu1 %v7263_v18  ;;  %v7304_v18 = vld [vmem:[#allocation80_spill] sm:$0xff] }
 0x286   :  { %1309 = vmatprep.subr.bf16.mxu0 %v7264_v19  ;;  %1350 = vmatprep.subr.bf16.mxu1 %v7265_v20  ;;  %v7305_v20 = vld [vmem:[#allocation82_spill] sm:$0xff] }
 0x289   :  { %1310 = vmatpush1.bf16.msra.mxu0 %v7266_v21  ;;  %1351 = vmatpush1.bf16.msra.mxu1 %v7267_v22 }
 0x28a   :  { %1406 = vmatprep.subr.bf16.mxu0 %v7268_v23  ;;  %1447 = vmatprep.subr.bf16.mxu1 %v7269_v24 }
 0x28c   :  { %1328 = vmatmul.mubr.bf16.vlgmr.msra.gmra.mrb[32].mxu0 %v5320_v58  ;;  %1369 = vmatmul.mubr.bf16.vlgmr.msra.gmra.mrb[32].mxu1 %v5320_v58  ;;  %v7278_v58 = vld [vmem:[#allocation55_spill] sm:$0xff] }
 0x28d   :  { %1407 = vmatpush1.bf16.msra.mxu0 %v7270_v26  ;;  %1448 = vmatpush1.bf16.msra.mxu1 %v7271_v27 }
 0x28e   :  { %1408 = vmatprep.subr.bf16.mxu0 %v7272_v28  ;;  %1449 = vmatprep.subr.bf16.mxu1 %v7273_v29 }
 0x28f   :  { %1438 = vmatprep.mubr.bf16.mxu0 %v7174_v2  ;;  %1479 = vmatprep.mubr.bf16.mxu1 %v7174_v2 }
 0x291   :  { %1409 = vmatpush1.bf16.msra.mxu0 %v7274_v31  ;;  %1450 = vmatpush1.bf16.msra.mxu1 %v7275_v33 }
 0x292   :  { %1410 = vmatprep.subr.bf16.mxu0 %v7276_v35  ;;  %1451 = vmatprep.subr.bf16.mxu1 %v7277_v36 }
 0x295   :  { %1411 = vmatpush1.bf16.msra.mxu0 %v7278_v58  ;;  %1452 = vmatpush1.bf16.msra.mxu1 %v7279_v37 }
 0x296   :  { %1412 = vmatprep.subr.bf16.mxu0 %v7280_v38  ;;  %1453 = vmatprep.subr.bf16.mxu1 %v7281_v39 }
 0x299   :  { %1413 = vmatpush1.bf16.msra.mxu0 %v7282_v40  ;;  %1454 = vmatpush1.bf16.msra.mxu1 %v7283_v41 }
 0x29a   :  { %1414 = vmatprep.subr.bf16.mxu0 %v7284_v42  ;;  %1455 = vmatprep.subr.bf16.mxu1 %v7285_v45 }
 0x29d   :  { %1415 = vmatpush1.bf16.msra.mxu0 %v7286_v53  ;;  %1456 = vmatpush1.bf16.msra.mxu1 %v7287_v3 }
 0x29e   :  { %1416 = vmatprep.subr.bf16.mxu0 %v7288_v62  ;;  %1457 = vmatprep.subr.bf16.mxu1 %v7289_v52 }
 0x2a1   :  { %1417 = vmatpush1.bf16.msra.mxu0 %v7290_v50  ;;  %1458 = vmatpush1.bf16.msra.mxu1 %v7291_v57 }
 0x2a2   :  { %1418 = vmatprep.subr.bf16.mxu0 %v7292_v6  ;;  %1459 = vmatprep.subr.bf16.mxu1 %v7293_v7 }
 0x2a5   :  { %1419 = vmatpush1.bf16.msra.mxu0 %v7294_v61  ;;  %1460 = vmatpush1.bf16.msra.mxu1 %v7295_v1 }
 0x2a6   :  { %1420 = vmatprep.subr.bf16.mxu0 %v7296_v25  ;;  %1461 = vmatprep.subr.bf16.mxu1 %v7297_v34 }
 0x2a9   :  { %1421 = vmatpush1.bf16.msra.mxu0 %v7298_v59  ;;  %1462 = vmatpush1.bf16.msra.mxu1 %v7299_v14 }
 0x2aa   :  { %1517 = vmatprep.subr.bf16.mxu0 %v5454_v48  ;;  %1558 = vmatprep.subr.bf16.mxu1 %v5457_v5 }
 0x33f   :  { %v5460_v43 = vpop.f32.mrb[28].mxu0  ;;  %v5462_v63 = vpop.f32.mrb[28].mxu1 }
 0x340   :  { %v5464_v49 = vpop.f32.mrb[29].mxu0  ;;  %v5466_v55 = vpop.f32.mrb[29].mxu1 }
 0x341   :  { %v1251_v56 = vpop.f32.mrb[30].mxu0  ;;  %v1292_v54 = vpop.f32.mrb[30].mxu1 }
 0x342   :  { %v1252_v44 = vpop.f32.mrb[31].mxu0  ;;  %v1293_v46 = vpop.f32.mrb[31].mxu1 }
 0x35f   :  { %v1329_v47 = vpop.f32.mrb[32].mxu0  ;;  %v1370_v8 = vpop.f32.mrb[32].mxu1 }
 0x360   :  { %v1377_v11 = vadd.f32 %v1329_v47, %v7302_v10  ;;  %v1379_v15 = vadd.f32 %v1370_v8, %v7303_v13  ;;  %v1331_v16 = vpop.f32.mrb[33].mxu0  ;;  %v1372_v17 = vpop.f32.mrb[33].mxu1 }
 0x361   :  { %v1378_v19 = vadd.f32 %v1331_v16, %v7304_v18  ;;  %v1380_v21 = vadd.f32 %v1372_v17, %v7305_v20  ;;  %v1333_v0 = vpop.f32.mrb[34].mxu0  ;;  %v1374_v4 = vpop.f32.mrb[34].mxu1  ;;  %v5483_v20 = vld [vmem:[#allocation5 + $0x228] ss:$16 sps:$4 sm:$0xff]  }
 0x362   :  { %v3994_v5 = vmul.f32 -1.442695, %v1377_v11  ;;  %v1334_v48 = vpop.f32.mrb[35].mxu0  ;;  %v1375_v56 = vpop.f32.mrb[35].mxu1  ;;  %v3996_v44 = vmul.f32 -1.442695, %v1379_v15 }
 0x363   :  { %v3995_v54 = vmul.f32 -1.442695, %v1378_v19  ;;  %v5494_v56 = vld [vmem:[#allocation5 + $0x240] ss:$16 sps:$4 sm:$0xff]  }
 0x364   :  { %4323 = vpow2.f32 %v3994_v5  ;;  %7306 = vst [vmem:[#allocation18_spill] sm:$0xff] %v5494_v56 }
 0x365   :  { %4325 = vpow2.f32 %v3995_v54  ;;  %v5497_v54 = vld [vmem:[#allocation5 + $0x248] ss:$16 sps:$4 sm:$0xff]  }
 0x366   :  { %4327 = vtanh.f32 %v1380_v21  ;;  %v5489_v21 = vld [vmem:[#allocation5 + $0x24c] ss:$16 sps:$4 sm:$0xff]   ;;  %7307 = vst [vmem:[#allocation19_spill] sm:$0xff] %v5497_v54 }
 0x367   :  { %4329 = vpow2.f32 %v3996_v44  ;;  %v5500_v44 = vld [vmem:[#allocation5 + $0x264] ss:$16 sps:$4 sm:$0xff]  }
 0x368   :  { %7308 = vst [vmem:[#allocation20_spill] sm:$0xff] %v5500_v44 }
 0x36e   :  { %v4324_v46 = vpop.eup %4323 }
 0x36f   :  { %v1390_v14 = vadd.f32 1.0, %v4324_v46  ;;  %v4326_v47 = vpop.eup %4325  ;;  %v5503_v46 = vld [vmem:[#allocation5 + $0x26c] ss:$16 sps:$4 sm:$0xff]  }
 0x370   :  { %v1391_v8 = vadd.f32 1.0, %v4326_v47  ;;  %v4328_v10 = vpop.eup %4327  ;;  %7309 = vst [vmem:[#allocation21_spill] sm:$0xff] %v5503_v46  ;;  %v5506_v47 = vld [vmem:[#allocation5 + $0x260] ss:$16 sps:$4 sm:$0xff]  }
 0x371   :  { %4331 = vrcp.f32 %v1390_v14  ;;  %v4330_v13 = vpop.eup %4329  ;;  %v5480_v14 = vld [vmem:[#allocation5 + $0x220] ss:$16 sps:$4 sm:$0xff]   ;;  %7310 = vst [vmem:[#allocation22_spill] sm:$0xff] %v5506_v47 }
 0x372   :  { %4333 = vrcp.f32 %v1391_v8  ;;  %v1392_v11 = vadd.f32 1.0, %v4330_v13  ;;  %v5509_v8 = vld [vmem:[#allocation5 + $0x268] ss:$16 sps:$4 sm:$0xff]   ;;  %v5515_v13 = vld [vmem:[#allocation5 + $0x28c] ss:$16 sps:$4 sm:$0xff]  }
 0x373   :  { %7311 = vst [vmem:[#allocation23_spill] sm:$0xff] %v5509_v8  ;;  %7313 = vst [vmem:[#allocation25_spill] sm:$0xff] %v5515_v13 }
 0x374   :  { %4335 = vrcp.f32 %v1392_v11  ;;  %v5527_v11 = vld [vmem:[#allocation5 + $0x2ac] ss:$16 sps:$4 sm:$0xff]  }
 0x375   :  { %7317 = vst [vmem:[#allocation29_spill] sm:$0xff] %v5527_v11 }
 0x37b   :  { %v4332_v16 = vpop.eup %4331 }
 0x37c   :  { %v1401_v0 = vmul.f32 %v4332_v16, %v4328_v10  ;;  %v4334_v4 = vpop.eup %4333  ;;  %v5512_v10 = vld [vmem:[#allocation5 + $0x284] ss:$16 sps:$4 sm:$0xff]   ;;  %v5518_v16 = vld [vmem:[#allocation5 + $0x280] ss:$16 sps:$4 sm:$0xff]  }
 0x37d   :  { %v1400_v48 = vmul.f32 %v4334_v4, %v5317_v60  ;;  %v5486_v60 = vld [vmem:[#allocation5 + $0x244] ss:$16 sps:$4 sm:$0xff]   ;;  %7312 = vst [vmem:[#allocation24_spill] sm:$0xff] %v5512_v10  ;;  %7314 = vst [vmem:[#allocation26_spill] sm:$0xff] %v5518_v16 }
 0x37e   :  { %v4336_v5 = vpop.eup %4335  ;;  %v5524_v4 = vld [vmem:[#allocation5 + $0x2a4] ss:$16 sps:$4 sm:$0xff]  }
 0x37f   :  { %v5473_v17 = vadd.f32 %v1401_v0, %v1400_v48  ;;  %v5521_v0 = vld [vmem:[#allocation5 + $0x288] ss:$16 sps:$4 sm:$0xff]   ;;  %7316 = vst [vmem:[#allocation28_spill] sm:$0xff] %v5524_v4  ;;  %v5530_v48 = vld [vmem:[#allocation5 + $0x2a0] ss:$16 sps:$4 sm:$0xff]  }
 0x380   :  { %7315 = vst [vmem:[#allocation27_spill] sm:$0xff] %v5521_v0  ;;  %7318 = vst [vmem:[#allocation30_spill] sm:$0xff] %v5530_v48 }
 0x381   :  { %4337 = vtanh.f32 %v5473_v17 }
 0x38b   :  { %v4338_v15 = vpop.eup %4337 }
 0x38c   :  { %v1404_v18 = vmul.f32 %v4338_v15, %v4336_v5  ;;  %v5533_v5 = vld [vmem:[#allocation5 + $0x2a8] ss:$16 sps:$4 sm:$0xff]   ;;  %v5536_v15 = vld [vmem:[#allocation5 + $0x2c4] ss:$16 sps:$4 sm:$0xff]  }
 0x38d   :  { %7319 = vst [vmem:[#allocation31_spill] sm:$0xff] %v5533_v5  ;;  %7320 = vst [vmem:[#allocation32_spill] sm:$0xff] %v5536_v15 }
 0x38e   :  { %v5476_v19 = vpack.c.bf16 %v1404_v18, %v1404_v18  ;;  %v5539_v18 = vld [vmem:[#allocation5 + $0x2cc] ss:$16 sps:$4 sm:$0xff]  }
 0x38f   :  { %7321 = vst [vmem:[#allocation33_spill] sm:$0xff] %v5539_v18 }
 0x390   :  { %1439 = vmatmul.mubr.bf16.vlgmr.msra.gmra.mrb[36].mxu0 %v5476_v19  ;;  %1480 = vmatmul.mubr.bf16.vlgmr.msra.gmra.mrb[36].mxu1 %v5476_v19 }
 0x391   :  { %1518 = vmatpush1.bf16.msra.mxu0 %v5480_v14  ;;  %1559 = vmatpush1.bf16.msra.mxu1 %v5483_v20 }
 0x392   :  { %1519 = vmatprep.subr.bf16.mxu0 %v5486_v60  ;;  %1560 = vmatprep.subr.bf16.mxu1 %v5489_v21 }
 0x393   :  { %1549 = vmatprep.mubr.bf16.mxu0 %v7174_v2  ;;  %1590 = vmatprep.mubr.bf16.mxu1 %v7174_v2 }
 0x395   :  { %1520 = vmatpush1.bf16.msra.mxu0 %v5494_v56  ;;  %1561 = vmatpush1.bf16.msra.mxu1 %v5497_v54 }
 0x396   :  { %1521 = vmatprep.subr.bf16.mxu0 %v5500_v44  ;;  %1562 = vmatprep.subr.bf16.mxu1 %v5503_v46 }
 0x399   :  { %1522 = vmatpush1.bf16.msra.mxu0 %v5506_v47  ;;  %1563 = vmatpush1.bf16.msra.mxu1 %v5509_v8 }
 0x39a   :  { %1523 = vmatprep.subr.bf16.mxu0 %v5512_v10  ;;  %1564 = vmatprep.subr.bf16.mxu1 %v5515_v13 }
 0x39d   :  { %1524 = vmatpush1.bf16.msra.mxu0 %v5518_v16  ;;  %1565 = vmatpush1.bf16.msra.mxu1 %v5521_v0 }
 0x39e   :  { %1525 = vmatprep.subr.bf16.mxu0 %v5524_v4  ;;  %1566 = vmatprep.subr.bf16.mxu1 %v5527_v11  ;;  %v5542_v4 = vld [vmem:[#allocation5 + $0x2c0] ss:$16 sps:$4 sm:$0xff]   ;;  %v5545_v11 = vld [vmem:[#allocation5 + $0x2c8] ss:$16 sps:$4 sm:$0xff]  }
 0x39f   :  { %7322 = vst [vmem:[#allocation34_spill] sm:$0xff] %v5542_v4  ;;  %7323 = vst [vmem:[#allocation35_spill] sm:$0xff] %v5545_v11 }
 0x3a1   :  { %1526 = vmatpush1.bf16.msra.mxu0 %v5530_v48  ;;  %1567 = vmatpush1.bf16.msra.mxu1 %v5533_v5  ;;  %v5548_v48 = vld [vmem:[#allocation5 + $0x2e4] ss:$16 sps:$4 sm:$0xff]   ;;  %v5551_v5 = vld [vmem:[#allocation5 + $0x2ec] ss:$16 sps:$4 sm:$0xff]  }
 0x3a2   :  { %1527 = vmatprep.subr.bf16.mxu0 %v5536_v15  ;;  %1568 = vmatprep.subr.bf16.mxu1 %v5539_v18  ;;  %7324 = vst [vmem:[#allocation36_spill] sm:$0xff] %v5548_v48  ;;  %7325 = vst [vmem:[#allocation37_spill] sm:$0xff] %v5551_v5  ;;  %v5554_v15 = vld [vmem:[#allocation5 + $0x2e0] ss:$16 sps:$4 sm:$0xff]   ;;  %v5557_v18 = vld [vmem:[#allocation5 + $0x2e8] ss:$16 sps:$4 sm:$0xff]  }
 0x3a3   :  { %7326 = vst [vmem:[#allocation38_spill] sm:$0xff] %v5554_v15  ;;  %7327 = vst [vmem:[#allocation39_spill] sm:$0xff] %v5557_v18 }
 0x3a5   :  { %1528 = vmatpush1.bf16.msra.mxu0 %v5542_v4  ;;  %1569 = vmatpush1.bf16.msra.mxu1 %v5545_v11  ;;  %v5560_v4 = vld [vmem:[#allocation5 + $0x304] ss:$16 sps:$4 sm:$0xff]   ;;  %v5563_v11 = vld [vmem:[#allocation5 + $0x30c] ss:$16 sps:$4 sm:$0xff]  }
 0x3a6   :  { %1529 = vmatprep.subr.bf16.mxu0 %v5548_v48  ;;  %1570 = vmatprep.subr.bf16.mxu1 %v5551_v5  ;;  %7328 = vst [vmem:[#allocation40_spill] sm:$0xff] %v5560_v4  ;;  %7329 = vst [vmem:[#allocation41_spill] sm:$0xff] %v5563_v11  ;;  %v5566_v48 = vld [vmem:[#allocation5 + $0x300] ss:$16 sps:$4 sm:$0xff]   ;;  %v5569_v5 = vld [vmem:[#allocation5 + $0x308] ss:$16 sps:$4 sm:$0xff]  }
 0x3a7   :  { %7330 = vst [vmem:[#allocation42_spill] sm:$0xff] %v5566_v48  ;;  %7331 = vst [vmem:[#allocation43_spill] sm:$0xff] %v5569_v5 }
 0x3a9   :  { %1530 = vmatpush1.bf16.msra.mxu0 %v5554_v15  ;;  %1571 = vmatpush1.bf16.msra.mxu1 %v5557_v18  ;;  %v5572_v15 = vld [vmem:[#allocation5 + $0x24] ss:$16 sps:$4 sm:$0xff]   ;;  %v5575_v18 = vld [vmem:[#allocation5 + $0x2c] ss:$16 sps:$4 sm:$0xff]  }
 0x3aa   :  { %1531 = vmatprep.subr.bf16.mxu0 %v5560_v4  ;;  %1572 = vmatprep.subr.bf16.mxu1 %v5563_v11  ;;  %7332 = vst [vmem:[#allocation44_spill] sm:$0xff] %v5572_v15  ;;  %7333 = vst [vmem:[#allocation45_spill] sm:$0xff] %v5575_v18 }
 0x3ad   :  { %1532 = vmatpush1.bf16.msra.mxu0 %v5566_v48  ;;  %1573 = vmatpush1.bf16.msra.mxu1 %v5569_v5 }
 0x3ae   :  { %1599 = vmatprep.subr.bf16.mxu0 %v5572_v15  ;;  %1640 = vmatprep.subr.bf16.mxu1 %v5575_v18 }
 0x463   :  { %v1440_v4 = vpop.f32.mrb[36].mxu0  ;;  %v1481_v0 = vpop.f32.mrb[36].mxu1 }
 0x464   :  { %v1441_v11 = vadd.f32 %v1440_v4, %v5460_v43  ;;  %v1482_v16 = vadd.f32 %v1481_v0, %v5462_v63  ;;  %v1442_v13 = vpop.f32.mrb[37].mxu0  ;;  %v1483_v48 = vpop.f32.mrb[37].mxu1 }
 0x465   :  { %v1443_v10 = vadd.f32 %v1442_v13, %v5464_v49  ;;  %v1484_v5 = vadd.f32 %v1483_v48, %v5466_v55  ;;  %v1444_v8 = vpop.f32.mrb[38].mxu0  ;;  %v1485_v47 = vpop.f32.mrb[38].mxu1 }
 0x466   :  { %v1488_v15 = vadd.f32 %v1441_v11, %v5362_v9  ;;  %v1445_v46 = vpop.f32.mrb[39].mxu0  ;;  %v1486_v44 = vpop.f32.mrb[39].mxu1  ;;  %v1490_v43 = vadd.f32 %v1482_v16, %v5375_v30 }
 0x467   :  { %v1489_v18 = vadd.f32 %v1443_v10, %v5365_v12  ;;  %v1491_v63 = vadd.f32 %v1484_v5, %v5379_v32 }
 0x468   :  { %v3997_v54 = vmul.f32 -1.442695, %v1488_v15  ;;  %v3999_v0 = vmul.f32 -1.442695, %v1490_v43  ;;  %v5593_v43 = vld [vmem:[#allocation5 + $0x28] ss:$16 sps:$4 sm:$0xff]  }
 0x469   :  { %v3998_v56 = vmul.f32 -1.442695, %v1489_v18  ;;  %v5590_v18 = vld [vmem:[#allocation5 + $0x20] ss:$16 sps:$4 sm:$0xff]  }
 0x46a   :  { %4339 = vpow2.f32 %v3997_v54 }
 0x46b   :  { %4341 = vpow2.f32 %v3998_v56 }
 0x46c   :  { %4343 = vtanh.f32 %v1491_v63  ;;  %v5599_v63 = vld [vmem:[#allocation5 + $0x4c] ss:$16 sps:$4 sm:$0xff]  }
 0x46d   :  { %4345 = vpow2.f32 %v3999_v0  ;;  %v5604_v0 = vld [vmem:[#allocation5 + $0x40] ss:$16 sps:$4 sm:$0xff]  }
 0x474   :  { %v4340_v49 = vpop.eup %4339 }
 0x475   :  { %v1501_v13 = vadd.f32 1.0, %v4340_v49  ;;  %v4342_v55 = vpop.eup %4341  ;;  %v5607_v49 = vld [vmem:[#allocation5 + $0x48] ss:$16 sps:$4 sm:$0xff]  }
 0x476   :  { %v1502_v47 = vadd.f32 1.0, %v4342_v55  ;;  %v4344_v44 = vpop.eup %4343  ;;  %v5613_v55 = vld [vmem:[#allocation5 + $0x6c] ss:$16 sps:$4 sm:$0xff]  }
 0x477   :  { %4347 = vrcp.f32 %v1501_v13  ;;  %v4346_v46 = vpop.eup %4345  ;;  %v5610_v13 = vld [vmem:[#allocation5 + $0x64] ss:$16 sps:$4 sm:$0xff]  }
 0x478   :  { %4349 = vrcp.f32 %v1502_v47  ;;  %v1503_v54 = vadd.f32 1.0, %v4346_v46  ;;  %v5616_v47 = vld [vmem:[#allocation5 + $0x60] ss:$16 sps:$4 sm:$0xff]   ;;  %v5622_v46 = vld [vmem:[#allocation5 + $0x84] ss:$16 sps:$4 sm:$0xff]  }
 0x47a   :  { %4351 = vrcp.f32 %v1503_v54  ;;  %v5634_v54 = vld [vmem:[#allocation5 + $0xa4] ss:$16 sps:$4 sm:$0xff]  }
 0x47b   :  { %7334 = vst [vmem:[#allocation46_spill] sm:$0xff] %v5634_v54 }
 0x481   :  { %v4348_v8 = vpop.eup %4347 }
 0x482   :  { %v1512_v10 = vmul.f32 %v4348_v8, %v4344_v44  ;;  %v4350_v4 = vpop.eup %4349  ;;  %v5619_v44 = vld [vmem:[#allocation5 + $0x68] ss:$16 sps:$4 sm:$0xff]   ;;  %v5625_v8 = vld [vmem:[#allocation5 + $0x8c] ss:$16 sps:$4 sm:$0xff]  }
 0x483   :  { %v1511_v56 = vmul.f32 %v4350_v4, %v5383_v51  ;;  %v5596_v51 = vld [vmem:[#allocation5 + $0x44] ss:$16 sps:$4 sm:$0xff]   ;;  %v5631_v4 = vld [vmem:[#allocation5 + $0x88] ss:$16 sps:$4 sm:$0xff]  }
 0x484   :  { %v4352_v11 = vpop.eup %4351 }
 0x485   :  { %v5587_v16 = vadd.f32 %v1512_v10, %v1511_v56  ;;  %v5628_v10 = vld [vmem:[#allocation5 + $0x80] ss:$16 sps:$4 sm:$0xff]   ;;  %v5637_v56 = vld [vmem:[#allocation5 + $0xac] ss:$16 sps:$4 sm:$0xff]  }
 0x486   :  { %7335 = vst [vmem:[#allocation47_spill] sm:$0xff] %v5637_v56 }
 0x487   :  { %4353 = vtanh.f32 %v5587_v16 }
 0x491   :  { %v4354_v48 = vpop.eup %4353 }
 0x492   :  { %v1515_v5 = vmul.f32 %v4354_v48, %v4352_v11  ;;  %v5640_v11 = vld [vmem:[#allocation5 + $0xa0] ss:$16 sps:$4 sm:$0xff]   ;;  %v5643_v48 = vld [vmem:[#allocation5 + $0xa8] ss:$16 sps:$4 sm:$0xff]  }
 0x493   :  { %7336 = vst [vmem:[#allocation48_spill] sm:$0xff] %v5640_v11  ;;  %7337 = vst [vmem:[#allocation49_spill] sm:$0xff] %v5643_v48 }
 0x494   :  { %v1516_v15 = vpack.c.bf16 %v1515_v5, %v1515_v5  ;;  %v5646_v5 = vld [vmem:[#allocation5 + $0xc4] ss:$16 sps:$4 sm:$0xff]  }
 0x495   :  { %7338 = vst [vmem:[#allocation50_spill] sm:$0xff] %v5646_v5 }
 0x496   :  { %1550 = vmatmul.mubr.bf16.vlgmr.msra.gmra.mrb[40].mxu0 %v1516_v15  ;;  %1591 = vmatmul.mubr.bf16.vlgmr.msra.gmra.mrb[40].mxu1 %v1516_v15  ;;  %v5649_v15 = vld [vmem:[#allocation5 + $0xcc] ss:$16 sps:$4 sm:$0xff]  }
 0x497   :  { %1600 = vmatpush1.bf16.msra.mxu0 %v5590_v18  ;;  %1641 = vmatpush1.bf16.msra.mxu1 %v5593_v43  ;;  %7339 = vst [vmem:[#allocation51_spill] sm:$0xff] %v5649_v15 }
 0x498   :  { %1601 = vmatprep.subr.bf16.mxu0 %v5596_v51  ;;  %1642 = vmatprep.subr.bf16.mxu1 %v5599_v63 }
 0x499   :  { %1631 = vmatprep.mubr.bf16.mxu0 %v7174_v2  ;;  %1672 = vmatprep.mubr.bf16.mxu1 %v7174_v2 }
 0x49b   :  { %1602 = vmatpush1.bf16.msra.mxu0 %v5604_v0  ;;  %1643 = vmatpush1.bf16.msra.mxu1 %v5607_v49 }
 0x49c   :  { %1603 = vmatprep.subr.bf16.mxu0 %v5610_v13  ;;  %1644 = vmatprep.subr.bf16.mxu1 %v5613_v55 }
 0x49f   :  { %1604 = vmatpush1.bf16.msra.mxu0 %v5616_v47  ;;  %1645 = vmatpush1.bf16.msra.mxu1 %v5619_v44 }
 0x4a0   :  { %1605 = vmatprep.subr.bf16.mxu0 %v5622_v46  ;;  %1646 = vmatprep.subr.bf16.mxu1 %v5625_v8 }
 0x4a3   :  { %1606 = vmatpush1.bf16.msra.mxu0 %v5628_v10  ;;  %1647 = vmatpush1.bf16.msra.mxu1 %v5631_v4 }
 0x4a4   :  { %1607 = vmatprep.subr.bf16.mxu0 %v5634_v54  ;;  %1648 = vmatprep.subr.bf16.mxu1 %v5637_v56  ;;  %v5652_v54 = vld [vmem:[#allocation5 + $0xc0] ss:$16 sps:$4 sm:$0xff]   ;;  %v5655_v56 = vld [vmem:[#allocation5 + $0xc8] ss:$16 sps:$4 sm:$0xff]  }
 0x4a5   :  { %7340 = vst [vmem:[#allocation52_spill] sm:$0xff] %v5652_v54  ;;  %7341 = vst [vmem:[#allocation53_spill] sm:$0xff] %v5655_v56 }
 0x4a7   :  { %1608 = vmatpush1.bf16.msra.mxu0 %v5640_v11  ;;  %1649 = vmatpush1.bf16.msra.mxu1 %v5643_v48  ;;  %v5658_v11 = vld [vmem:[#allocation5 + $0xe4] ss:$16 sps:$4 sm:$0xff]   ;;  %v5661_v48 = vld [vmem:[#allocation5 + $0xec] ss:$16 sps:$4 sm:$0xff]  }
 0x4a8   :  { %1609 = vmatprep.subr.bf16.mxu0 %v5646_v5  ;;  %1650 = vmatprep.subr.bf16.mxu1 %v5649_v15  ;;  %7342 = vst [vmem:[#allocation54_spill] sm:$0xff] %v5658_v11  ;;  %7343 = vst [vmem:[#allocation55_spill] sm:$0xff] %v5661_v48  ;;  %v5664_v5 = vld [vmem:[#allocation5 + $0xe0] ss:$16 sps:$4 sm:$0xff]   ;;  %v5667_v15 = vld [vmem:[#allocation5 + $0xe8] ss:$16 sps:$4 sm:$0xff]  }
 0x4a9   :  { %7344 = vst [vmem:[#allocation56_spill] sm:$0xff] %v5664_v5  ;;  %7345 = vst [vmem:[#allocation57_spill] sm:$0xff] %v5667_v15 }
 0x4ab   :  { %1610 = vmatpush1.bf16.msra.mxu0 %v5652_v54  ;;  %1651 = vmatpush1.bf16.msra.mxu1 %v5655_v56  ;;  %v5670_v54 = vld [vmem:[#allocation5 + $0x104] ss:$16 sps:$4 sm:$0xff]   ;;  %v5673_v56 = vld [vmem:[#allocation5 + $0x10c] ss:$16 sps:$4 sm:$0xff]  }
 0x4ac   :  { %1611 = vmatprep.subr.bf16.mxu0 %v5658_v11  ;;  %1652 = vmatprep.subr.bf16.mxu1 %v5661_v48  ;;  %7346 = vst [vmem:[#allocation58_spill] sm:$0xff] %v5670_v54  ;;  %7347 = vst [vmem:[#allocation59_spill] sm:$0xff] %v5673_v56  ;;  %v5676_v11 = vld [vmem:[#allocation5 + $0x100] ss:$16 sps:$4 sm:$0xff]  }
 0x4ad   :  { %7348 = vst [vmem:[#allocation60_spill] sm:$0xff] %v5676_v11 }
 0x4af   :  { %1612 = vmatpush1.bf16.msra.mxu0 %v5664_v5  ;;  %1653 = vmatpush1.bf16.msra.mxu1 %v5667_v15 }
 0x4b0   :  { %1613 = vmatprep.subr.bf16.mxu0 %v5670_v54  ;;  %1654 = vmatprep.subr.bf16.mxu1 %v5673_v56 }
 0x4b3   :  { %1614 = vmatpush1.bf16.msra.mxu0 %v5676_v11  ;;  %1655 = vmatpush1.bf16.msra.mxu1 %v7267_v22  ;;  %v7349_v22 = vld [vmem:[#allocation76_spill] sm:$0xff] }
 0x4b4   :  { %1710 = vmatprep.subr.bf16.mxu0 %v7268_v23  ;;  %1751 = vmatprep.subr.bf16.mxu1 %v7269_v24  ;;  %v7350_v23 = vld [vmem:[#allocation16_spill] sm:$0xff]  ;;  %v7351_v24 = vld [vmem:[#allocation17_spill] sm:$0xff] }
 0x4b6   :  { %1632 = vmatmul.mubr.bf16.vlgmr.msra.gmra.mrb[44].mxu0 %v5476_v19  ;;  %1673 = vmatmul.mubr.bf16.vlgmr.msra.gmra.mrb[44].mxu1 %v5476_v19 }
 0x4b7   :  { %1711 = vmatpush1.bf16.msra.mxu0 %v7270_v26  ;;  %1752 = vmatpush1.bf16.msra.mxu1 %v7271_v27 }
 0x4b8   :  { %1712 = vmatprep.subr.bf16.mxu0 %v7272_v28  ;;  %1753 = vmatprep.subr.bf16.mxu1 %v7273_v29 }
 0x4b9   :  { %1742 = vmatprep.mubr.bf16.mxu0 %v7174_v2  ;;  %1783 = vmatprep.mubr.bf16.mxu1 %v7174_v2 }
 0x4bb   :  { %1713 = vmatpush1.bf16.msra.mxu0 %v7274_v31  ;;  %1754 = vmatpush1.bf16.msra.mxu1 %v7275_v33 }
 0x4bc   :  { %1714 = vmatprep.subr.bf16.mxu0 %v7276_v35  ;;  %1755 = vmatprep.subr.bf16.mxu1 %v7277_v36 }
 0x4bf   :  { %1715 = vmatpush1.bf16.msra.mxu0 %v7278_v58  ;;  %1756 = vmatpush1.bf16.msra.mxu1 %v7279_v37 }
 0x4c0   :  { %1716 = vmatprep.subr.bf16.mxu0 %v7280_v38  ;;  %1757 = vmatprep.subr.bf16.mxu1 %v7281_v39  ;;  %v7352_v38 = vld [vmem:[#allocation83_spill] sm:$0xff] }
 0x4c3   :  { %1717 = vmatpush1.bf16.msra.mxu0 %v7282_v40  ;;  %1758 = vmatpush1.bf16.msra.mxu1 %v7283_v41  ;;  %v7353_v40 = vld [vmem:[#allocation85_spill] sm:$0xff] }
 0x4c4   :  { %1718 = vmatprep.subr.bf16.mxu0 %v7284_v42  ;;  %1759 = vmatprep.subr.bf16.mxu1 %v7285_v45 }
 0x4c7   :  { %1719 = vmatpush1.bf16.msra.mxu0 %v7286_v53  ;;  %1760 = vmatpush1.bf16.msra.mxu1 %v7287_v3  ;;  %v7354_v53 = vld [vmem:[#allocation84_spill] sm:$0xff] }
 0x4c8   :  { %1720 = vmatprep.subr.bf16.mxu0 %v7288_v62  ;;  %1761 = vmatprep.subr.bf16.mxu1 %v7289_v52  ;;  %v7355_v62 = vld [vmem:[#allocation87_spill] sm:$0xff] }
 0x4cb   :  { %1721 = vmatpush1.bf16.msra.mxu0 %v7290_v50  ;;  %1762 = vmatpush1.bf16.msra.mxu1 %v7291_v57 }
 0x4cc   :  { %1722 = vmatprep.subr.bf16.mxu0 %v7292_v6  ;;  %1763 = vmatprep.subr.bf16.mxu1 %v7293_v7 }
 0x4cf   :  { %1723 = vmatpush1.bf16.msra.mxu0 %v7294_v61  ;;  %1764 = vmatpush1.bf16.msra.mxu1 %v7295_v1 }
 0x4d0   :  { %1724 = vmatprep.subr.bf16.mxu0 %v7296_v25  ;;  %1765 = vmatprep.subr.bf16.mxu1 %v7297_v34 }
 0x4d3   :  { %1725 = vmatpush1.bf16.msra.mxu0 %v7298_v59  ;;  %1766 = vmatpush1.bf16.msra.mxu1 %v7349_v22 }
 0x4d4   :  { %1821 = vmatprep.subr.bf16.mxu0 %v7350_v23  ;;  %1862 = vmatprep.subr.bf16.mxu1 %v7351_v24 }
 0x569   :  { %v5718_v26 = vpop.f32.mrb[40].mxu0  ;;  %v5720_v27 = vpop.f32.mrb[40].mxu1 }
 0x56a   :  { %v5722_v28 = vpop.f32.mrb[41].mxu0  ;;  %v5724_v29 = vpop.f32.mrb[41].mxu1 }
 0x56b   :  { %v1555_v31 = vpop.f32.mrb[42].mxu0  ;;  %v1596_v33 = vpop.f32.mrb[42].mxu1 }
 0x56c   :  { %v1556_v35 = vpop.f32.mrb[43].mxu0  ;;  %v1597_v36 = vpop.f32.mrb[43].mxu1 }
 0x589   :  { %v1633_v58 = vpop.f32.mrb[44].mxu0  ;;  %v1674_v37 = vpop.f32.mrb[44].mxu1 }
 0x58a   :  { %v1681_v39 = vadd.f32 %v1633_v58, %v7352_v38  ;;  %v1683_v41 = vadd.f32 %v1674_v37, %v7353_v40  ;;  %v1635_v42 = vpop.f32.mrb[45].mxu0  ;;  %v1676_v45 = vpop.f32.mrb[45].mxu1 }
 0x58b   :  { %v1682_v3 = vadd.f32 %v1635_v42, %v7354_v53  ;;  %v1684_v52 = vadd.f32 %v1676_v45, %v7355_v62  ;;  %v1637_v50 = vpop.f32.mrb[46].mxu0  ;;  %v1678_v57 = vpop.f32.mrb[46].mxu1  ;;  %v7357_v53 = vld [vmem:[#allocation19_spill] sm:$0xff]  ;;  %v7359_v62 = vld [vmem:[#allocation21_spill] sm:$0xff] }
 0x58c   :  { %v4000_v6 = vmul.f32 -1.442695, %v1681_v39  ;;  %v1638_v7 = vpop.f32.mrb[47].mxu0  ;;  %v1679_v61 = vpop.f32.mrb[47].mxu1  ;;  %v4002_v25 = vmul.f32 -1.442695, %v1683_v41 }
 0x58d   :  { %v4001_v1 = vmul.f32 -1.442695, %v1682_v3  ;;  %v7358_v3 = vld [vmem:[#allocation20_spill] sm:$0xff]  ;;  %v7361_v50 = vld [vmem:[#allocation23_spill] sm:$0xff]  ;;  %v7364_v7 = vld [vmem:[#allocation26_spill] sm:$0xff] }
 0x58e   :  { %4355 = vpow2.f32 %v4000_v6  ;;  %v7362_v57 = vld [vmem:[#allocation24_spill] sm:$0xff]  ;;  %v7363_v6 = vld [vmem:[#allocation25_spill] sm:$0xff]  ;;  %v7365_v61 = vld [vmem:[#allocation27_spill] sm:$0xff] }
 0x58f   :  { %4357 = vpow2.f32 %v4001_v1  ;;  %v7366_v1 = vld [vmem:[#allocation28_spill] sm:$0xff] }
 0x590   :  { %4359 = vtanh.f32 %v1684_v52  ;;  %v7360_v52 = vld [vmem:[#allocation22_spill] sm:$0xff] }
 0x591   :  { %4361 = vpow2.f32 %v4002_v25  ;;  %v7367_v25 = vld [vmem:[#allocation29_spill] sm:$0xff] }
 0x598   :  { %v4356_v34 = vpop.eup %4355 }
 0x599   :  { %v1694_v59 = vadd.f32 1.0, %v4356_v34  ;;  %v4358_v19 = vpop.eup %4357  ;;  %v7368_v34 = vld [vmem:[#allocation30_spill] sm:$0xff] }
 0x59a   :  { %v1695_v22 = vadd.f32 1.0, %v4358_v19  ;;  %v4360_v31 = vpop.eup %4359  ;;  %v7370_v19 = vld [vmem:[#allocation32_spill] sm:$0xff] }
 0x59b   :  { %4363 = vrcp.f32 %v1694_v59  ;;  %v4362_v33 = vpop.eup %4361  ;;  %v7369_v59 = vld [vmem:[#allocation31_spill] sm:$0xff] }
 0x59c   :  { %4365 = vrcp.f32 %v1695_v22  ;;  %v1696_v37 = vadd.f32 1.0, %v4362_v33  ;;  %v7371_v22 = vld [vmem:[#allocation33_spill] sm:$0xff]  ;;  %v7373_v33 = vld [vmem:[#allocation35_spill] sm:$0xff] }
 0x59e   :  { %4367 = vrcp.f32 %v1696_v37  ;;  %v7377_v37 = vld [vmem:[#allocation39_spill] sm:$0xff] }
 0x5a5   :  { %v4364_v35 = vpop.eup %4363 }
 0x5a6   :  { %v1705_v36 = vmul.f32 %v4364_v35, %v4360_v31  ;;  %v4366_v58 = vpop.eup %4365  ;;  %v7372_v31 = vld [vmem:[#allocation34_spill] sm:$0xff]  ;;  %v7374_v35 = vld [vmem:[#allocation36_spill] sm:$0xff] }
 0x5a7   :  { %v1704_v38 = vmul.f32 %v4366_v58, %v5473_v17  ;;  %v7356_v17 = vld [vmem:[#allocation18_spill] sm:$0xff] }
 0x5a8   :  { %v4368_v40 = vpop.eup %4367  ;;  %v7376_v58 = vld [vmem:[#allocation38_spill] sm:$0xff] }
 0x5a9   :  { %v5731_v39 = vadd.f32 %v1705_v36, %v1704_v38  ;;  %v7375_v36 = vld [vmem:[#allocation37_spill] sm:$0xff]  ;;  %v7378_v38 = vld [vmem:[#allocation40_spill] sm:$0xff] }
 0x5ab   :  { %4369 = vtanh.f32 %v5731_v39 }
 0x5b5   :  { %v4370_v41 = vpop.eup %4369 }
 0x5b6   :  { %v1708_v42 = vmul.f32 %v4370_v41, %v4368_v40  ;;  %v7379_v40 = vld [vmem:[#allocation41_spill] sm:$0xff]  ;;  %v7380_v41 = vld [vmem:[#allocation42_spill] sm:$0xff] }
 0x5b8   :  { %v5734_v45 = vpack.c.bf16 %v1708_v42, %v1708_v42  ;;  %v7381_v42 = vld [vmem:[#allocation43_spill] sm:$0xff] }
 0x5ba   :  { %1743 = vmatmul.mubr.bf16.vlgmr.msra.gmra.mrb[48].mxu0 %v5734_v45  ;;  %1784 = vmatmul.mubr.bf16.vlgmr.msra.gmra.mrb[48].mxu1 %v5734_v45 }
 0x5bb   :  { %1822 = vmatpush1.bf16.msra.mxu0 %v5480_v14  ;;  %1863 = vmatpush1.bf16.msra.mxu1 %v5483_v20 }
 0x5bc   :  { %1823 = vmatprep.subr.bf16.mxu0 %v5486_v60  ;;  %1864 = vmatprep.subr.bf16.mxu1 %v5489_v21 }
 0x5bd   :  { %1853 = vmatprep.mubr.bf16.mxu0 %v7174_v2  ;;  %1894 = vmatprep.mubr.bf16.mxu1 %v7174_v2 }
 0x5bf   :  { %1824 = vmatpush1.bf16.msra.mxu0 %v7356_v17  ;;  %1865 = vmatpush1.bf16.msra.mxu1 %v7357_v53 }
 0x5c0   :  { %1825 = vmatprep.subr.bf16.mxu0 %v7358_v3  ;;  %1866 = vmatprep.subr.bf16.mxu1 %v7359_v62 }
 0x5c3   :  { %1826 = vmatpush1.bf16.msra.mxu0 %v7360_v52  ;;  %1867 = vmatpush1.bf16.msra.mxu1 %v7361_v50 }
 0x5c4   :  { %1827 = vmatprep.subr.bf16.mxu0 %v7362_v57  ;;  %1868 = vmatprep.subr.bf16.mxu1 %v7363_v6 }
 0x5c7   :  { %1828 = vmatpush1.bf16.msra.mxu0 %v7364_v7  ;;  %1869 = vmatpush1.bf16.msra.mxu1 %v7365_v61 }
 0x5c8   :  { %1829 = vmatprep.subr.bf16.mxu0 %v7366_v1  ;;  %1870 = vmatprep.subr.bf16.mxu1 %v7367_v25 }
 0x5cb   :  { %1830 = vmatpush1.bf16.msra.mxu0 %v7368_v34  ;;  %1871 = vmatpush1.bf16.msra.mxu1 %v7369_v59 }
 0x5cc   :  { %1831 = vmatprep.subr.bf16.mxu0 %v7370_v19  ;;  %1872 = vmatprep.subr.bf16.mxu1 %v7371_v22  ;;  %v7382_v22 = vld [vmem:[#allocation44_spill] sm:$0xff] }
 0x5cf   :  { %1832 = vmatpush1.bf16.msra.mxu0 %v7372_v31  ;;  %1873 = vmatpush1.bf16.msra.mxu1 %v7373_v33  ;;  %v7383_v31 = vld [vmem:[#allocation45_spill] sm:$0xff] }
 0x5d0   :  { %1833 = vmatprep.subr.bf16.mxu0 %v7374_v35  ;;  %1874 = vmatprep.subr.bf16.mxu1 %v7375_v36 }
 0x5d3   :  { %1834 = vmatpush1.bf16.msra.mxu0 %v7376_v58  ;;  %1875 = vmatpush1.bf16.msra.mxu1 %v7377_v37 }
 0x5d4   :  { %1835 = vmatprep.subr.bf16.mxu0 %v7378_v38  ;;  %1876 = vmatprep.subr.bf16.mxu1 %v7379_v40 }
 0x5d7   :  { %1836 = vmatpush1.bf16.msra.mxu0 %v7380_v41  ;;  %1877 = vmatpush1.bf16.msra.mxu1 %v7381_v42 }
 0x5d8   :  { %1903 = vmatprep.subr.bf16.mxu0 %v7382_v22  ;;  %1944 = vmatprep.subr.bf16.mxu1 %v7383_v31 }
 0x68d   :  { %v1744_v33 = vpop.f32.mrb[48].mxu0  ;;  %v1785_v35 = vpop.f32.mrb[48].mxu1 }
 0x68e   :  { %v1745_v36 = vadd.f32 %v1744_v33, %v5718_v26  ;;  %v1786_v58 = vadd.f32 %v1785_v35, %v5720_v27  ;;  %v1746_v19 = vpop.f32.mrb[49].mxu0  ;;  %v1787_v37 = vpop.f32.mrb[49].mxu1 }
 0x68f   :  { %v1747_v38 = vadd.f32 %v1746_v19, %v5722_v28  ;;  %v1788_v40 = vadd.f32 %v1787_v37, %v5724_v29  ;;  %v1748_v59 = vpop.f32.mrb[50].mxu0  ;;  %v1789_v41 = vpop.f32.mrb[50].mxu1 }
 0x690   :  { %v1792_v42 = vadd.f32 %v1745_v36, %v5362_v9  ;;  %v1749_v34 = vpop.f32.mrb[51].mxu0  ;;  %v1790_v22 = vpop.f32.mrb[51].mxu1  ;;  %v1794_v26 = vadd.f32 %v1786_v58, %v5375_v30 }
 0x691   :  { %v1793_v31 = vadd.f32 %v1747_v38, %v5365_v12  ;;  %v1795_v27 = vadd.f32 %v1788_v40, %v5379_v32 }
 0x692   :  { %v4003_v25 = vmul.f32 -1.442695, %v1792_v42  ;;  %v4005_v33 = vmul.f32 -1.442695, %v1794_v26  ;;  %v7385_v42 = vld [vmem:[#allocation47_spill] sm:$0xff]  ;;  %v7386_v26 = vld [vmem:[#allocation48_spill] sm:$0xff] }
 0x693   :  { %v4004_v1 = vmul.f32 -1.442695, %v1793_v31 }
 0x694   :  { %4371 = vpow2.f32 %v4003_v25 }
 0x695   :  { %4373 = vpow2.f32 %v4004_v1 }
 0x696   :  { %4375 = vtanh.f32 %v1795_v27  ;;  %v7387_v27 = vld [vmem:[#allocation49_spill] sm:$0xff] }
 0x697   :  { %4377 = vpow2.f32 %v4005_v33  ;;  %v7388_v33 = vld [vmem:[#allocation50_spill] sm:$0xff] }
 0x69e   :  { %v4372_v28 = vpop.eup %4371 }
 0x69f   :  { %v1805_v19 = vadd.f32 1.0, %v4372_v28  ;;  %v4374_v29 = vpop.eup %4373  ;;  %v7389_v28 = vld [vmem:[#allocation51_spill] sm:$0xff] }
 0x6a0   :  { %v1806_v59 = vadd.f32 1.0, %v4374_v29  ;;  %v4376_v34 = vpop.eup %4375  ;;  %v7391_v29 = vld [vmem:[#allocation53_spill] sm:$0xff] }
 0x6a1   :  { %4379 = vrcp.f32 %v1805_v19  ;;  %v4378_v22 = vpop.eup %4377  ;;  %v7390_v19 = vld [vmem:[#allocation52_spill] sm:$0xff] }
 0x6a2   :  { %4381 = vrcp.f32 %v1806_v59  ;;  %v1807_v25 = vadd.f32 1.0, %v4378_v22  ;;  %v7392_v59 = vld [vmem:[#allocation54_spill] sm:$0xff] }
 0x6a3   :  { %v5818_v22 = vld [vmem:[#allocation5 + $0x124] ss:$16 sps:$4 sm:$0xff]  }
 0x6a4   :  { %4383 = vrcp.f32 %v1807_v25  ;;  %7394 = vst [vmem:[#allocation62_spill] sm:$0xff] %v5818_v22  ;;  %v5832_v25 = vld [vmem:[#allocation5 + $0x144] ss:$16 sps:$4 sm:$0xff]  }
 0x6a5   :  { %7398 = vst [vmem:[#allocation66_spill] sm:$0xff] %v5832_v25 }
 0x6ab   :  { %v4380_v35 = vpop.eup %4379 }
 0x6ac   :  { %v1816_v36 = vmul.f32 %v4380_v35, %v4376_v34  ;;  %v4382_v31 = vpop.eup %4381  ;;  %v5815_v34 = vld [vmem:[#allocation5 + $0x108] ss:$16 sps:$4 sm:$0xff]   ;;  %v5821_v35 = vld [vmem:[#allocation5 + $0x12c] ss:$16 sps:$4 sm:$0xff]  }
 0x6ad   :  { %v1815_v1 = vmul.f32 %v4382_v31, %v5587_v16  ;;  %v7384_v16 = vld [vmem:[#allocation46_spill] sm:$0xff]  ;;  %7393 = vst [vmem:[#allocation61_spill] sm:$0xff] %v5815_v34  ;;  %7395 = vst [vmem:[#allocation63_spill] sm:$0xff] %v5821_v35  ;;  %v5829_v31 = vld [vmem:[#allocation5 + $0x128] ss:$16 sps:$4 sm:$0xff]  }
 0x6ae   :  { %v4384_v37 = vpop.eup %4383  ;;  %7397 = vst [vmem:[#allocation65_spill] sm:$0xff] %v5829_v31 }
 0x6af   :  { %v5781_v58 = vadd.f32 %v1816_v36, %v1815_v1  ;;  %v5826_v36 = vld [vmem:[#allocation5 + $0x120] ss:$16 sps:$4 sm:$0xff]   ;;  %v5835_v1 = vld [vmem:[#allocation5 + $0x14c] ss:$16 sps:$4 sm:$0xff]  }
 0x6b0   :  { %7396 = vst [vmem:[#allocation64_spill] sm:$0xff] %v5826_v36  ;;  %7399 = vst [vmem:[#allocation67_spill] sm:$0xff] %v5835_v1 }
 0x6b1   :  { %4385 = vtanh.f32 %v5781_v58 }
 0x6bb   :  { %v4386_v38 = vpop.eup %4385 }
 0x6bc   :  { %v1819_v40 = vmul.f32 %v4386_v38, %v4384_v37  ;;  %v5843_v37 = vld [vmem:[#allocation5 + $0x148] ss:$16 sps:$4 sm:$0xff]   ;;  %v5846_v38 = vld [vmem:[#allocation5 + $0x164] ss:$16 sps:$4 sm:$0xff]  }
 0x6bd   :  { %7401 = vst [vmem:[#allocation69_spill] sm:$0xff] %v5843_v37  ;;  %7402 = vst [vmem:[#allocation70_spill] sm:$0xff] %v5846_v38 }
 0x6be   :  { %v1820_v41 = vpack.c.bf16 %v1819_v40, %v1819_v40  ;;  %v5849_v40 = vld [vmem:[#allocation5 + $0x16c] ss:$16 sps:$4 sm:$0xff]  }
 0x6bf   :  { %7403 = vst [vmem:[#allocation71_spill] sm:$0xff] %v5849_v40 }
 0x6c0   :  { %1854 = vmatmul.mubr.bf16.vlgmr.msra.gmra.mrb[52].mxu0 %v1820_v41  ;;  %1895 = vmatmul.mubr.bf16.vlgmr.msra.gmra.mrb[52].mxu1 %v1820_v41  ;;  %v5852_v41 = vld [vmem:[#allocation5 + $0x160] ss:$16 sps:$4 sm:$0xff]  }
 0x6c1   :  { %1904 = vmatpush1.bf16.msra.mxu0 %v5590_v18  ;;  %1945 = vmatpush1.bf16.msra.mxu1 %v5593_v43  ;;  %7404 = vst [vmem:[#allocation72_spill] sm:$0xff] %v5852_v41 }
 0x6c2   :  { %1905 = vmatprep.subr.bf16.mxu0 %v5596_v51  ;;  %1946 = vmatprep.subr.bf16.mxu1 %v5599_v63 }
 0x6c3   :  { %1935 = vmatprep.mubr.bf16.mxu0 %v7174_v2  ;;  %1976 = vmatprep.mubr.bf16.mxu1 %v7174_v2 }
 0x6c5   :  { %1906 = vmatpush1.bf16.msra.mxu0 %v5604_v0  ;;  %1947 = vmatpush1.bf16.msra.mxu1 %v5607_v49 }
 0x6c6   :  { %1907 = vmatprep.subr.bf16.mxu0 %v5610_v13  ;;  %1948 = vmatprep.subr.bf16.mxu1 %v5613_v55 }
 0x6c9   :  { %1908 = vmatpush1.bf16.msra.mxu0 %v5616_v47  ;;  %1949 = vmatpush1.bf16.msra.mxu1 %v5619_v44 }
 0x6ca   :  { %1909 = vmatprep.subr.bf16.mxu0 %v5622_v46  ;;  %1950 = vmatprep.subr.bf16.mxu1 %v5625_v8 }
 0x6cd   :  { %1910 = vmatpush1.bf16.msra.mxu0 %v5628_v10  ;;  %1951 = vmatpush1.bf16.msra.mxu1 %v5631_v4 }
 0x6ce   :  { %1911 = vmatprep.subr.bf16.mxu0 %v7384_v16  ;;  %1952 = vmatprep.subr.bf16.mxu1 %v7385_v42 }
 0x6d1   :  { %1912 = vmatpush1.bf16.msra.mxu0 %v7386_v26  ;;  %1953 = vmatpush1.bf16.msra.mxu1 %v7387_v27 }
 0x6d2   :  { %1913 = vmatprep.subr.bf16.mxu0 %v7388_v33  ;;  %1954 = vmatprep.subr.bf16.mxu1 %v7389_v28 }
 0x6d5   :  { %1914 = vmatpush1.bf16.msra.mxu0 %v7390_v19  ;;  %1955 = vmatpush1.bf16.msra.mxu1 %v7391_v29 }
 0x6d6   :  { %1915 = vmatprep.subr.bf16.mxu0 %v7392_v59  ;;  %1956 = vmatprep.subr.bf16.mxu1 %v5661_v48 }
 0x6d9   :  { %1916 = vmatpush1.bf16.msra.mxu0 %v5664_v5  ;;  %1957 = vmatpush1.bf16.msra.mxu1 %v5667_v15  ;;  %v7429_v5 = vld [vmem:[#allocation90_spill] sm:$0xff] }
 0x6da   :  { %1917 = vmatprep.subr.bf16.mxu0 %v5670_v54  ;;  %1958 = vmatprep.subr.bf16.mxu1 %v5673_v56  ;;  %v7428_v54 = vld [vmem:[#allocation88_spill] sm:$0xff] }
 0x6dd   :  { %1918 = vmatpush1.bf16.msra.mxu0 %v5676_v11  ;;  %1959 = vmatpush1.bf16.msra.mxu1 %v5815_v34  ;;  %v7426_v34 = vld [vmem:[#allocation86_spill] sm:$0xff]  ;;  %v7427_v11 = vld [vmem:[#allocation89_spill] sm:$0xff] }
 0x6de   :  { %2014 = vmatprep.subr.bf16.mxu0 %v5818_v22  ;;  %2055 = vmatprep.subr.bf16.mxu1 %v5821_v35 }
 0x6e0   :  { %1936 = vmatmul.mubr.bf16.vlgmr.msra.gmra.mrb[56].mxu0 %v5734_v45  ;;  %1977 = vmatmul.mubr.bf16.vlgmr.msra.gmra.mrb[56].mxu1 %v5734_v45  ;;  %v5840_v45 = vld [vmem:[#allocation5 + $0x140] ss:$16 sps:$4 sm:$0xff]  }
 0x6e1   :  { %2015 = vmatpush1.bf16.msra.mxu0 %v5826_v36  ;;  %2056 = vmatpush1.bf16.msra.mxu1 %v5829_v31  ;;  %7400 = vst [vmem:[#allocation68_spill] sm:$0xff] %v5840_v45 }
 0x6e2   :  { %2016 = vmatprep.subr.bf16.mxu0 %v5832_v25  ;;  %2057 = vmatprep.subr.bf16.mxu1 %v5835_v1  ;;  %v5855_v1 = vld [vmem:[#allocation5 + $0x168] ss:$16 sps:$4 sm:$0xff]  }
 0x6e3   :  { %2046 = vmatprep.mubr.bf16.mxu0 %v7174_v2  ;;  %2087 = vmatprep.mubr.bf16.mxu1 %v7174_v2  ;;  %7405 = vst [vmem:[#allocation73_spill] sm:$0xff] %v5855_v1 }
 0x6e5   :  { %2017 = vmatpush1.bf16.msra.mxu0 %v5840_v45  ;;  %2058 = vmatpush1.bf16.msra.mxu1 %v5843_v37  ;;  %v5858_v45 = vld [vmem:[#allocation5 + $0x184] ss:$16 sps:$4 sm:$0xff]   ;;  %v5861_v37 = vld [vmem:[#allocation5 + $0x18c] ss:$16 sps:$4 sm:$0xff]  }
 0x6e6   :  { %2018 = vmatprep.subr.bf16.mxu0 %v5846_v38  ;;  %2059 = vmatprep.subr.bf16.mxu1 %v5849_v40  ;;  %7406 = vst [vmem:[#allocation74_spill] sm:$0xff] %v5858_v45  ;;  %7407 = vst [vmem:[#allocation75_spill] sm:$0xff] %v5861_v37  ;;  %v5864_v38 = vld [vmem:[#allocation5 + $0x180] ss:$16 sps:$4 sm:$0xff]   ;;  %v5867_v40 = vld [vmem:[#allocation5 + $0x188] ss:$16 sps:$4 sm:$0xff]  }
 0x6e7   :  { %7408 = vst [vmem:[#allocation79_spill] sm:$0xff] %v5864_v38  ;;  %7409 = vst [vmem:[#allocation81_spill] sm:$0xff] %v5867_v40 }
 0x6e9   :  { %2019 = vmatpush1.bf16.msra.mxu0 %v5852_v41  ;;  %2060 = vmatpush1.bf16.msra.mxu1 %v5855_v1  ;;  %v5870_v41 = vld [vmem:[#allocation5 + $0x1a4] ss:$16 sps:$4 sm:$0xff]   ;;  %v5873_v1 = vld [vmem:[#allocation5 + $0x1ac] ss:$16 sps:$4 sm:$0xff]  }
 0x6ea   :  { %2020 = vmatprep.subr.bf16.mxu0 %v5858_v45  ;;  %2061 = vmatprep.subr.bf16.mxu1 %v5861_v37  ;;  %7410 = vst [vmem:[#allocation80_spill] sm:$0xff] %v5870_v41  ;;  %7411 = vst [vmem:[#allocation82_spill] sm:$0xff] %v5873_v1  ;;  %v5876_v45 = vld [vmem:[#allocation5 + $0x1a0] ss:$16 sps:$4 sm:$0xff]   ;;  %v5879_v37 = vld [vmem:[#allocation5 + $0x1a8] ss:$16 sps:$4 sm:$0xff]  }
 0x6eb   :  { %7412 = vst [vmem:[#allocation76_spill] sm:$0xff] %v5876_v45  ;;  %7413 = vst [vmem:[#allocation16_spill] sm:$0xff] %v5879_v37 }
 0x6ed   :  { %2021 = vmatpush1.bf16.msra.mxu0 %v5864_v38  ;;  %2062 = vmatpush1.bf16.msra.mxu1 %v5867_v40  ;;  %v5882_v38 = vld [vmem:[#allocation5 + $0x1c4] ss:$16 sps:$4 sm:$0xff]   ;;  %v5885_v40 = vld [vmem:[#allocation5 + $0x1cc] ss:$16 sps:$4 sm:$0xff]  }
 0x6ee   :  { %2022 = vmatprep.subr.bf16.mxu0 %v5870_v41  ;;  %2063 = vmatprep.subr.bf16.mxu1 %v5873_v1  ;;  %7414 = vst [vmem:[#allocation17_spill] sm:$0xff] %v5882_v38  ;;  %7415 = vst [vmem:[#allocation83_spill] sm:$0xff] %v5885_v40  ;;  %v5888_v41 = vld [vmem:[#allocation5 + $0x1c0] ss:$16 sps:$4 sm:$0xff]   ;;  %v5891_v1 = vld [vmem:[#allocation5 + $0x1c8] ss:$16 sps:$4 sm:$0xff]  }
 0x6ef   :  { %7416 = vst [vmem:[#allocation85_spill] sm:$0xff] %v5888_v41  ;;  %7417 = vst [vmem:[#allocation84_spill] sm:$0xff] %v5891_v1 }
 0x6f1   :  { %2023 = vmatpush1.bf16.msra.mxu0 %v5876_v45  ;;  %2064 = vmatpush1.bf16.msra.mxu1 %v5879_v37  ;;  %v5894_v45 = vld [vmem:[#allocation5 + $0x1e4] ss:$16 sps:$4 sm:$0xff]   ;;  %v5897_v37 = vld [vmem:[#allocation5 + $0x1ec] ss:$16 sps:$4 sm:$0xff]  }
 0x6f2   :  { %2024 = vmatprep.subr.bf16.mxu0 %v5882_v38  ;;  %2065 = vmatprep.subr.bf16.mxu1 %v5885_v40  ;;  %7418 = vst [vmem:[#allocation87_spill] sm:$0xff] %v5894_v45  ;;  %7419 = vst [vmem:[#allocation18_spill] sm:$0xff] %v5897_v37  ;;  %v5900_v38 = vld [vmem:[#allocation5 + $0x1e0] ss:$16 sps:$4 sm:$0xff]   ;;  %v5903_v40 = vld [vmem:[#allocation5 + $0x1e8] ss:$16 sps:$4 sm:$0xff]  }
 0x6f3   :  { %7420 = vst [vmem:[#allocation19_spill] sm:$0xff] %v5900_v38  ;;  %7421 = vst [vmem:[#allocation20_spill] sm:$0xff] %v5903_v40 }
 0x6f5   :  { %2025 = vmatpush1.bf16.msra.mxu0 %v5888_v41  ;;  %2066 = vmatpush1.bf16.msra.mxu1 %v5891_v1  ;;  %v5906_v41 = vld [vmem:[#allocation5 + $0x204] ss:$16 sps:$4 sm:$0xff]   ;;  %v5909_v1 = vld [vmem:[#allocation5 + $0x20c] ss:$16 sps:$4 sm:$0xff]  }
 0x6f6   :  { %2026 = vmatprep.subr.bf16.mxu0 %v5894_v45  ;;  %2067 = vmatprep.subr.bf16.mxu1 %v5897_v37  ;;  %7422 = vst [vmem:[#allocation21_spill] sm:$0xff] %v5906_v41  ;;  %7423 = vst [vmem:[#allocation22_spill] sm:$0xff] %v5909_v1  ;;  %v5912_v45 = vld [vmem:[#allocation5 + $0x200] ss:$16 sps:$4 sm:$0xff]   ;;  %v5915_v37 = vld [vmem:[#allocation5 + $0x208] ss:$16 sps:$4 sm:$0xff]  }
 0x6f7   :  { %7424 = vst [vmem:[#allocation23_spill] sm:$0xff] %v5912_v45  ;;  %7425 = vst [vmem:[#allocation24_spill] sm:$0xff] %v5915_v37 }
 0x6f9   :  { %2027 = vmatpush1.bf16.msra.mxu0 %v5900_v38  ;;  %2068 = vmatpush1.bf16.msra.mxu1 %v5903_v40 }
 0x6fa   :  { %2028 = vmatprep.subr.bf16.mxu0 %v5906_v41  ;;  %2069 = vmatprep.subr.bf16.mxu1 %v5909_v1 }
 0x6fd   :  { %2029 = vmatpush1.bf16.msra.mxu0 %v5912_v45  ;;  %2070 = vmatpush1.bf16.msra.mxu1 %v5915_v37 }
 0x6fe   :  { %2125 = vmatprep.subr.bf16.mxu0 %v7350_v23  ;;  %2166 = vmatprep.subr.bf16.mxu1 %v7351_v24 }
 0x793   :  { %v5920_v40 = vpop.f32.mrb[52].mxu0  ;;  %v5922_v38 = vpop.f32.mrb[52].mxu1 }
 0x794   :  { %v5924_v41 = vpop.f32.mrb[53].mxu0  ;;  %v5926_v25 = vpop.f32.mrb[53].mxu1 }
 0x795   :  { %v1859_v1 = vpop.f32.mrb[54].mxu0  ;;  %v1900_v31 = vpop.f32.mrb[54].mxu1 }
 0x796   :  { %v1860_v36 = vpop.f32.mrb[55].mxu0  ;;  %v1901_v45 = vpop.f32.mrb[55].mxu1 }
 0x7b3   :  { %v1937_v35 = vpop.f32.mrb[56].mxu0  ;;  %v1978_v22 = vpop.f32.mrb[56].mxu1 }
 0x7b4   :  { %v1985_v37 = vadd.f32 %v1937_v35, %v7426_v34  ;;  %v1987_v23 = vadd.f32 %v1978_v22, %v7427_v11  ;;  %v1939_v56 = vpop.f32.mrb[57].mxu0  ;;  %v1980_v24 = vpop.f32.mrb[57].mxu1 }
 0x7b5   :  { %v1986_v15 = vadd.f32 %v1939_v56, %v7428_v54  ;;  %v1988_v48 = vadd.f32 %v1980_v24, %v7429_v5  ;;  %v1941_v59 = vpop.f32.mrb[58].mxu0  ;;  %v1982_v29 = vpop.f32.mrb[58].mxu1  ;;  %v7447_v24 = vld [vmem:[#allocation45_spill] sm:$0xff] }
 0x7b6   :  { %v4006_v19 = vmul.f32 -1.442695, %v1985_v37  ;;  %v1942_v28 = vpop.f32.mrb[59].mxu0  ;;  %v1983_v1 = vpop.f32.mrb[59].mxu1  ;;  %v4008_v36 = vmul.f32 -1.442695, %v1987_v23 }
 0x7b7   :  { %v4007_v31 = vmul.f32 -1.442695, %v1986_v15  ;;  %v7446_v23 = vld [vmem:[#allocation44_spill] sm:$0xff] }
 0x7b8   :  { %4387 = vpow2.f32 %v4006_v19 }
 0x7b9   :  { %4389 = vpow2.f32 %v4007_v31 }
 0x7ba   :  { %4391 = vtanh.f32 %v1988_v48 }
 0x7bb   :  { %4393 = vpow2.f32 %v4008_v36 }
 0x7c2   :  { %v4388_v45 = vpop.eup %4387 }
 0x7c3   :  { %v1998_v33 = vadd.f32 1.0, %v4388_v45  ;;  %v4390_v34 = vpop.eup %4389 }
 0x7c4   :  { %v1999_v11 = vadd.f32 1.0, %v4390_v34  ;;  %v4392_v54 = vpop.eup %4391 }
 0x7c5   :  { %4395 = vrcp.f32 %v1998_v33  ;;  %v4394_v56 = vpop.eup %4393  ;;  %v7445_v33 = vld [vmem:[#allocation43_spill] sm:$0xff] }
 0x7c6   :  { %4397 = vrcp.f32 %v1999_v11  ;;  %v2000_v22 = vadd.f32 1.0, %v4394_v56 }
 0x7c8   :  { %4399 = vrcp.f32 %v2000_v22 }
 0x7cf   :  { %v4396_v5 = vpop.eup %4395 }
 0x7d0   :  { %v2009_v59 = vmul.f32 %v4396_v5, %v4392_v54  ;;  %v4398_v29 = vpop.eup %4397 }
 0x7d1   :  { %v2008_v28 = vmul.f32 %v4398_v29, %v5731_v39  ;;  %v7434_v39 = vld [vmem:[#allocation32_spill] sm:$0xff] }
 0x7d2   :  { %v4400_v19 = vpop.eup %4399 }
 0x7d3   :  { %v5933_v15 = vadd.f32 %v2009_v59, %v2008_v28 }
 0x7d5   :  { %4401 = vtanh.f32 %v5933_v15 }
 0x7df   :  { %v4402_v48 = vpop.eup %4401 }
 0x7e0   :  { %v2012_v35 = vmul.f32 %v4402_v48, %v4400_v19 }
 0x7e2   :  { %v5936_v37 = vpack.c.bf16 %v2012_v35, %v2012_v35 }
 0x7e4   :  { %2047 = vmatmul.mubr.bf16.vlgmr.msra.gmra.mrb[60].mxu0 %v5936_v37  ;;  %2088 = vmatmul.mubr.bf16.vlgmr.msra.gmra.mrb[60].mxu1 %v5936_v37 }
 0x7e5   :  { %2126 = vmatpush1.bf16.msra.mxu0 %v5480_v14  ;;  %2167 = vmatpush1.bf16.msra.mxu1 %v5483_v20  ;;  %v7430_v14 = vld [vmem:[#allocation28_spill] sm:$0xff]  ;;  %v7431_v20 = vld [vmem:[#allocation29_spill] sm:$0xff] }
 0x7e6   :  { %2127 = vmatprep.subr.bf16.mxu0 %v5486_v60  ;;  %2168 = vmatprep.subr.bf16.mxu1 %v5489_v21  ;;  %v7432_v60 = vld [vmem:[#allocation30_spill] sm:$0xff]  ;;  %v7433_v21 = vld [vmem:[#allocation31_spill] sm:$0xff] }
 0x7e7   :  { %2157 = vmatprep.mubr.bf16.mxu0 %v7174_v2  ;;  %2198 = vmatprep.mubr.bf16.mxu1 %v7174_v2 }
 0x7e9   :  { %2128 = vmatpush1.bf16.msra.mxu0 %v7356_v17  ;;  %2169 = vmatpush1.bf16.msra.mxu1 %v7357_v53  ;;  %v7435_v17 = vld [vmem:[#allocation33_spill] sm:$0xff]  ;;  %v7436_v53 = vld [vmem:[#allocation34_spill] sm:$0xff] }
 0x7ea   :  { %2129 = vmatprep.subr.bf16.mxu0 %v7358_v3  ;;  %2170 = vmatprep.subr.bf16.mxu1 %v7359_v62  ;;  %v7437_v3 = vld [vmem:[#allocation35_spill] sm:$0xff]  ;;  %v7438_v62 = vld [vmem:[#allocation36_spill] sm:$0xff] }
 0x7ed   :  { %2130 = vmatpush1.bf16.msra.mxu0 %v7360_v52  ;;  %2171 = vmatpush1.bf16.msra.mxu1 %v7361_v50  ;;  %v7439_v52 = vld [vmem:[#allocation37_spill] sm:$0xff]  ;;  %v7440_v50 = vld [vmem:[#allocation38_spill] sm:$0xff] }
 0x7ee   :  { %2131 = vmatprep.subr.bf16.mxu0 %v7362_v57  ;;  %2172 = vmatprep.subr.bf16.mxu1 %v7363_v6  ;;  %v7441_v57 = vld [vmem:[#allocation39_spill] sm:$0xff]  ;;  %v7442_v6 = vld [vmem:[#allocation40_spill] sm:$0xff] }
 0x7f1   :  { %2132 = vmatpush1.bf16.msra.mxu0 %v7364_v7  ;;  %2173 = vmatpush1.bf16.msra.mxu1 %v7365_v61  ;;  %v7443_v7 = vld [vmem:[#allocation41_spill] sm:$0xff]  ;;  %v7444_v61 = vld [vmem:[#allocation42_spill] sm:$0xff] }
 0x7f2   :  { %2133 = vmatprep.subr.bf16.mxu0 %v7430_v14  ;;  %2174 = vmatprep.subr.bf16.mxu1 %v7431_v20 }
 0x7f5   :  { %2134 = vmatpush1.bf16.msra.mxu0 %v7432_v60  ;;  %2175 = vmatpush1.bf16.msra.mxu1 %v7433_v21 }
 0x7f6   :  { %2135 = vmatprep.subr.bf16.mxu0 %v7434_v39  ;;  %2176 = vmatprep.subr.bf16.mxu1 %v7435_v17 }
 0x7f9   :  { %2136 = vmatpush1.bf16.msra.mxu0 %v7436_v53  ;;  %2177 = vmatpush1.bf16.msra.mxu1 %v7437_v3 }
 0x7fa   :  { %2137 = vmatprep.subr.bf16.mxu0 %v7438_v62  ;;  %2178 = vmatprep.subr.bf16.mxu1 %v7439_v52 }
 0x7fd   :  { %2138 = vmatpush1.bf16.msra.mxu0 %v7440_v50  ;;  %2179 = vmatpush1.bf16.msra.mxu1 %v7441_v57 }
 0x7fe   :  { %2139 = vmatprep.subr.bf16.mxu0 %v7442_v6  ;;  %2180 = vmatprep.subr.bf16.mxu1 %v7443_v7 }
 0x801   :  { %2140 = vmatpush1.bf16.msra.mxu0 %v7444_v61  ;;  %2181 = vmatpush1.bf16.msra.mxu1 %v7445_v33  ;;  %v7467_v33 = vld [vmem:[#allocation69_spill] sm:$0xff] }
 0x802   :  { %2207 = vmatprep.subr.bf16.mxu0 %v7446_v23  ;;  %2248 = vmatprep.subr.bf16.mxu1 %v7447_v24  ;;  %v7468_v23 = vld [vmem:[#allocation70_spill] sm:$0xff]  ;;  %v7469_v24 = vld [vmem:[#allocation71_spill] sm:$0xff] }
 0x8b7   :  { %v2048_v1 = vpop.f32.mrb[60].mxu0  ;;  %v2089_v31 = vpop.f32.mrb[60].mxu1 }
 0x8b8   :  { %v2049_v36 = vadd.f32 %v2048_v1, %v5920_v40  ;;  %v2090_v45 = vadd.f32 %v2089_v31, %v5922_v38  ;;  %v2050_v34 = vpop.f32.mrb[61].mxu0  ;;  %v2091_v11 = vpop.f32.mrb[61].mxu1  ;;  %v7471_v1 = vld [vmem:[#allocation73_spill] sm:$0xff]  ;;  %v7472_v31 = vld [vmem:[#allocation74_spill] sm:$0xff] }
 0x8b9   :  { %v2051_v54 = vadd.f32 %v2050_v34, %v5924_v41  ;;  %v2092_v56 = vadd.f32 %v2091_v11, %v5926_v25  ;;  %v2052_v5 = vpop.f32.mrb[62].mxu0  ;;  %v2093_v59 = vpop.f32.mrb[62].mxu1  ;;  %v7475_v34 = vld [vmem:[#allocation81_spill] sm:$0xff]  ;;  %v7476_v11 = vld [vmem:[#allocation80_spill] sm:$0xff] }
 0x8ba   :  { %v2096_v29 = vadd.f32 %v2049_v36, %v5362_v9  ;;  %v2053_v22 = vpop.f32.mrb[63].mxu0  ;;  %v2094_v28 = vpop.f32.mrb[63].mxu1  ;;  %v2098_v38 = vadd.f32 %v2090_v45, %v5375_v30  ;;  %v7473_v36 = vld [vmem:[#allocation75_spill] sm:$0xff]  ;;  %v7479_v5 = vld [vmem:[#allocation16_spill] sm:$0xff]  ;;  %v7480_v59 = vld [vmem:[#allocation17_spill] sm:$0xff] }
 0x8bb   :  { %v2097_v19 = vadd.f32 %v2051_v54, %v5365_v12  ;;  %v2099_v40 = vadd.f32 %v2092_v56, %v5379_v32  ;;  %v7474_v45 = vld [vmem:[#allocation79_spill] sm:$0xff]  ;;  %v7477_v54 = vld [vmem:[#allocation82_spill] sm:$0xff]  ;;  %v7478_v56 = vld [vmem:[#allocation76_spill] sm:$0xff] }
 0x8bc   :  { %v4009_v48 = vmul.f32 -1.442695, %v2096_v29  ;;  %v4011_v14 = vmul.f32 -1.442695, %v2098_v38  ;;  %v7481_v29 = vld [vmem:[#allocation83_spill] sm:$0xff]  ;;  %v7482_v22 = vld [vmem:[#allocation85_spill] sm:$0xff] }
 0x8bd   :  { %v4010_v35 = vmul.f32 -1.442695, %v2097_v19  ;;  %v7483_v28 = vld [vmem:[#allocation84_spill] sm:$0xff]  ;;  %v7484_v19 = vld [vmem:[#allocation87_spill] sm:$0xff] }
 0x8be   :  { %4403 = vpow2.f32 %v4009_v48  ;;  %v7485_v48 = vld [vmem:[#allocation18_spill] sm:$0xff]  ;;  %v7487_v38 = vld [vmem:[#allocation20_spill] sm:$0xff] }
 0x8bf   :  { %4405 = vpow2.f32 %v4010_v35  ;;  %v7486_v35 = vld [vmem:[#allocation19_spill] sm:$0xff] }
 0x8c0   :  { %4407 = vtanh.f32 %v2099_v40  ;;  %v7488_v40 = vld [vmem:[#allocation21_spill] sm:$0xff] }
 0x8c1   :  { %4409 = vpow2.f32 %v4011_v14  ;;  %v7489_v14 = vld [vmem:[#allocation22_spill] sm:$0xff] }
 0x8c8   :  { %v4404_v41 = vpop.eup %4403 }
 0x8c9   :  { %v2109_v20 = vadd.f32 1.0, %v4404_v41  ;;  %v4406_v25 = vpop.eup %4405  ;;  %v7490_v41 = vld [vmem:[#allocation23_spill] sm:$0xff] }
 0x8ca   :  { %v2110_v60 = vadd.f32 1.0, %v4406_v25  ;;  %v4408_v21 = vpop.eup %4407  ;;  %v6054_v25 = vld [vmem:[#allocation5 + $0x224] ss:$16 sps:$4 sm:$0xff]  }
 0x8cb   :  { %4411 = vrcp.f32 %v2109_v20  ;;  %v4410_v39 = vpop.eup %4409  ;;  %v7491_v20 = vld [vmem:[#allocation24_spill] sm:$0xff]  ;;  %7492 = vst [vmem:[#allocation25_spill] sm:$0xff] %v6054_v25 }
 0x8cc   :  { %4413 = vrcp.f32 %v2110_v60  ;;  %v2111_v62 = vadd.f32 1.0, %v4410_v39  ;;  %v6057_v60 = vld [vmem:[#allocation5 + $0x22c] ss:$16 sps:$4 sm:$0xff]  }
 0x8cd   :  { %7493 = vst [vmem:[#allocation26_spill] sm:$0xff] %v6057_v60 }
 0x8ce   :  { %4415 = vrcp.f32 %v2111_v62 }
 0x8d5   :  { %v4412_v17 = vpop.eup %4411 }
 0x8d6   :  { %v2120_v53 = vmul.f32 %v4412_v17, %v4408_v21  ;;  %v4414_v3 = vpop.eup %4413 }
 0x8d7   :  { %v2119_v52 = vmul.f32 %v4414_v3, %v5781_v58  ;;  %v7462_v58 = vld [vmem:[#allocation64_spill] sm:$0xff] }
 0x8d8   :  { %v4416_v57 = vpop.eup %4415 }
 0x8d9   :  { %v5983_v50 = vadd.f32 %v2120_v53, %v2119_v52 }
 0x8db   :  { %4417 = vtanh.f32 %v5983_v50 }
 0x8e5   :  { %v4418_v6 = vpop.eup %4417 }
 0x8e6   :  { %v2123_v7 = vmul.f32 %v4418_v6, %v4416_v57 }
 0x8e8   :  { %v2124_v61 = vpack.c.bf16 %v2123_v7, %v2123_v7 }
 0x8ea   :  { %2158 = vmatmul.mubr.bf16.vlgmr.msra.gmra.mrb[64].mxu0 %v2124_v61  ;;  %2199 = vmatmul.mubr.bf16.vlgmr.msra.gmra.mrb[64].mxu1 %v2124_v61  ;;  %v7494_v61 = vld [vmem:[#allocation91_spill] sm:$0xff] }
 0x8eb   :  { %2208 = vmatpush1.bf16.msra.mxu0 %v5590_v18  ;;  %2249 = vmatpush1.bf16.msra.mxu1 %v5593_v43  ;;  %v7448_v18 = vld [vmem:[#allocation50_spill] sm:$0xff]  ;;  %v7449_v43 = vld [vmem:[#allocation51_spill] sm:$0xff] }
 0x8ec   :  { %2209 = vmatprep.subr.bf16.mxu0 %v5596_v51  ;;  %2250 = vmatprep.subr.bf16.mxu1 %v5599_v63  ;;  %v7450_v51 = vld [vmem:[#allocation52_spill] sm:$0xff]  ;;  %v7451_v63 = vld [vmem:[#allocation53_spill] sm:$0xff] }
 0x8ed   :  { %2239 = vmatprep.mubr.bf16.mxu0 %v7174_v2  ;;  %2280 = vmatprep.mubr.bf16.mxu1 %v7174_v2 }
 0x8ef   :  { %2210 = vmatpush1.bf16.msra.mxu0 %v5604_v0  ;;  %2251 = vmatpush1.bf16.msra.mxu1 %v5607_v49  ;;  %v7452_v0 = vld [vmem:[#allocation54_spill] sm:$0xff]  ;;  %v7453_v49 = vld [vmem:[#allocation55_spill] sm:$0xff] }
 0x8f0   :  { %2211 = vmatprep.subr.bf16.mxu0 %v5610_v13  ;;  %2252 = vmatprep.subr.bf16.mxu1 %v5613_v55  ;;  %v7454_v13 = vld [vmem:[#allocation56_spill] sm:$0xff]  ;;  %v7455_v55 = vld [vmem:[#allocation57_spill] sm:$0xff] }
 0x8f3   :  { %2212 = vmatpush1.bf16.msra.mxu0 %v5616_v47  ;;  %2253 = vmatpush1.bf16.msra.mxu1 %v5619_v44  ;;  %v7456_v47 = vld [vmem:[#allocation58_spill] sm:$0xff]  ;;  %v7457_v44 = vld [vmem:[#allocation59_spill] sm:$0xff] }
 0x8f4   :  { %2213 = vmatprep.subr.bf16.mxu0 %v5622_v46  ;;  %2254 = vmatprep.subr.bf16.mxu1 %v5625_v8  ;;  %v7458_v46 = vld [vmem:[#allocation60_spill] sm:$0xff]  ;;  %v7459_v8 = vld [vmem:[#allocation61_spill] sm:$0xff] }
 0x8f7   :  { %2214 = vmatpush1.bf16.msra.mxu0 %v5628_v10  ;;  %2255 = vmatpush1.bf16.msra.mxu1 %v5631_v4  ;;  %v7460_v10 = vld [vmem:[#allocation62_spill] sm:$0xff]  ;;  %v7461_v4 = vld [vmem:[#allocation63_spill] sm:$0xff] }
 0x8f8   :  { %2215 = vmatprep.subr.bf16.mxu0 %v7384_v16  ;;  %2256 = vmatprep.subr.bf16.mxu1 %v7385_v42  ;;  %v7463_v16 = vld [vmem:[#allocation65_spill] sm:$0xff]  ;;  %v7464_v42 = vld [vmem:[#allocation66_spill] sm:$0xff] }
 0x8fb   :  { %2216 = vmatpush1.bf16.msra.mxu0 %v7386_v26  ;;  %2257 = vmatpush1.bf16.msra.mxu1 %v7387_v27  ;;  %v7465_v26 = vld [vmem:[#allocation67_spill] sm:$0xff]  ;;  %v7466_v27 = vld [vmem:[#allocation68_spill] sm:$0xff] }
 0x8fc   :  { %2217 = vmatprep.subr.bf16.mxu0 %v7448_v18  ;;  %2258 = vmatprep.subr.bf16.mxu1 %v7449_v43  ;;  %v7495_v43 = vld [vmem:[#allocation93_spill] sm:$0xff] }
 0x8ff   :  { %2218 = vmatpush1.bf16.msra.mxu0 %v7450_v51  ;;  %2259 = vmatpush1.bf16.msra.mxu1 %v7451_v63 }
 0x900   :  { %2219 = vmatprep.subr.bf16.mxu0 %v7452_v0  ;;  %2260 = vmatprep.subr.bf16.mxu1 %v7453_v49  ;;  %v7496_v49 = vld [vmem:[#allocation92_spill] sm:$0xff] }
 0x903   :  { %2220 = vmatpush1.bf16.msra.mxu0 %v7454_v13  ;;  %2261 = vmatpush1.bf16.msra.mxu1 %v7455_v55  ;;  %v7497_v55 = vld [vmem:[#allocation95_spill] sm:$0xff] }
 0x904   :  { %2221 = vmatprep.subr.bf16.mxu0 %v7456_v47  ;;  %2262 = vmatprep.subr.bf16.mxu1 %v7457_v44 }
 0x907   :  { %2222 = vmatpush1.bf16.msra.mxu0 %v7458_v46  ;;  %2263 = vmatpush1.bf16.msra.mxu1 %v7459_v8 }
 0x908   :  { %2318 = vmatprep.subr.bf16.mxu0 %v7460_v10  ;;  %2359 = vmatprep.subr.bf16.mxu1 %v7461_v4 }
 0x90a   :  { %2240 = vmatmul.mubr.bf16.vlgmr.msra.gmra.mrb[68].mxu0 %v5936_v37  ;;  %2281 = vmatmul.mubr.bf16.vlgmr.msra.gmra.mrb[68].mxu1 %v5936_v37  ;;  %v7470_v37 = vld [vmem:[#allocation72_spill] sm:$0xff] }
 0x90b   :  { %2319 = vmatpush1.bf16.msra.mxu0 %v7462_v58  ;;  %2360 = vmatpush1.bf16.msra.mxu1 %v7463_v16 }
 0x90c   :  { %2320 = vmatprep.subr.bf16.mxu0 %v7464_v42  ;;  %2361 = vmatprep.subr.bf16.mxu1 %v7465_v26 }
 0x90d   :  { %2350 = vmatprep.mubr.bf16.mxu0 %v7174_v2  ;;  %2391 = vmatprep.mubr.bf16.mxu1 %v7174_v2 }
 0x90f   :  { %2321 = vmatpush1.bf16.msra.mxu0 %v7466_v27  ;;  %2362 = vmatpush1.bf16.msra.mxu1 %v7467_v33 }
 0x910   :  { %2322 = vmatprep.subr.bf16.mxu0 %v7468_v23  ;;  %2363 = vmatprep.subr.bf16.mxu1 %v7469_v24 }
 0x913   :  { %2323 = vmatpush1.bf16.msra.mxu0 %v7470_v37  ;;  %2364 = vmatpush1.bf16.msra.mxu1 %v7471_v1 }
 0x914   :  { %2324 = vmatprep.subr.bf16.mxu0 %v7472_v31  ;;  %2365 = vmatprep.subr.bf16.mxu1 %v7473_v36 }
 0x917   :  { %2325 = vmatpush1.bf16.msra.mxu0 %v7474_v45  ;;  %2366 = vmatpush1.bf16.msra.mxu1 %v7475_v34 }
 0x918   :  { %2326 = vmatprep.subr.bf16.mxu0 %v7476_v11  ;;  %2367 = vmatprep.subr.bf16.mxu1 %v7477_v54 }
 0x91b   :  { %2327 = vmatpush1.bf16.msra.mxu0 %v7478_v56  ;;  %2368 = vmatpush1.bf16.msra.mxu1 %v7479_v5 }
 0x91c   :  { %2328 = vmatprep.subr.bf16.mxu0 %v7480_v59  ;;  %2369 = vmatprep.subr.bf16.mxu1 %v7481_v29 }
 0x91f   :  { %2329 = vmatpush1.bf16.msra.mxu0 %v7482_v22  ;;  %2370 = vmatpush1.bf16.msra.mxu1 %v7483_v28 }
 0x920   :  { %2330 = vmatprep.subr.bf16.mxu0 %v7484_v19  ;;  %2371 = vmatprep.subr.bf16.mxu1 %v7485_v48 }
 0x923   :  { %2331 = vmatpush1.bf16.msra.mxu0 %v7486_v35  ;;  %2372 = vmatpush1.bf16.msra.mxu1 %v7487_v38 }
 0x924   :  { %2332 = vmatprep.subr.bf16.mxu0 %v7488_v40  ;;  %2373 = vmatprep.subr.bf16.mxu1 %v7489_v14 }
 0x927   :  { %2333 = vmatpush1.bf16.msra.mxu0 %v7490_v41  ;;  %2374 = vmatpush1.bf16.msra.mxu1 %v7491_v20 }
 0x928   :  { %2429 = vmatprep.subr.bf16.mxu0 %v6054_v25  ;;  %2470 = vmatprep.subr.bf16.mxu1 %v6057_v60 }
 0x9bd   :  { %v6060_v21 = vpop.f32.mrb[64].mxu0  ;;  %v6062_v39 = vpop.f32.mrb[64].mxu1 }
 0x9be   :  { %v6064_v17 = vpop.f32.mrb[65].mxu0  ;;  %v6066_v53 = vpop.f32.mrb[65].mxu1 }
 0x9bf   :  { %v2163_v3 = vpop.f32.mrb[66].mxu0  ;;  %v2204_v62 = vpop.f32.mrb[66].mxu1 }
 0x9c0   :  { %v2164_v52 = vpop.f32.mrb[67].mxu0  ;;  %v2205_v57 = vpop.f32.mrb[67].mxu1 }
 0x9dd   :  { %v2241_v6 = vpop.f32.mrb[68].mxu0  ;;  %v2282_v7 = vpop.f32.mrb[68].mxu1 }
 0x9de   :  { %v2289_v18 = vadd.f32 %v2241_v6, %v7494_v61  ;;  %v2291_v51 = vadd.f32 %v2282_v7, %v7495_v43  ;;  %v2243_v63 = vpop.f32.mrb[69].mxu0  ;;  %v2284_v0 = vpop.f32.mrb[69].mxu1 }
 0x9df   :  { %v2290_v13 = vadd.f32 %v2243_v63, %v7496_v49  ;;  %v2292_v47 = vadd.f32 %v2284_v0, %v7497_v55  ;;  %v2245_v44 = vpop.f32.mrb[70].mxu0  ;;  %v2286_v46 = vpop.f32.mrb[70].mxu1 }
 0x9e0   :  { %v4012_v60 = vmul.f32 -1.442695, %v2289_v18  ;;  %v2246_v25 = vpop.f32.mrb[71].mxu0  ;;  %v2287_v3 = vpop.f32.mrb[71].mxu1  ;;  %v4014_v52 = vmul.f32 -1.442695, %v2291_v51 }
 0x9e1   :  { %v4013_v62 = vmul.f32 -1.442695, %v2290_v13  ;;  %v6083_v44 = vld [vmem:[#allocation5 + $0x228] ss:$16 sps:$4 sm:$0xff]   ;;  %v6089_v46 = vld [vmem:[#allocation5 + $0x24c] ss:$16 sps:$4 sm:$0xff]  }
 0x9e2   :  { %4419 = vpow2.f32 %v4012_v60  ;;  %v6094_v3 = vld [vmem:[#allocation5 + $0x240] ss:$16 sps:$4 sm:$0xff]  }
 0x9e3   :  { %4421 = vpow2.f32 %v4013_v62  ;;  %7498 = vst [vmem:[#allocation27_spill] sm:$0xff] %v6094_v3  ;;  %v6097_v62 = vld [vmem:[#allocation5 + $0x248] ss:$16 sps:$4 sm:$0xff]  }
 0x9e4   :  { %4423 = vtanh.f32 %v2292_v47  ;;  %7499 = vst [vmem:[#allocation46_spill] sm:$0xff] %v6097_v62 }
 0x9e5   :  { %4425 = vpow2.f32 %v4014_v52  ;;  %v6100_v52 = vld [vmem:[#allocation5 + $0x264] ss:$16 sps:$4 sm:$0xff]  }
 0x9e6   :  { %7500 = vst [vmem:[#allocation47_spill] sm:$0xff] %v6100_v52 }
 0x9ec   :  { %v4420_v57 = vpop.eup %4419 }
 0x9ed   :  { %v2302_v20 = vadd.f32 1.0, %v4420_v57  ;;  %v4422_v6 = vpop.eup %4421  ;;  %v6103_v57 = vld [vmem:[#allocation5 + $0x26c] ss:$16 sps:$4 sm:$0xff]  }
 0x9ee   :  { %v2303_v7 = vadd.f32 1.0, %v4422_v6  ;;  %v4424_v61 = vpop.eup %4423  ;;  %7501 = vst [vmem:[#allocation48_spill] sm:$0xff] %v6103_v57  ;;  %v6106_v6 = vld [vmem:[#allocation5 + $0x260] ss:$16 sps:$4 sm:$0xff]  }
 0x9ef   :  { %4427 = vrcp.f32 %v2302_v20  ;;  %v4426_v43 = vpop.eup %4425  ;;  %v6080_v20 = vld [vmem:[#allocation5 + $0x220] ss:$16 sps:$4 sm:$0xff]   ;;  %7502 = vst [vmem:[#allocation49_spill] sm:$0xff] %v6106_v6 }
 0x9f0   :  { %4429 = vrcp.f32 %v2303_v7  ;;  %v2304_v18 = vadd.f32 1.0, %v4426_v43  ;;  %v6109_v7 = vld [vmem:[#allocation5 + $0x268] ss:$16 sps:$4 sm:$0xff]   ;;  %v6115_v43 = vld [vmem:[#allocation5 + $0x28c] ss:$16 sps:$4 sm:$0xff]  }
 0x9f1   :  { %7503 = vst [vmem:[#allocation86_spill] sm:$0xff] %v6109_v7  ;;  %7505 = vst [vmem:[#allocation88_spill] sm:$0xff] %v6115_v43 }
 0x9f2   :  { %4431 = vrcp.f32 %v2304_v18  ;;  %v6127_v18 = vld [vmem:[#allocation5 + $0x2ac] ss:$16 sps:$4 sm:$0xff]  }
 0x9f3   :  { %7509 = vst [vmem:[#allocation30_spill] sm:$0xff] %v6127_v18 }
 0x9f9   :  { %v4428_v63 = vpop.eup %4427 }
 0x9fa   :  { %v2313_v0 = vmul.f32 %v4428_v63, %v4424_v61  ;;  %v4430_v49 = vpop.eup %4429  ;;  %v6112_v61 = vld [vmem:[#allocation5 + $0x284] ss:$16 sps:$4 sm:$0xff]   ;;  %v6118_v63 = vld [vmem:[#allocation5 + $0x280] ss:$16 sps:$4 sm:$0xff]  }
 0x9fb   :  { %v2312_v25 = vmul.f32 %v4430_v49, %v5933_v15  ;;  %v6086_v15 = vld [vmem:[#allocation5 + $0x244] ss:$16 sps:$4 sm:$0xff]   ;;  %7504 = vst [vmem:[#allocation89_spill] sm:$0xff] %v6112_v61  ;;  %7506 = vst [vmem:[#allocation90_spill] sm:$0xff] %v6118_v63 }
 0x9fc   :  { %v4432_v60 = vpop.eup %4431  ;;  %v6124_v49 = vld [vmem:[#allocation5 + $0x2a4] ss:$16 sps:$4 sm:$0xff]  }
 0x9fd   :  { %v6073_v13 = vadd.f32 %v2313_v0, %v2312_v25  ;;  %v6121_v0 = vld [vmem:[#allocation5 + $0x288] ss:$16 sps:$4 sm:$0xff]   ;;  %7508 = vst [vmem:[#allocation29_spill] sm:$0xff] %v6124_v49  ;;  %v6130_v25 = vld [vmem:[#allocation5 + $0x2a0] ss:$16 sps:$4 sm:$0xff]  }
 0x9fe   :  { %7507 = vst [vmem:[#allocation28_spill] sm:$0xff] %v6121_v0  ;;  %7510 = vst [vmem:[#allocation31_spill] sm:$0xff] %v6130_v25 }
 0x9ff   :  { %4433 = vtanh.f32 %v6073_v13 }
 0xa09   :  { %v4434_v51 = vpop.eup %4433 }
 0xa0a   :  { %v2316_v55 = vmul.f32 %v4434_v51, %v4432_v60  ;;  %v6133_v60 = vld [vmem:[#allocation5 + $0x2a8] ss:$16 sps:$4 sm:$0xff]   ;;  %v6136_v51 = vld [vmem:[#allocation5 + $0x2c4] ss:$16 sps:$4 sm:$0xff]  }
 0xa0b   :  { %7511 = vst [vmem:[#allocation32_spill] sm:$0xff] %v6133_v60  ;;  %7512 = vst [vmem:[#allocation33_spill] sm:$0xff] %v6136_v51 }
 0xa0c   :  { %v6076_v47 = vpack.c.bf16 %v2316_v55, %v2316_v55  ;;  %v6139_v55 = vld [vmem:[#allocation5 + $0x2cc] ss:$16 sps:$4 sm:$0xff]  }
 0xa0d   :  { %7513 = vst [vmem:[#allocation34_spill] sm:$0xff] %v6139_v55 }
 0xa0e   :  { %2351 = vmatmul.mubr.bf16.vlgmr.msra.gmra.mrb[72].mxu0 %v6076_v47  ;;  %2392 = vmatmul.mubr.bf16.vlgmr.msra.gmra.mrb[72].mxu1 %v6076_v47 }
 0xa0f   :  { %2430 = vmatpush1.bf16.msra.mxu0 %v6080_v20  ;;  %2471 = vmatpush1.bf16.msra.mxu1 %v6083_v44 }
 0xa10   :  { %2431 = vmatprep.subr.bf16.mxu0 %v6086_v15  ;;  %2472 = vmatprep.subr.bf16.mxu1 %v6089_v46 }
 0xa11   :  { %2461 = vmatprep.mubr.bf16.mxu0 %v7174_v2  ;;  %2502 = vmatprep.mubr.bf16.mxu1 %v7174_v2 }
 0xa13   :  { %2432 = vmatpush1.bf16.msra.mxu0 %v6094_v3  ;;  %2473 = vmatpush1.bf16.msra.mxu1 %v6097_v62 }
 0xa14   :  { %2433 = vmatprep.subr.bf16.mxu0 %v6100_v52  ;;  %2474 = vmatprep.subr.bf16.mxu1 %v6103_v57 }
 0xa17   :  { %2434 = vmatpush1.bf16.msra.mxu0 %v6106_v6  ;;  %2475 = vmatpush1.bf16.msra.mxu1 %v6109_v7 }
 0xa18   :  { %2435 = vmatprep.subr.bf16.mxu0 %v6112_v61  ;;  %2476 = vmatprep.subr.bf16.mxu1 %v6115_v43 }
 0xa1b   :  { %2436 = vmatpush1.bf16.msra.mxu0 %v6118_v63  ;;  %2477 = vmatpush1.bf16.msra.mxu1 %v6121_v0 }
 0xa1c   :  { %2437 = vmatprep.subr.bf16.mxu0 %v6124_v49  ;;  %2478 = vmatprep.subr.bf16.mxu1 %v6127_v18  ;;  %v6142_v49 = vld [vmem:[#allocation5 + $0x2c0] ss:$16 sps:$4 sm:$0xff]   ;;  %v6145_v18 = vld [vmem:[#allocation5 + $0x2c8] ss:$16 sps:$4 sm:$0xff]  }
 0xa1d   :  { %7514 = vst [vmem:[#allocation35_spill] sm:$0xff] %v6142_v49  ;;  %7515 = vst [vmem:[#allocation36_spill] sm:$0xff] %v6145_v18 }
 0xa1f   :  { %2438 = vmatpush1.bf16.msra.mxu0 %v6130_v25  ;;  %2479 = vmatpush1.bf16.msra.mxu1 %v6133_v60  ;;  %v6148_v25 = vld [vmem:[#allocation5 + $0x2e4] ss:$16 sps:$4 sm:$0xff]   ;;  %v6151_v60 = vld [vmem:[#allocation5 + $0x2ec] ss:$16 sps:$4 sm:$0xff]  }
 0xa20   :  { %2439 = vmatprep.subr.bf16.mxu0 %v6136_v51  ;;  %2480 = vmatprep.subr.bf16.mxu1 %v6139_v55  ;;  %7516 = vst [vmem:[#allocation37_spill] sm:$0xff] %v6148_v25  ;;  %7517 = vst [vmem:[#allocation38_spill] sm:$0xff] %v6151_v60  ;;  %v6154_v51 = vld [vmem:[#allocation5 + $0x2e0] ss:$16 sps:$4 sm:$0xff]   ;;  %v6157_v55 = vld [vmem:[#allocation5 + $0x2e8] ss:$16 sps:$4 sm:$0xff]  }
 0xa21   :  { %7518 = vst [vmem:[#allocation39_spill] sm:$0xff] %v6154_v51  ;;  %7519 = vst [vmem:[#allocation40_spill] sm:$0xff] %v6157_v55 }
 0xa23   :  { %2440 = vmatpush1.bf16.msra.mxu0 %v6142_v49  ;;  %2481 = vmatpush1.bf16.msra.mxu1 %v6145_v18  ;;  %v6160_v49 = vld [vmem:[#allocation5 + $0x304] ss:$16 sps:$4 sm:$0xff]   ;;  %v6163_v18 = vld [vmem:[#allocation5 + $0x30c] ss:$16 sps:$4 sm:$0xff]  }
 0xa24   :  { %2441 = vmatprep.subr.bf16.mxu0 %v6148_v25  ;;  %2482 = vmatprep.subr.bf16.mxu1 %v6151_v60  ;;  %7520 = vst [vmem:[#allocation41_spill] sm:$0xff] %v6160_v49  ;;  %7521 = vst [vmem:[#allocation42_spill] sm:$0xff] %v6163_v18  ;;  %v6166_v25 = vld [vmem:[#allocation5 + $0x300] ss:$16 sps:$4 sm:$0xff]   ;;  %v6169_v60 = vld [vmem:[#allocation5 + $0x308] ss:$16 sps:$4 sm:$0xff]  }
 0xa25   :  { %7522 = vst [vmem:[#allocation43_spill] sm:$0xff] %v6166_v25  ;;  %7523 = vst [vmem:[#allocation44_spill] sm:$0xff] %v6169_v60 }
 0xa27   :  { %2442 = vmatpush1.bf16.msra.mxu0 %v6154_v51  ;;  %2483 = vmatpush1.bf16.msra.mxu1 %v6157_v55  ;;  %v6172_v51 = vld [vmem:[#allocation5 + $0x24] ss:$16 sps:$4 sm:$0xff]   ;;  %v6175_v55 = vld [vmem:[#allocation5 + $0x2c] ss:$16 sps:$4 sm:$0xff]  }
 0xa28   :  { %2443 = vmatprep.subr.bf16.mxu0 %v6160_v49  ;;  %2484 = vmatprep.subr.bf16.mxu1 %v6163_v18  ;;  %7524 = vst [vmem:[#allocation45_spill] sm:$0xff] %v6172_v51  ;;  %7525 = vst [vmem:[#allocation50_spill] sm:$0xff] %v6175_v55 }
 0xa2b   :  { %2444 = vmatpush1.bf16.msra.mxu0 %v6166_v25  ;;  %2485 = vmatpush1.bf16.msra.mxu1 %v6169_v60 }
 0xa2c   :  { %2511 = vmatprep.subr.bf16.mxu0 %v6172_v51  ;;  %2552 = vmatprep.subr.bf16.mxu1 %v6175_v55 }
 0xae1   :  { %v2352_v49 = vpop.f32.mrb[72].mxu0  ;;  %v2393_v0 = vpop.f32.mrb[72].mxu1 }
 0xae2   :  { %v2353_v18 = vadd.f32 %v2352_v49, %v6060_v21  ;;  %v2394_v63 = vadd.f32 %v2393_v0, %v6062_v39  ;;  %v2354_v43 = vpop.f32.mrb[73].mxu0  ;;  %v2395_v25 = vpop.f32.mrb[73].mxu1 }
 0xae3   :  { %v2355_v61 = vadd.f32 %v2354_v43, %v6064_v17  ;;  %v2396_v60 = vadd.f32 %v2395_v25, %v6066_v53  ;;  %v2356_v7 = vpop.f32.mrb[74].mxu0  ;;  %v2397_v6 = vpop.f32.mrb[74].mxu1 }
 0xae4   :  { %v2400_v51 = vadd.f32 %v2353_v18, %v5362_v9  ;;  %v2357_v57 = vpop.f32.mrb[75].mxu0  ;;  %v2398_v52 = vpop.f32.mrb[75].mxu1  ;;  %v2402_v21 = vadd.f32 %v2394_v63, %v5375_v30 }
 0xae5   :  { %v2401_v55 = vadd.f32 %v2355_v61, %v5365_v12  ;;  %v2403_v39 = vadd.f32 %v2396_v60, %v5379_v32 }
 0xae6   :  { %v4015_v62 = vmul.f32 -1.442695, %v2400_v51  ;;  %v4017_v0 = vmul.f32 -1.442695, %v2402_v21  ;;  %v6193_v21 = vld [vmem:[#allocation5 + $0x28] ss:$16 sps:$4 sm:$0xff]  }
 0xae7   :  { %v4016_v3 = vmul.f32 -1.442695, %v2401_v55  ;;  %v6190_v55 = vld [vmem:[#allocation5 + $0x20] ss:$16 sps:$4 sm:$0xff]  }
 0xae8   :  { %4435 = vpow2.f32 %v4015_v62 }
 0xae9   :  { %4437 = vpow2.f32 %v4016_v3 }
 0xaea   :  { %4439 = vtanh.f32 %v2403_v39  ;;  %v6199_v39 = vld [vmem:[#allocation5 + $0x4c] ss:$16 sps:$4 sm:$0xff]  }
 0xaeb   :  { %4441 = vpow2.f32 %v4017_v0  ;;  %v6204_v0 = vld [vmem:[#allocation5 + $0x40] ss:$16 sps:$4 sm:$0xff]  }
 0xaf2   :  { %v4436_v17 = vpop.eup %4435 }
 0xaf3   :  { %v2413_v43 = vadd.f32 1.0, %v4436_v17  ;;  %v4438_v53 = vpop.eup %4437  ;;  %v6207_v17 = vld [vmem:[#allocation5 + $0x48] ss:$16 sps:$4 sm:$0xff]  }
 0xaf4   :  { %v2414_v6 = vadd.f32 1.0, %v4438_v53  ;;  %v4440_v52 = vpop.eup %4439  ;;  %v6213_v53 = vld [vmem:[#allocation5 + $0x6c] ss:$16 sps:$4 sm:$0xff]  }
 0xaf5   :  { %4443 = vrcp.f32 %v2413_v43  ;;  %v4442_v57 = vpop.eup %4441  ;;  %v6210_v43 = vld [vmem:[#allocation5 + $0x64] ss:$16 sps:$4 sm:$0xff]  }
 0xaf6   :  { %4445 = vrcp.f32 %v2414_v6  ;;  %v2415_v62 = vadd.f32 1.0, %v4442_v57  ;;  %v6216_v6 = vld [vmem:[#allocation5 + $0x60] ss:$16 sps:$4 sm:$0xff]   ;;  %v6222_v57 = vld [vmem:[#allocation5 + $0x84] ss:$16 sps:$4 sm:$0xff]  }
 0xaf8   :  { %4447 = vrcp.f32 %v2415_v62  ;;  %v6234_v62 = vld [vmem:[#allocation5 + $0xa4] ss:$16 sps:$4 sm:$0xff]  }
 0xaf9   :  { %7526 = vst [vmem:[#allocation51_spill] sm:$0xff] %v6234_v62 }
 0xaff   :  { %v4444_v7 = vpop.eup %4443 }
 0xb00   :  { %v2424_v61 = vmul.f32 %v4444_v7, %v4440_v52  ;;  %v4446_v49 = vpop.eup %4445  ;;  %v6219_v52 = vld [vmem:[#allocation5 + $0x68] ss:$16 sps:$4 sm:$0xff]   ;;  %v6225_v7 = vld [vmem:[#allocation5 + $0x8c] ss:$16 sps:$4 sm:$0xff]  }
 0xb01   :  { %v2423_v3 = vmul.f32 %v4446_v49, %v5983_v50  ;;  %v6196_v50 = vld [vmem:[#allocation5 + $0x44] ss:$16 sps:$4 sm:$0xff]   ;;  %v6231_v49 = vld [vmem:[#allocation5 + $0x88] ss:$16 sps:$4 sm:$0xff]  }
 0xb02   :  { %v4448_v18 = vpop.eup %4447 }
 0xb03   :  { %v6187_v63 = vadd.f32 %v2424_v61, %v2423_v3  ;;  %v6228_v61 = vld [vmem:[#allocation5 + $0x80] ss:$16 sps:$4 sm:$0xff]   ;;  %v6237_v3 = vld [vmem:[#allocation5 + $0xac] ss:$16 sps:$4 sm:$0xff]  }
 0xb04   :  { %7527 = vst [vmem:[#allocation52_spill] sm:$0xff] %v6237_v3 }
 0xb05   :  { %4449 = vtanh.f32 %v6187_v63 }
 0xb0f   :  { %v4450_v25 = vpop.eup %4449 }
 0xb10   :  { %v2427_v60 = vmul.f32 %v4450_v25, %v4448_v18  ;;  %v6240_v18 = vld [vmem:[#allocation5 + $0xa0] ss:$16 sps:$4 sm:$0xff]   ;;  %v6243_v25 = vld [vmem:[#allocation5 + $0xa8] ss:$16 sps:$4 sm:$0xff]  }
 0xb11   :  { %7528 = vst [vmem:[#allocation53_spill] sm:$0xff] %v6240_v18  ;;  %7529 = vst [vmem:[#allocation54_spill] sm:$0xff] %v6243_v25 }
 0xb12   :  { %v2428_v51 = vpack.c.bf16 %v2427_v60, %v2427_v60  ;;  %v6246_v60 = vld [vmem:[#allocation5 + $0xc4] ss:$16 sps:$4 sm:$0xff]  }
 0xb13   :  { %7530 = vst [vmem:[#allocation55_spill] sm:$0xff] %v6246_v60 }
 0xb14   :  { %2462 = vmatmul.mubr.bf16.vlgmr.msra.gmra.mrb[76].mxu0 %v2428_v51  ;;  %2503 = vmatmul.mubr.bf16.vlgmr.msra.gmra.mrb[76].mxu1 %v2428_v51  ;;  %v6249_v51 = vld [vmem:[#allocation5 + $0xcc] ss:$16 sps:$4 sm:$0xff]  }
 0xb15   :  { %2512 = vmatpush1.bf16.msra.mxu0 %v6190_v55  ;;  %2553 = vmatpush1.bf16.msra.mxu1 %v6193_v21  ;;  %7531 = vst [vmem:[#allocation56_spill] sm:$0xff] %v6249_v51 }
 0xb16   :  { %2513 = vmatprep.subr.bf16.mxu0 %v6196_v50  ;;  %2554 = vmatprep.subr.bf16.mxu1 %v6199_v39 }
 0xb17   :  { %2543 = vmatprep.mubr.bf16.mxu0 %v7174_v2  ;;  %2584 = vmatprep.mubr.bf16.mxu1 %v7174_v2 }
 0xb19   :  { %2514 = vmatpush1.bf16.msra.mxu0 %v6204_v0  ;;  %2555 = vmatpush1.bf16.msra.mxu1 %v6207_v17 }
 0xb1a   :  { %2515 = vmatprep.subr.bf16.mxu0 %v6210_v43  ;;  %2556 = vmatprep.subr.bf16.mxu1 %v6213_v53 }
 0xb1d   :  { %2516 = vmatpush1.bf16.msra.mxu0 %v6216_v6  ;;  %2557 = vmatpush1.bf16.msra.mxu1 %v6219_v52 }
 0xb1e   :  { %2517 = vmatprep.subr.bf16.mxu0 %v6222_v57  ;;  %2558 = vmatprep.subr.bf16.mxu1 %v6225_v7 }
 0xb21   :  { %2518 = vmatpush1.bf16.msra.mxu0 %v6228_v61  ;;  %2559 = vmatpush1.bf16.msra.mxu1 %v6231_v49 }
 0xb22   :  { %2519 = vmatprep.subr.bf16.mxu0 %v6234_v62  ;;  %2560 = vmatprep.subr.bf16.mxu1 %v6237_v3  ;;  %v6252_v62 = vld [vmem:[#allocation5 + $0xc0] ss:$16 sps:$4 sm:$0xff]   ;;  %v6255_v3 = vld [vmem:[#allocation5 + $0xc8] ss:$16 sps:$4 sm:$0xff]  }
 0xb23   :  { %7532 = vst [vmem:[#allocation57_spill] sm:$0xff] %v6252_v62  ;;  %7533 = vst [vmem:[#allocation58_spill] sm:$0xff] %v6255_v3 }
 0xb25   :  { %2520 = vmatpush1.bf16.msra.mxu0 %v6240_v18  ;;  %2561 = vmatpush1.bf16.msra.mxu1 %v6243_v25  ;;  %v6258_v18 = vld [vmem:[#allocation5 + $0xe4] ss:$16 sps:$4 sm:$0xff]   ;;  %v6261_v25 = vld [vmem:[#allocation5 + $0xec] ss:$16 sps:$4 sm:$0xff]  }
 0xb26   :  { %2521 = vmatprep.subr.bf16.mxu0 %v6246_v60  ;;  %2562 = vmatprep.subr.bf16.mxu1 %v6249_v51  ;;  %7534 = vst [vmem:[#allocation59_spill] sm:$0xff] %v6258_v18  ;;  %7535 = vst [vmem:[#allocation60_spill] sm:$0xff] %v6261_v25  ;;  %v6264_v60 = vld [vmem:[#allocation5 + $0xe0] ss:$16 sps:$4 sm:$0xff]   ;;  %v6267_v51 = vld [vmem:[#allocation5 + $0xe8] ss:$16 sps:$4 sm:$0xff]  }
 0xb27   :  { %7536 = vst [vmem:[#allocation61_spill] sm:$0xff] %v6264_v60  ;;  %7537 = vst [vmem:[#allocation62_spill] sm:$0xff] %v6267_v51 }
 0xb29   :  { %2522 = vmatpush1.bf16.msra.mxu0 %v6252_v62  ;;  %2563 = vmatpush1.bf16.msra.mxu1 %v6255_v3  ;;  %v6270_v62 = vld [vmem:[#allocation5 + $0x104] ss:$16 sps:$4 sm:$0xff]   ;;  %v6273_v3 = vld [vmem:[#allocation5 + $0x10c] ss:$16 sps:$4 sm:$0xff]  }
 0xb2a   :  { %2523 = vmatprep.subr.bf16.mxu0 %v6258_v18  ;;  %2564 = vmatprep.subr.bf16.mxu1 %v6261_v25  ;;  %7538 = vst [vmem:[#allocation63_spill] sm:$0xff] %v6270_v62  ;;  %7539 = vst [vmem:[#allocation64_spill] sm:$0xff] %v6273_v3  ;;  %v6276_v18 = vld [vmem:[#allocation5 + $0x100] ss:$16 sps:$4 sm:$0xff]  }
 0xb2b   :  { %7540 = vst [vmem:[#allocation65_spill] sm:$0xff] %v6276_v18 }
 0xb2d   :  { %2524 = vmatpush1.bf16.msra.mxu0 %v6264_v60  ;;  %2565 = vmatpush1.bf16.msra.mxu1 %v6267_v51 }
 0xb2e   :  { %2525 = vmatprep.subr.bf16.mxu0 %v6270_v62  ;;  %2566 = vmatprep.subr.bf16.mxu1 %v6273_v3 }
 0xb31   :  { %2526 = vmatpush1.bf16.msra.mxu0 %v6276_v18  ;;  %2567 = vmatpush1.bf16.msra.mxu1 %v7459_v8  ;;  %v7541_v8 = vld [vmem:[#allocation24_spill] sm:$0xff] }
 0xb32   :  { %2622 = vmatprep.subr.bf16.mxu0 %v7460_v10  ;;  %2663 = vmatprep.subr.bf16.mxu1 %v7461_v4  ;;  %v7542_v10 = vld [vmem:[#allocation25_spill] sm:$0xff]  ;;  %v7543_v4 = vld [vmem:[#allocation26_spill] sm:$0xff] }
 0xb34   :  { %2544 = vmatmul.mubr.bf16.vlgmr.msra.gmra.mrb[80].mxu0 %v6076_v47  ;;  %2585 = vmatmul.mubr.bf16.vlgmr.msra.gmra.mrb[80].mxu1 %v6076_v47 }
 0xb35   :  { %2623 = vmatpush1.bf16.msra.mxu0 %v7462_v58  ;;  %2664 = vmatpush1.bf16.msra.mxu1 %v7463_v16 }
 0xb36   :  { %2624 = vmatprep.subr.bf16.mxu0 %v7464_v42  ;;  %2665 = vmatprep.subr.bf16.mxu1 %v7465_v26 }
 0xb37   :  { %2654 = vmatprep.mubr.bf16.mxu0 %v7174_v2  ;;  %2695 = vmatprep.mubr.bf16.mxu1 %v7174_v2 }
 0xb39   :  { %2625 = vmatpush1.bf16.msra.mxu0 %v7466_v27  ;;  %2666 = vmatpush1.bf16.msra.mxu1 %v7467_v33 }
 0xb3a   :  { %2626 = vmatprep.subr.bf16.mxu0 %v7468_v23  ;;  %2667 = vmatprep.subr.bf16.mxu1 %v7469_v24 }
 0xb3d   :  { %2627 = vmatpush1.bf16.msra.mxu0 %v7470_v37  ;;  %2668 = vmatpush1.bf16.msra.mxu1 %v7471_v1 }
 0xb3e   :  { %2628 = vmatprep.subr.bf16.mxu0 %v7472_v31  ;;  %2669 = vmatprep.subr.bf16.mxu1 %v7473_v36  ;;  %v7544_v31 = vld [vmem:[#allocation94_spill] sm:$0xff] }
 0xb41   :  { %2629 = vmatpush1.bf16.msra.mxu0 %v7474_v45  ;;  %2670 = vmatpush1.bf16.msra.mxu1 %v7475_v34  ;;  %v7545_v45 = vld [vmem:[#allocation97_spill] sm:$0xff] }
 0xb42   :  { %2630 = vmatprep.subr.bf16.mxu0 %v7476_v11  ;;  %2671 = vmatprep.subr.bf16.mxu1 %v7477_v54 }
 0xb45   :  { %2631 = vmatpush1.bf16.msra.mxu0 %v7478_v56  ;;  %2672 = vmatpush1.bf16.msra.mxu1 %v7479_v5  ;;  %v7546_v56 = vld [vmem:[#allocation96_spill] sm:$0xff] }
 0xb46   :  { %2632 = vmatprep.subr.bf16.mxu0 %v7480_v59  ;;  %2673 = vmatprep.subr.bf16.mxu1 %v7481_v29  ;;  %v7547_v59 = vld [vmem:[#allocation98_spill] sm:$0xff] }
 0xb49   :  { %2633 = vmatpush1.bf16.msra.mxu0 %v7482_v22  ;;  %2674 = vmatpush1.bf16.msra.mxu1 %v7483_v28 }
 0xb4a   :  { %2634 = vmatprep.subr.bf16.mxu0 %v7484_v19  ;;  %2675 = vmatprep.subr.bf16.mxu1 %v7485_v48 }
 0xb4d   :  { %2635 = vmatpush1.bf16.msra.mxu0 %v7486_v35  ;;  %2676 = vmatpush1.bf16.msra.mxu1 %v7487_v38 }
 0xb4e   :  { %2636 = vmatprep.subr.bf16.mxu0 %v7488_v40  ;;  %2677 = vmatprep.subr.bf16.mxu1 %v7489_v14 }
 0xb51   :  { %2637 = vmatpush1.bf16.msra.mxu0 %v7490_v41  ;;  %2678 = vmatpush1.bf16.msra.mxu1 %v7541_v8 }
 0xb52   :  { %2733 = vmatprep.subr.bf16.mxu0 %v7542_v10  ;;  %2774 = vmatprep.subr.bf16.mxu1 %v7543_v4 }
 0xbe7   :  { %v6318_v58 = vpop.f32.mrb[76].mxu0  ;;  %v6320_v16 = vpop.f32.mrb[76].mxu1 }
 0xbe8   :  { %v6322_v42 = vpop.f32.mrb[77].mxu0  ;;  %v6324_v26 = vpop.f32.mrb[77].mxu1 }
 0xbe9   :  { %v2467_v27 = vpop.f32.mrb[78].mxu0  ;;  %v2508_v33 = vpop.f32.mrb[78].mxu1 }
 0xbea   :  { %v2468_v23 = vpop.f32.mrb[79].mxu0  ;;  %v2509_v24 = vpop.f32.mrb[79].mxu1 }
 0xc07   :  { %v2545_v37 = vpop.f32.mrb[80].mxu0  ;;  %v2586_v1 = vpop.f32.mrb[80].mxu1 }
 0xc08   :  { %v2593_v36 = vadd.f32 %v2545_v37, %v7544_v31  ;;  %v2595_v34 = vadd.f32 %v2586_v1, %v7545_v45  ;;  %v2547_v11 = vpop.f32.mrb[81].mxu0  ;;  %v2588_v54 = vpop.f32.mrb[81].mxu1 }
 0xc09   :  { %v2594_v5 = vadd.f32 %v2547_v11, %v7546_v56  ;;  %v2596_v29 = vadd.f32 %v2588_v54, %v7547_v59  ;;  %v2549_v22 = vpop.f32.mrb[82].mxu0  ;;  %v2590_v28 = vpop.f32.mrb[82].mxu1  ;;  %v7549_v56 = vld [vmem:[#allocation46_spill] sm:$0xff]  ;;  %v7551_v59 = vld [vmem:[#allocation48_spill] sm:$0xff] }
 0xc0a   :  { %v4018_v19 = vmul.f32 -1.442695, %v2593_v36  ;;  %v2550_v48 = vpop.f32.mrb[83].mxu0  ;;  %v2591_v35 = vpop.f32.mrb[83].mxu1  ;;  %v4020_v40 = vmul.f32 -1.442695, %v2595_v34 }
 0xc0b   :  { %v4019_v38 = vmul.f32 -1.442695, %v2594_v5  ;;  %v7550_v5 = vld [vmem:[#allocation47_spill] sm:$0xff]  ;;  %v7553_v22 = vld [vmem:[#allocation86_spill] sm:$0xff]  ;;  %v7554_v28 = vld [vmem:[#allocation89_spill] sm:$0xff] }
 0xc0c   :  { %4451 = vpow2.f32 %v4018_v19  ;;  %v7555_v19 = vld [vmem:[#allocation88_spill] sm:$0xff]  ;;  %v7556_v48 = vld [vmem:[#allocation90_spill] sm:$0xff] }
 0xc0d   :  { %4453 = vpow2.f32 %v4019_v38  ;;  %v7557_v35 = vld [vmem:[#allocation28_spill] sm:$0xff]  ;;  %v7558_v38 = vld [vmem:[#allocation29_spill] sm:$0xff] }
 0xc0e   :  { %4455 = vtanh.f32 %v2596_v29  ;;  %v7552_v29 = vld [vmem:[#allocation49_spill] sm:$0xff] }
 0xc0f   :  { %4457 = vpow2.f32 %v4020_v40  ;;  %v7559_v40 = vld [vmem:[#allocation30_spill] sm:$0xff] }
 0xc16   :  { %v4452_v14 = vpop.eup %4451 }
 0xc17   :  { %v2606_v41 = vadd.f32 1.0, %v4452_v14  ;;  %v4454_v47 = vpop.eup %4453  ;;  %v7560_v14 = vld [vmem:[#allocation31_spill] sm:$0xff] }
 0xc18   :  { %v2607_v8 = vadd.f32 1.0, %v4454_v47  ;;  %v4456_v27 = vpop.eup %4455  ;;  %v7562_v47 = vld [vmem:[#allocation33_spill] sm:$0xff] }
 0xc19   :  { %4459 = vrcp.f32 %v2606_v41  ;;  %v4458_v33 = vpop.eup %4457  ;;  %v7561_v41 = vld [vmem:[#allocation32_spill] sm:$0xff] }
 0xc1a   :  { %4461 = vrcp.f32 %v2607_v8  ;;  %v2608_v1 = vadd.f32 1.0, %v4458_v33  ;;  %v7563_v8 = vld [vmem:[#allocation34_spill] sm:$0xff]  ;;  %v7565_v33 = vld [vmem:[#allocation36_spill] sm:$0xff] }
 0xc1c   :  { %4463 = vrcp.f32 %v2608_v1  ;;  %v7569_v1 = vld [vmem:[#allocation40_spill] sm:$0xff] }
 0xc23   :  { %v4460_v23 = vpop.eup %4459 }
 0xc24   :  { %v2617_v24 = vmul.f32 %v4460_v23, %v4456_v27  ;;  %v4462_v37 = vpop.eup %4461  ;;  %v7564_v27 = vld [vmem:[#allocation35_spill] sm:$0xff]  ;;  %v7566_v23 = vld [vmem:[#allocation37_spill] sm:$0xff] }
 0xc25   :  { %v2616_v31 = vmul.f32 %v4462_v37, %v6073_v13  ;;  %v7548_v13 = vld [vmem:[#allocation27_spill] sm:$0xff] }
 0xc26   :  { %v4464_v45 = vpop.eup %4463  ;;  %v7568_v37 = vld [vmem:[#allocation39_spill] sm:$0xff] }
 0xc27   :  { %v6331_v36 = vadd.f32 %v2617_v24, %v2616_v31  ;;  %v7567_v24 = vld [vmem:[#allocation38_spill] sm:$0xff]  ;;  %v7570_v31 = vld [vmem:[#allocation41_spill] sm:$0xff] }
 0xc29   :  { %4465 = vtanh.f32 %v6331_v36 }
 0xc33   :  { %v4466_v34 = vpop.eup %4465 }
 0xc34   :  { %v2620_v11 = vmul.f32 %v4466_v34, %v4464_v45  ;;  %v7571_v45 = vld [vmem:[#allocation42_spill] sm:$0xff]  ;;  %v7572_v34 = vld [vmem:[#allocation43_spill] sm:$0xff] }
 0xc36   :  { %v6334_v54 = vpack.c.bf16 %v2620_v11, %v2620_v11  ;;  %v7573_v11 = vld [vmem:[#allocation44_spill] sm:$0xff] }
 0xc38   :  { %2655 = vmatmul.mubr.bf16.vlgmr.msra.gmra.mrb[84].mxu0 %v6334_v54  ;;  %2696 = vmatmul.mubr.bf16.vlgmr.msra.gmra.mrb[84].mxu1 %v6334_v54 }
 0xc39   :  { %2734 = vmatpush1.bf16.msra.mxu0 %v6080_v20  ;;  %2775 = vmatpush1.bf16.msra.mxu1 %v6083_v44 }
 0xc3a   :  { %2735 = vmatprep.subr.bf16.mxu0 %v6086_v15  ;;  %2776 = vmatprep.subr.bf16.mxu1 %v6089_v46 }
 0xc3b   :  { %2765 = vmatprep.mubr.bf16.mxu0 %v7174_v2  ;;  %2806 = vmatprep.mubr.bf16.mxu1 %v7174_v2 }
 0xc3d   :  { %2736 = vmatpush1.bf16.msra.mxu0 %v7548_v13  ;;  %2777 = vmatpush1.bf16.msra.mxu1 %v7549_v56 }
 0xc3e   :  { %2737 = vmatprep.subr.bf16.mxu0 %v7550_v5  ;;  %2778 = vmatprep.subr.bf16.mxu1 %v7551_v59 }
 0xc41   :  { %2738 = vmatpush1.bf16.msra.mxu0 %v7552_v29  ;;  %2779 = vmatpush1.bf16.msra.mxu1 %v7553_v22 }
 0xc42   :  { %2739 = vmatprep.subr.bf16.mxu0 %v7554_v28  ;;  %2780 = vmatprep.subr.bf16.mxu1 %v7555_v19 }
 0xc45   :  { %2740 = vmatpush1.bf16.msra.mxu0 %v7556_v48  ;;  %2781 = vmatpush1.bf16.msra.mxu1 %v7557_v35 }
 0xc46   :  { %2741 = vmatprep.subr.bf16.mxu0 %v7558_v38  ;;  %2782 = vmatprep.subr.bf16.mxu1 %v7559_v40 }
 0xc49   :  { %2742 = vmatpush1.bf16.msra.mxu0 %v7560_v14  ;;  %2783 = vmatpush1.bf16.msra.mxu1 %v7561_v41 }
 0xc4a   :  { %2743 = vmatprep.subr.bf16.mxu0 %v7562_v47  ;;  %2784 = vmatprep.subr.bf16.mxu1 %v7563_v8  ;;  %v7574_v8 = vld [vmem:[#allocation45_spill] sm:$0xff] }
 0xc4d   :  { %2744 = vmatpush1.bf16.msra.mxu0 %v7564_v27  ;;  %2785 = vmatpush1.bf16.msra.mxu1 %v7565_v33  ;;  %v7575_v27 = vld [vmem:[#allocation50_spill] sm:$0xff] }
 0xc4e   :  { %2745 = vmatprep.subr.bf16.mxu0 %v7566_v23  ;;  %2786 = vmatprep.subr.bf16.mxu1 %v7567_v24 }
 0xc51   :  { %2746 = vmatpush1.bf16.msra.mxu0 %v7568_v37  ;;  %2787 = vmatpush1.bf16.msra.mxu1 %v7569_v1 }
 0xc52   :  { %2747 = vmatprep.subr.bf16.mxu0 %v7570_v31  ;;  %2788 = vmatprep.subr.bf16.mxu1 %v7571_v45 }
 0xc55   :  { %2748 = vmatpush1.bf16.msra.mxu0 %v7572_v34  ;;  %2789 = vmatpush1.bf16.msra.mxu1 %v7573_v11 }
 0xc56   :  { %2815 = vmatprep.subr.bf16.mxu0 %v7574_v8  ;;  %2856 = vmatprep.subr.bf16.mxu1 %v7575_v27 }
 0xd0b   :  { %v2656_v33 = vpop.f32.mrb[84].mxu0  ;;  %v2697_v23 = vpop.f32.mrb[84].mxu1 }
 0xd0c   :  { %v2657_v24 = vadd.f32 %v2656_v33, %v6318_v58  ;;  %v2698_v37 = vadd.f32 %v2697_v23, %v6320_v16  ;;  %v2658_v47 = vpop.f32.mrb[85].mxu0  ;;  %v2699_v1 = vpop.f32.mrb[85].mxu1 }
 0xd0d   :  { %v2659_v31 = vadd.f32 %v2658_v47, %v6322_v42  ;;  %v2700_v45 = vadd.f32 %v2699_v1, %v6324_v26  ;;  %v2660_v41 = vpop.f32.mrb[86].mxu0  ;;  %v2701_v34 = vpop.f32.mrb[86].mxu1 }
 0xd0e   :  { %v2704_v11 = vadd.f32 %v2657_v24, %v5362_v9  ;;  %v2661_v14 = vpop.f32.mrb[87].mxu0  ;;  %v2702_v8 = vpop.f32.mrb[87].mxu1  ;;  %v2706_v58 = vadd.f32 %v2698_v37, %v5375_v30 }
 0xd0f   :  { %v2705_v27 = vadd.f32 %v2659_v31, %v5365_v12  ;;  %v2707_v16 = vadd.f32 %v2700_v45, %v5379_v32 }
 0xd10   :  { %v4021_v40 = vmul.f32 -1.442695, %v2704_v11  ;;  %v4023_v33 = vmul.f32 -1.442695, %v2706_v58  ;;  %v7577_v11 = vld [vmem:[#allocation52_spill] sm:$0xff]  ;;  %v7578_v58 = vld [vmem:[#allocation53_spill] sm:$0xff] }
 0xd11   :  { %v4022_v38 = vmul.f32 -1.442695, %v2705_v27 }
 0xd12   :  { %4467 = vpow2.f32 %v4021_v40 }
 0xd13   :  { %4469 = vpow2.f32 %v4022_v38 }
 0xd14   :  { %4471 = vtanh.f32 %v2707_v16  ;;  %v7579_v16 = vld [vmem:[#allocation54_spill] sm:$0xff] }
 0xd15   :  { %4473 = vpow2.f32 %v4023_v33  ;;  %v7580_v33 = vld [vmem:[#allocation55_spill] sm:$0xff] }
 0xd1c   :  { %v4468_v42 = vpop.eup %4467 }
 0xd1d   :  { %v2717_v47 = vadd.f32 1.0, %v4468_v42  ;;  %v4470_v26 = vpop.eup %4469  ;;  %v7581_v42 = vld [vmem:[#allocation56_spill] sm:$0xff] }
 0xd1e   :  { %v2718_v41 = vadd.f32 1.0, %v4470_v26  ;;  %v4472_v14 = vpop.eup %4471  ;;  %v7583_v26 = vld [vmem:[#allocation58_spill] sm:$0xff] }
 0xd1f   :  { %4475 = vrcp.f32 %v2717_v47  ;;  %v4474_v8 = vpop.eup %4473  ;;  %v7582_v47 = vld [vmem:[#allocation57_spill] sm:$0xff] }
 0xd20   :  { %4477 = vrcp.f32 %v2718_v41  ;;  %v2719_v40 = vadd.f32 1.0, %v4474_v8  ;;  %v7584_v41 = vld [vmem:[#allocation59_spill] sm:$0xff]  ;;  %v6418_v8 = vld [vmem:[#allocation5 + $0x124] ss:$16 sps:$4 sm:$0xff]  }
 0xd21   :  { %7586 = vst [vmem:[#allocation67_spill] sm:$0xff] %v6418_v8 }
 0xd22   :  { %4479 = vrcp.f32 %v2719_v40  ;;  %v6432_v40 = vld [vmem:[#allocation5 + $0x144] ss:$16 sps:$4 sm:$0xff]  }
 0xd23   :  { %7590 = vst [vmem:[#allocation71_spill] sm:$0xff] %v6432_v40 }
 0xd29   :  { %v4476_v23 = vpop.eup %4475 }
 0xd2a   :  { %v2728_v24 = vmul.f32 %v4476_v23, %v4472_v14  ;;  %v4478_v27 = vpop.eup %4477  ;;  %v6415_v14 = vld [vmem:[#allocation5 + $0x108] ss:$16 sps:$4 sm:$0xff]   ;;  %v6421_v23 = vld [vmem:[#allocation5 + $0x12c] ss:$16 sps:$4 sm:$0xff]  }
 0xd2b   :  { %v2727_v38 = vmul.f32 %v4478_v27, %v6187_v63  ;;  %v7576_v63 = vld [vmem:[#allocation51_spill] sm:$0xff]  ;;  %7585 = vst [vmem:[#allocation66_spill] sm:$0xff] %v6415_v14  ;;  %7587 = vst [vmem:[#allocation68_spill] sm:$0xff] %v6421_v23 }
 0xd2c   :  { %v4480_v1 = vpop.eup %4479  ;;  %v6429_v27 = vld [vmem:[#allocation5 + $0x128] ss:$16 sps:$4 sm:$0xff]  }
 0xd2d   :  { %v6381_v37 = vadd.f32 %v2728_v24, %v2727_v38  ;;  %v6426_v24 = vld [vmem:[#allocation5 + $0x120] ss:$16 sps:$4 sm:$0xff]   ;;  %7589 = vst [vmem:[#allocation70_spill] sm:$0xff] %v6429_v27  ;;  %v6435_v38 = vld [vmem:[#allocation5 + $0x14c] ss:$16 sps:$4 sm:$0xff]  }
 0xd2e   :  { %7588 = vst [vmem:[#allocation69_spill] sm:$0xff] %v6426_v24  ;;  %7591 = vst [vmem:[#allocation72_spill] sm:$0xff] %v6435_v38 }
 0xd2f   :  { %4481 = vtanh.f32 %v6381_v37 }
 0xd39   :  { %v4482_v31 = vpop.eup %4481 }
 0xd3a   :  { %v2731_v45 = vmul.f32 %v4482_v31, %v4480_v1  ;;  %v6443_v1 = vld [vmem:[#allocation5 + $0x148] ss:$16 sps:$4 sm:$0xff]   ;;  %v6446_v31 = vld [vmem:[#allocation5 + $0x164] ss:$16 sps:$4 sm:$0xff]  }
 0xd3b   :  { %7593 = vst [vmem:[#allocation74_spill] sm:$0xff] %v6443_v1  ;;  %7594 = vst [vmem:[#allocation75_spill] sm:$0xff] %v6446_v31 }
 0xd3c   :  { %v2732_v34 = vpack.c.bf16 %v2731_v45, %v2731_v45  ;;  %v6449_v45 = vld [vmem:[#allocation5 + $0x16c] ss:$16 sps:$4 sm:$0xff]  }
 0xd3d   :  { %7595 = vst [vmem:[#allocation79_spill] sm:$0xff] %v6449_v45 }
 0xd3e   :  { %2766 = vmatmul.mubr.bf16.vlgmr.msra.gmra.mrb[88].mxu0 %v2732_v34  ;;  %2807 = vmatmul.mubr.bf16.vlgmr.msra.gmra.mrb[88].mxu1 %v2732_v34  ;;  %v6452_v34 = vld [vmem:[#allocation5 + $0x160] ss:$16 sps:$4 sm:$0xff]  }
 0xd3f   :  { %2816 = vmatpush1.bf16.msra.mxu0 %v6190_v55  ;;  %2857 = vmatpush1.bf16.msra.mxu1 %v6193_v21  ;;  %7596 = vst [vmem:[#allocation81_spill] sm:$0xff] %v6452_v34 }
 0xd40   :  { %2817 = vmatprep.subr.bf16.mxu0 %v6196_v50  ;;  %2858 = vmatprep.subr.bf16.mxu1 %v6199_v39 }
 0xd41   :  { %2847 = vmatprep.mubr.bf16.mxu0 %v7174_v2  ;;  %2888 = vmatprep.mubr.bf16.mxu1 %v7174_v2 }
 0xd43   :  { %2818 = vmatpush1.bf16.msra.mxu0 %v6204_v0  ;;  %2859 = vmatpush1.bf16.msra.mxu1 %v6207_v17 }
 0xd44   :  { %2819 = vmatprep.subr.bf16.mxu0 %v6210_v43  ;;  %2860 = vmatprep.subr.bf16.mxu1 %v6213_v53 }
 0xd47   :  { %2820 = vmatpush1.bf16.msra.mxu0 %v6216_v6  ;;  %2861 = vmatpush1.bf16.msra.mxu1 %v6219_v52 }
 0xd48   :  { %2821 = vmatprep.subr.bf16.mxu0 %v6222_v57  ;;  %2862 = vmatprep.subr.bf16.mxu1 %v6225_v7 }
 0xd4b   :  { %2822 = vmatpush1.bf16.msra.mxu0 %v6228_v61  ;;  %2863 = vmatpush1.bf16.msra.mxu1 %v6231_v49 }
 0xd4c   :  { %2823 = vmatprep.subr.bf16.mxu0 %v7576_v63  ;;  %2864 = vmatprep.subr.bf16.mxu1 %v7577_v11 }
 0xd4f   :  { %2824 = vmatpush1.bf16.msra.mxu0 %v7578_v58  ;;  %2865 = vmatpush1.bf16.msra.mxu1 %v7579_v16 }
 0xd50   :  { %2825 = vmatprep.subr.bf16.mxu0 %v7580_v33  ;;  %2866 = vmatprep.subr.bf16.mxu1 %v7581_v42 }
 0xd53   :  { %2826 = vmatpush1.bf16.msra.mxu0 %v7582_v47  ;;  %2867 = vmatpush1.bf16.msra.mxu1 %v7583_v26 }
 0xd54   :  { %2827 = vmatprep.subr.bf16.mxu0 %v7584_v41  ;;  %2868 = vmatprep.subr.bf16.mxu1 %v6261_v25 }
 0xd57   :  { %2828 = vmatpush1.bf16.msra.mxu0 %v6264_v60  ;;  %2869 = vmatpush1.bf16.msra.mxu1 %v6267_v51  ;;  %v7621_v60 = vld [vmem:[#allocation103_spill] sm:$0xff] }
 0xd58   :  { %2829 = vmatprep.subr.bf16.mxu0 %v6270_v62  ;;  %2870 = vmatprep.subr.bf16.mxu1 %v6273_v3  ;;  %v7620_v62 = vld [vmem:[#allocation100_spill] sm:$0xff] }
 0xd5b   :  { %2830 = vmatpush1.bf16.msra.mxu0 %v6276_v18  ;;  %2871 = vmatpush1.bf16.msra.mxu1 %v6415_v14  ;;  %v7618_v14 = vld [vmem:[#allocation99_spill] sm:$0xff]  ;;  %v7619_v18 = vld [vmem:[#allocation101_spill] sm:$0xff] }
 0xd5c   :  { %2926 = vmatprep.subr.bf16.mxu0 %v6418_v8  ;;  %2967 = vmatprep.subr.bf16.mxu1 %v6421_v23 }
 0xd5e   :  { %2848 = vmatmul.mubr.bf16.vlgmr.msra.gmra.mrb[92].mxu0 %v6334_v54  ;;  %2889 = vmatmul.mubr.bf16.vlgmr.msra.gmra.mrb[92].mxu1 %v6334_v54  ;;  %v6440_v54 = vld [vmem:[#allocation5 + $0x140] ss:$16 sps:$4 sm:$0xff]  }
 0xd5f   :  { %2927 = vmatpush1.bf16.msra.mxu0 %v6426_v24  ;;  %2968 = vmatpush1.bf16.msra.mxu1 %v6429_v27  ;;  %7592 = vst [vmem:[#allocation73_spill] sm:$0xff] %v6440_v54 }
 0xd60   :  { %2928 = vmatprep.subr.bf16.mxu0 %v6432_v40  ;;  %2969 = vmatprep.subr.bf16.mxu1 %v6435_v38  ;;  %v6455_v38 = vld [vmem:[#allocation5 + $0x168] ss:$16 sps:$4 sm:$0xff]  }
 0xd61   :  { %2958 = vmatprep.mubr.bf16.mxu0 %v7174_v2  ;;  %2999 = vmatprep.mubr.bf16.mxu1 %v7174_v2  ;;  %7597 = vst [vmem:[#allocation80_spill] sm:$0xff] %v6455_v38 }
 0xd63   :  { %2929 = vmatpush1.bf16.msra.mxu0 %v6440_v54  ;;  %2970 = vmatpush1.bf16.msra.mxu1 %v6443_v1  ;;  %v6458_v54 = vld [vmem:[#allocation5 + $0x184] ss:$16 sps:$4 sm:$0xff]   ;;  %v6461_v1 = vld [vmem:[#allocation5 + $0x18c] ss:$16 sps:$4 sm:$0xff]  }
 0xd64   :  { %2930 = vmatprep.subr.bf16.mxu0 %v6446_v31  ;;  %2971 = vmatprep.subr.bf16.mxu1 %v6449_v45  ;;  %7598 = vst [vmem:[#allocation82_spill] sm:$0xff] %v6458_v54  ;;  %7599 = vst [vmem:[#allocation76_spill] sm:$0xff] %v6461_v1  ;;  %v6464_v31 = vld [vmem:[#allocation5 + $0x180] ss:$16 sps:$4 sm:$0xff]   ;;  %v6467_v45 = vld [vmem:[#allocation5 + $0x188] ss:$16 sps:$4 sm:$0xff]  }
 0xd65   :  { %7600 = vst [vmem:[#allocation16_spill] sm:$0xff] %v6464_v31  ;;  %7601 = vst [vmem:[#allocation17_spill] sm:$0xff] %v6467_v45 }
 0xd67   :  { %2931 = vmatpush1.bf16.msra.mxu0 %v6452_v34  ;;  %2972 = vmatpush1.bf16.msra.mxu1 %v6455_v38  ;;  %v6470_v34 = vld [vmem:[#allocation5 + $0x1a4] ss:$16 sps:$4 sm:$0xff]   ;;  %v6473_v38 = vld [vmem:[#allocation5 + $0x1ac] ss:$16 sps:$4 sm:$0xff]  }
 0xd68   :  { %2932 = vmatprep.subr.bf16.mxu0 %v6458_v54  ;;  %2973 = vmatprep.subr.bf16.mxu1 %v6461_v1  ;;  %7602 = vst [vmem:[#allocation83_spill] sm:$0xff] %v6470_v34  ;;  %7603 = vst [vmem:[#allocation85_spill] sm:$0xff] %v6473_v38  ;;  %v6476_v54 = vld [vmem:[#allocation5 + $0x1a0] ss:$16 sps:$4 sm:$0xff]   ;;  %v6479_v1 = vld [vmem:[#allocation5 + $0x1a8] ss:$16 sps:$4 sm:$0xff]  }
 0xd69   :  { %7604 = vst [vmem:[#allocation84_spill] sm:$0xff] %v6476_v54  ;;  %7605 = vst [vmem:[#allocation87_spill] sm:$0xff] %v6479_v1 }
 0xd6b   :  { %2933 = vmatpush1.bf16.msra.mxu0 %v6464_v31  ;;  %2974 = vmatpush1.bf16.msra.mxu1 %v6467_v45  ;;  %v6482_v31 = vld [vmem:[#allocation5 + $0x1c4] ss:$16 sps:$4 sm:$0xff]   ;;  %v6485_v45 = vld [vmem:[#allocation5 + $0x1cc] ss:$16 sps:$4 sm:$0xff]  }
 0xd6c   :  { %2934 = vmatprep.subr.bf16.mxu0 %v6470_v34  ;;  %2975 = vmatprep.subr.bf16.mxu1 %v6473_v38  ;;  %7606 = vst [vmem:[#allocation18_spill] sm:$0xff] %v6482_v31  ;;  %7607 = vst [vmem:[#allocation19_spill] sm:$0xff] %v6485_v45  ;;  %v6488_v34 = vld [vmem:[#allocation5 + $0x1c0] ss:$16 sps:$4 sm:$0xff]   ;;  %v6491_v38 = vld [vmem:[#allocation5 + $0x1c8] ss:$16 sps:$4 sm:$0xff]  }
 0xd6d   :  { %7608 = vst [vmem:[#allocation20_spill] sm:$0xff] %v6488_v34  ;;  %7609 = vst [vmem:[#allocation21_spill] sm:$0xff] %v6491_v38 }
 0xd6f   :  { %2935 = vmatpush1.bf16.msra.mxu0 %v6476_v54  ;;  %2976 = vmatpush1.bf16.msra.mxu1 %v6479_v1  ;;  %v6494_v54 = vld [vmem:[#allocation5 + $0x1e4] ss:$16 sps:$4 sm:$0xff]   ;;  %v6497_v1 = vld [vmem:[#allocation5 + $0x1ec] ss:$16 sps:$4 sm:$0xff]  }
 0xd70   :  { %2936 = vmatprep.subr.bf16.mxu0 %v6482_v31  ;;  %2977 = vmatprep.subr.bf16.mxu1 %v6485_v45  ;;  %7610 = vst [vmem:[#allocation22_spill] sm:$0xff] %v6494_v54  ;;  %7611 = vst [vmem:[#allocation23_spill] sm:$0xff] %v6497_v1  ;;  %v6500_v31 = vld [vmem:[#allocation5 + $0x1e0] ss:$16 sps:$4 sm:$0xff]   ;;  %v6503_v45 = vld [vmem:[#allocation5 + $0x1e8] ss:$16 sps:$4 sm:$0xff]  }
 0xd71   :  { %7612 = vst [vmem:[#allocation91_spill] sm:$0xff] %v6500_v31  ;;  %7613 = vst [vmem:[#allocation93_spill] sm:$0xff] %v6503_v45 }
 0xd73   :  { %2937 = vmatpush1.bf16.msra.mxu0 %v6488_v34  ;;  %2978 = vmatpush1.bf16.msra.mxu1 %v6491_v38  ;;  %v6506_v34 = vld [vmem:[#allocation5 + $0x204] ss:$16 sps:$4 sm:$0xff]   ;;  %v6509_v38 = vld [vmem:[#allocation5 + $0x20c] ss:$16 sps:$4 sm:$0xff]  }
 0xd74   :  { %2938 = vmatprep.subr.bf16.mxu0 %v6494_v54  ;;  %2979 = vmatprep.subr.bf16.mxu1 %v6497_v1  ;;  %7614 = vst [vmem:[#allocation92_spill] sm:$0xff] %v6506_v34  ;;  %7615 = vst [vmem:[#allocation95_spill] sm:$0xff] %v6509_v38  ;;  %v6512_v54 = vld [vmem:[#allocation5 + $0x200] ss:$16 sps:$4 sm:$0xff]   ;;  %v6515_v1 = vld [vmem:[#allocation5 + $0x208] ss:$16 sps:$4 sm:$0xff]  }
 0xd75   :  { %7616 = vst [vmem:[#allocation24_spill] sm:$0xff] %v6512_v54  ;;  %7617 = vst [vmem:[#allocation25_spill] sm:$0xff] %v6515_v1 }
 0xd77   :  { %2939 = vmatpush1.bf16.msra.mxu0 %v6500_v31  ;;  %2980 = vmatpush1.bf16.msra.mxu1 %v6503_v45 }
 0xd78   :  { %2940 = vmatprep.subr.bf16.mxu0 %v6506_v34  ;;  %2981 = vmatprep.subr.bf16.mxu1 %v6509_v38 }
 0xd7b   :  { %2941 = vmatpush1.bf16.msra.mxu0 %v6512_v54  ;;  %2982 = vmatpush1.bf16.msra.mxu1 %v6515_v1 }
 0xd7c   :  { %3037 = vmatprep.subr.bf16.mxu0 %v7542_v10  ;;  %3078 = vmatprep.subr.bf16.mxu1 %v7543_v4 }
 0xe11   :  { %v6520_v45 = vpop.f32.mrb[88].mxu0  ;;  %v6522_v31 = vpop.f32.mrb[88].mxu1 }
 0xe12   :  { %v6524_v34 = vpop.f32.mrb[89].mxu0  ;;  %v6526_v40 = vpop.f32.mrb[89].mxu1 }
 0xe13   :  { %v2771_v38 = vpop.f32.mrb[90].mxu0  ;;  %v2812_v27 = vpop.f32.mrb[90].mxu1 }
 0xe14   :  { %v2772_v24 = vpop.f32.mrb[91].mxu0  ;;  %v2813_v54 = vpop.f32.mrb[91].mxu1 }
 0xe31   :  { %v2849_v23 = vpop.f32.mrb[92].mxu0  ;;  %v2890_v8 = vpop.f32.mrb[92].mxu1 }
 0xe32   :  { %v2897_v1 = vadd.f32 %v2849_v23, %v7618_v14  ;;  %v2899_v10 = vadd.f32 %v2890_v8, %v7619_v18  ;;  %v2851_v3 = vpop.f32.mrb[93].mxu0  ;;  %v2892_v4 = vpop.f32.mrb[93].mxu1 }
 0xe33   :  { %v2898_v51 = vadd.f32 %v2851_v3, %v7620_v62  ;;  %v2900_v25 = vadd.f32 %v2892_v4, %v7621_v60  ;;  %v2853_v41 = vpop.f32.mrb[94].mxu0  ;;  %v2894_v26 = vpop.f32.mrb[94].mxu1  ;;  %v7639_v4 = vld [vmem:[#allocation50_spill] sm:$0xff] }
 0xe34   :  { %v4024_v47 = vmul.f32 -1.442695, %v2897_v1  ;;  %v2854_v42 = vpop.f32.mrb[95].mxu0  ;;  %v2895_v38 = vpop.f32.mrb[95].mxu1  ;;  %v4026_v24 = vmul.f32 -1.442695, %v2899_v10 }
 0xe35   :  { %v4025_v27 = vmul.f32 -1.442695, %v2898_v51  ;;  %v7638_v10 = vld [vmem:[#allocation45_spill] sm:$0xff] }
 0xe36   :  { %4483 = vpow2.f32 %v4024_v47 }
 0xe37   :  { %4485 = vpow2.f32 %v4025_v27 }
 0xe38   :  { %4487 = vtanh.f32 %v2900_v25 }
 0xe39   :  { %4489 = vpow2.f32 %v4026_v24 }
 0xe40   :  { %v4484_v54 = vpop.eup %4483 }
 0xe41   :  { %v2910_v33 = vadd.f32 1.0, %v4484_v54  ;;  %v4486_v14 = vpop.eup %4485 }
 0xe42   :  { %v2911_v18 = vadd.f32 1.0, %v4486_v14  ;;  %v4488_v62 = vpop.eup %4487 }
 0xe43   :  { %4491 = vrcp.f32 %v2910_v33  ;;  %v4490_v3 = vpop.eup %4489  ;;  %v7637_v33 = vld [vmem:[#allocation44_spill] sm:$0xff] }
 0xe44   :  { %4493 = vrcp.f32 %v2911_v18  ;;  %v2912_v8 = vadd.f32 1.0, %v4490_v3 }
 0xe46   :  { %4495 = vrcp.f32 %v2912_v8 }
 0xe4d   :  { %v4492_v60 = vpop.eup %4491 }
 0xe4e   :  { %v2921_v41 = vmul.f32 %v4492_v60, %v4488_v62  ;;  %v4494_v26 = vpop.eup %4493 }
 0xe4f   :  { %v2920_v42 = vmul.f32 %v4494_v26, %v6331_v36  ;;  %v7626_v36 = vld [vmem:[#allocation33_spill] sm:$0xff] }
 0xe50   :  { %v4496_v47 = vpop.eup %4495 }
 0xe51   :  { %v6533_v51 = vadd.f32 %v2921_v41, %v2920_v42 }
 0xe53   :  { %4497 = vtanh.f32 %v6533_v51 }
 0xe5d   :  { %v4498_v25 = vpop.eup %4497 }
 0xe5e   :  { %v2924_v23 = vmul.f32 %v4498_v25, %v4496_v47 }
 0xe60   :  { %v6536_v1 = vpack.c.bf16 %v2924_v23, %v2924_v23 }
 0xe62   :  { %2959 = vmatmul.mubr.bf16.vlgmr.msra.gmra.mrb[96].mxu0 %v6536_v1  ;;  %3000 = vmatmul.mubr.bf16.vlgmr.msra.gmra.mrb[96].mxu1 %v6536_v1 }
 0xe63   :  { %3038 = vmatpush1.bf16.msra.mxu0 %v6080_v20  ;;  %3079 = vmatpush1.bf16.msra.mxu1 %v6083_v44  ;;  %v7622_v20 = vld [vmem:[#allocation29_spill] sm:$0xff]  ;;  %v7623_v44 = vld [vmem:[#allocation30_spill] sm:$0xff] }
 0xe64   :  { %3039 = vmatprep.subr.bf16.mxu0 %v6086_v15  ;;  %3080 = vmatprep.subr.bf16.mxu1 %v6089_v46  ;;  %v7624_v15 = vld [vmem:[#allocation31_spill] sm:$0xff]  ;;  %v7625_v46 = vld [vmem:[#allocation32_spill] sm:$0xff] }
 0xe65   :  { %3069 = vmatprep.mubr.bf16.mxu0 %v7174_v2  ;;  %3110 = vmatprep.mubr.bf16.mxu1 %v7174_v2 }
 0xe67   :  { %3040 = vmatpush1.bf16.msra.mxu0 %v7548_v13  ;;  %3081 = vmatpush1.bf16.msra.mxu1 %v7549_v56  ;;  %v7627_v13 = vld [vmem:[#allocation34_spill] sm:$0xff]  ;;  %v7628_v56 = vld [vmem:[#allocation35_spill] sm:$0xff] }
 0xe68   :  { %3041 = vmatprep.subr.bf16.mxu0 %v7550_v5  ;;  %3082 = vmatprep.subr.bf16.mxu1 %v7551_v59  ;;  %v7629_v5 = vld [vmem:[#allocation36_spill] sm:$0xff]  ;;  %v7630_v59 = vld [vmem:[#allocation37_spill] sm:$0xff] }
 0xe6b   :  { %3042 = vmatpush1.bf16.msra.mxu0 %v7552_v29  ;;  %3083 = vmatpush1.bf16.msra.mxu1 %v7553_v22  ;;  %v7631_v29 = vld [vmem:[#allocation38_spill] sm:$0xff]  ;;  %v7632_v22 = vld [vmem:[#allocation39_spill] sm:$0xff] }
 0xe6c   :  { %3043 = vmatprep.subr.bf16.mxu0 %v7554_v28  ;;  %3084 = vmatprep.subr.bf16.mxu1 %v7555_v19  ;;  %v7633_v28 = vld [vmem:[#allocation40_spill] sm:$0xff]  ;;  %v7634_v19 = vld [vmem:[#allocation41_spill] sm:$0xff] }
 0xe6f   :  { %3044 = vmatpush1.bf16.msra.mxu0 %v7556_v48  ;;  %3085 = vmatpush1.bf16.msra.mxu1 %v7557_v35  ;;  %v7635_v48 = vld [vmem:[#allocation42_spill] sm:$0xff]  ;;  %v7636_v35 = vld [vmem:[#allocation43_spill] sm:$0xff] }
 0xe70   :  { %3045 = vmatprep.subr.bf16.mxu0 %v7622_v20  ;;  %3086 = vmatprep.subr.bf16.mxu1 %v7623_v44 }
 0xe73   :  { %3046 = vmatpush1.bf16.msra.mxu0 %v7624_v15  ;;  %3087 = vmatpush1.bf16.msra.mxu1 %v7625_v46 }
 0xe74   :  { %3047 = vmatprep.subr.bf16.mxu0 %v7626_v36  ;;  %3088 = vmatprep.subr.bf16.mxu1 %v7627_v13 }
 0xe77   :  { %3048 = vmatpush1.bf16.msra.mxu0 %v7628_v56  ;;  %3089 = vmatpush1.bf16.msra.mxu1 %v7629_v5 }
 0xe78   :  { %3049 = vmatprep.subr.bf16.mxu0 %v7630_v59  ;;  %3090 = vmatprep.subr.bf16.mxu1 %v7631_v29 }
 0xe7b   :  { %3050 = vmatpush1.bf16.msra.mxu0 %v7632_v22  ;;  %3091 = vmatpush1.bf16.msra.mxu1 %v7633_v28 }
 0xe7c   :  { %3051 = vmatprep.subr.bf16.mxu0 %v7634_v19  ;;  %3092 = vmatprep.subr.bf16.mxu1 %v7635_v48 }
 0xe7f   :  { %3052 = vmatpush1.bf16.msra.mxu0 %v7636_v35  ;;  %3093 = vmatpush1.bf16.msra.mxu1 %v7637_v33  ;;  %v7659_v33 = vld [vmem:[#allocation74_spill] sm:$0xff] }
 0xe80   :  { %3119 = vmatprep.subr.bf16.mxu0 %v7638_v10  ;;  %3160 = vmatprep.subr.bf16.mxu1 %v7639_v4  ;;  %v7660_v10 = vld [vmem:[#allocation75_spill] sm:$0xff] }
 0xe81   :  { %v7661_v4 = vld [vmem:[#allocation79_spill] sm:$0xff] }
 0xf35   :  { %v2960_v38 = vpop.f32.mrb[96].mxu0  ;;  %v3001_v27 = vpop.f32.mrb[96].mxu1 }
 0xf36   :  { %v2961_v24 = vadd.f32 %v2960_v38, %v6520_v45  ;;  %v3002_v54 = vadd.f32 %v3001_v27, %v6522_v31  ;;  %v2962_v14 = vpop.f32.mrb[97].mxu0  ;;  %v3003_v18 = vpop.f32.mrb[97].mxu1  ;;  %v7663_v38 = vld [vmem:[#allocation80_spill] sm:$0xff]  ;;  %v7664_v27 = vld [vmem:[#allocation82_spill] sm:$0xff] }
 0xf37   :  { %v2963_v62 = vadd.f32 %v2962_v14, %v6524_v34  ;;  %v3004_v3 = vadd.f32 %v3003_v18, %v6526_v40  ;;  %v2964_v60 = vpop.f32.mrb[98].mxu0  ;;  %v3005_v41 = vpop.f32.mrb[98].mxu1  ;;  %v7667_v14 = vld [vmem:[#allocation17_spill] sm:$0xff]  ;;  %v7668_v18 = vld [vmem:[#allocation83_spill] sm:$0xff] }
 0xf38   :  { %v3008_v26 = vadd.f32 %v2961_v24, %v5362_v9  ;;  %v2965_v8 = vpop.f32.mrb[99].mxu0  ;;  %v3006_v42 = vpop.f32.mrb[99].mxu1  ;;  %v3010_v31 = vadd.f32 %v3002_v54, %v5375_v30  ;;  %v7665_v24 = vld [vmem:[#allocation76_spill] sm:$0xff]  ;;  %v7671_v60 = vld [vmem:[#allocation87_spill] sm:$0xff]  ;;  %v7672_v41 = vld [vmem:[#allocation18_spill] sm:$0xff] }
 0xf39   :  { %v3009_v47 = vadd.f32 %v2963_v62, %v5365_v12  ;;  %v3011_v45 = vadd.f32 %v3004_v3, %v5379_v32  ;;  %v7666_v54 = vld [vmem:[#allocation16_spill] sm:$0xff]  ;;  %v7669_v62 = vld [vmem:[#allocation85_spill] sm:$0xff] }
 0xf3a   :  { %v4027_v25 = vmul.f32 -1.442695, %v3008_v26  ;;  %v4029_v20 = vmul.f32 -1.442695, %v3010_v31  ;;  %v7670_v3 = vld [vmem:[#allocation84_spill] sm:$0xff]  ;;  %v7673_v26 = vld [vmem:[#allocation19_spill] sm:$0xff] }
 0xf3b   :  { %v4028_v23 = vmul.f32 -1.442695, %v3009_v47  ;;  %v7674_v8 = vld [vmem:[#allocation20_spill] sm:$0xff]  ;;  %v7675_v42 = vld [vmem:[#allocation21_spill] sm:$0xff]  ;;  %v7676_v47 = vld [vmem:[#allocation22_spill] sm:$0xff] }
 0xf3c   :  { %4499 = vpow2.f32 %v4027_v25  ;;  %v7677_v25 = vld [vmem:[#allocation23_spill] sm:$0xff]  ;;  %v7679_v31 = vld [vmem:[#allocation93_spill] sm:$0xff] }
 0xf3d   :  { %4501 = vpow2.f32 %v4028_v23  ;;  %v7678_v23 = vld [vmem:[#allocation91_spill] sm:$0xff] }
 0xf3e   :  { %4503 = vtanh.f32 %v3011_v45  ;;  %v7680_v45 = vld [vmem:[#allocation92_spill] sm:$0xff] }
 0xf3f   :  { %4505 = vpow2.f32 %v4029_v20  ;;  %v7681_v20 = vld [vmem:[#allocation95_spill] sm:$0xff] }
 0xf46   :  { %v4500_v34 = vpop.eup %4499 }
 0xf47   :  { %v3021_v44 = vadd.f32 1.0, %v4500_v34  ;;  %v4502_v40 = vpop.eup %4501  ;;  %v7682_v34 = vld [vmem:[#allocation24_spill] sm:$0xff] }
 0xf48   :  { %v3022_v15 = vadd.f32 1.0, %v4502_v40  ;;  %v4504_v46 = vpop.eup %4503 }
 0xf49   :  { %4507 = vrcp.f32 %v3021_v44  ;;  %v4506_v36 = vpop.eup %4505  ;;  %v7683_v44 = vld [vmem:[#allocation25_spill] sm:$0xff] }
 0xf4a   :  { %4509 = vrcp.f32 %v3022_v15  ;;  %v3023_v59 = vadd.f32 1.0, %v4506_v36 }
 0xf4c   :  { %4511 = vrcp.f32 %v3023_v59 }
 0xf53   :  { %v4508_v13 = vpop.eup %4507 }
 0xf54   :  { %v3032_v56 = vmul.f32 %v4508_v13, %v4504_v46  ;;  %v4510_v5 = vpop.eup %4509 }
 0xf55   :  { %v3031_v29 = vmul.f32 %v4510_v5, %v6381_v37  ;;  %v7654_v37 = vld [vmem:[#allocation69_spill] sm:$0xff] }
 0xf56   :  { %v4512_v28 = vpop.eup %4511 }
 0xf57   :  { %v6583_v22 = vadd.f32 %v3032_v56, %v3031_v29 }
 0xf59   :  { %4513 = vtanh.f32 %v6583_v22 }
 0xf63   :  { %v4514_v19 = vpop.eup %4513 }
 0xf64   :  { %v3035_v48 = vmul.f32 %v4514_v19, %v4512_v28  ;;  %v7684_v19 = vld [vmem:[#allocation102_spill] sm:$0xff] }
 0xf66   :  { %v3036_v35 = vpack.c.bf16 %v3035_v48, %v3035_v48 }
 0xf68   :  { %3070 = vmatmul.mubr.bf16.vlgmr.msra.gmra.mrb[100].mxu0 %v3036_v35  ;;  %3111 = vmatmul.mubr.bf16.vlgmr.msra.gmra.mrb[100].mxu1 %v3036_v35  ;;  %v7685_v35 = vld [vmem:[#allocation105_spill] sm:$0xff] }
 0xf69   :  { %3120 = vmatpush1.bf16.msra.mxu0 %v6190_v55  ;;  %3161 = vmatpush1.bf16.msra.mxu1 %v6193_v21  ;;  %v7640_v55 = vld [vmem:[#allocation55_spill] sm:$0xff]  ;;  %v7641_v21 = vld [vmem:[#allocation56_spill] sm:$0xff] }
 0xf6a   :  { %3121 = vmatprep.subr.bf16.mxu0 %v6196_v50  ;;  %3162 = vmatprep.subr.bf16.mxu1 %v6199_v39  ;;  %v7642_v50 = vld [vmem:[#allocation57_spill] sm:$0xff]  ;;  %v7643_v39 = vld [vmem:[#allocation58_spill] sm:$0xff] }
 0xf6b   :  { %3151 = vmatprep.mubr.bf16.mxu0 %v7174_v2  ;;  %3192 = vmatprep.mubr.bf16.mxu1 %v7174_v2 }
 0xf6d   :  { %3122 = vmatpush1.bf16.msra.mxu0 %v6204_v0  ;;  %3163 = vmatpush1.bf16.msra.mxu1 %v6207_v17  ;;  %v7644_v0 = vld [vmem:[#allocation59_spill] sm:$0xff]  ;;  %v7645_v17 = vld [vmem:[#allocation60_spill] sm:$0xff] }
 0xf6e   :  { %3123 = vmatprep.subr.bf16.mxu0 %v6210_v43  ;;  %3164 = vmatprep.subr.bf16.mxu1 %v6213_v53  ;;  %v7646_v43 = vld [vmem:[#allocation61_spill] sm:$0xff]  ;;  %v7647_v53 = vld [vmem:[#allocation62_spill] sm:$0xff] }
 0xf71   :  { %3124 = vmatpush1.bf16.msra.mxu0 %v6216_v6  ;;  %3165 = vmatpush1.bf16.msra.mxu1 %v6219_v52  ;;  %v7648_v6 = vld [vmem:[#allocation63_spill] sm:$0xff]  ;;  %v7649_v52 = vld [vmem:[#allocation64_spill] sm:$0xff] }
 0xf72   :  { %3125 = vmatprep.subr.bf16.mxu0 %v6222_v57  ;;  %3166 = vmatprep.subr.bf16.mxu1 %v6225_v7  ;;  %v7650_v57 = vld [vmem:[#allocation65_spill] sm:$0xff]  ;;  %v7651_v7 = vld [vmem:[#allocation66_spill] sm:$0xff] }
 0xf75   :  { %3126 = vmatpush1.bf16.msra.mxu0 %v6228_v61  ;;  %3167 = vmatpush1.bf16.msra.mxu1 %v6231_v49  ;;  %v7652_v61 = vld [vmem:[#allocation67_spill] sm:$0xff]  ;;  %v7653_v49 = vld [vmem:[#allocation68_spill] sm:$0xff] }
 0xf76   :  { %3127 = vmatprep.subr.bf16.mxu0 %v7576_v63  ;;  %3168 = vmatprep.subr.bf16.mxu1 %v7577_v11  ;;  %v7655_v63 = vld [vmem:[#allocation70_spill] sm:$0xff]  ;;  %v7656_v11 = vld [vmem:[#allocation71_spill] sm:$0xff] }
 0xf79   :  { %3128 = vmatpush1.bf16.msra.mxu0 %v7578_v58  ;;  %3169 = vmatpush1.bf16.msra.mxu1 %v7579_v16  ;;  %v7657_v58 = vld [vmem:[#allocation72_spill] sm:$0xff]  ;;  %v7658_v16 = vld [vmem:[#allocation73_spill] sm:$0xff] }
 0xf7a   :  { %3129 = vmatprep.subr.bf16.mxu0 %v7640_v55  ;;  %3170 = vmatprep.subr.bf16.mxu1 %v7641_v21 }
 0xf7d   :  { %3130 = vmatpush1.bf16.msra.mxu0 %v7642_v50  ;;  %3171 = vmatpush1.bf16.msra.mxu1 %v7643_v39  ;;  %v7686_v39 = vld [vmem:[#allocation104_spill] sm:$0xff] }
 0xf7e   :  { %3131 = vmatprep.subr.bf16.mxu0 %v7644_v0  ;;  %3172 = vmatprep.subr.bf16.mxu1 %v7645_v17  ;;  %v7687_v17 = vld [vmem:[#allocation106_spill] sm:$0xff] }
 0xf81   :  { %3132 = vmatpush1.bf16.msra.mxu0 %v7646_v43  ;;  %3173 = vmatpush1.bf16.msra.mxu1 %v7647_v53 }
 0xf82   :  { %3133 = vmatprep.subr.bf16.mxu0 %v7648_v6  ;;  %3174 = vmatprep.subr.bf16.mxu1 %v7649_v52 }
 0xf85   :  { %3134 = vmatpush1.bf16.msra.mxu0 %v7650_v57  ;;  %3175 = vmatpush1.bf16.msra.mxu1 %v7651_v7 }
 0xf86   :  { %3230 = vmatprep.subr.bf16.mxu0 %v7652_v61  ;;  %3271 = vmatprep.subr.bf16.mxu1 %v7653_v49 }
 0xf88   :  { %3152 = vmatmul.mubr.bf16.vlgmr.msra.gmra.mrb[104].mxu0 %v6536_v1  ;;  %3193 = vmatmul.mubr.bf16.vlgmr.msra.gmra.mrb[104].mxu1 %v6536_v1  ;;  %v7662_v1 = vld [vmem:[#allocation81_spill] sm:$0xff] }
 0xf89   :  { %3231 = vmatpush1.bf16.msra.mxu0 %v7654_v37  ;;  %3272 = vmatpush1.bf16.msra.mxu1 %v7655_v63 }
 0xf8a   :  { %3232 = vmatprep.subr.bf16.mxu0 %v7656_v11  ;;  %3273 = vmatprep.subr.bf16.mxu1 %v7657_v58 }
 0xf8b   :  { %3262 = vmatprep.mubr.bf16.mxu0 %v7174_v2  ;;  %3303 = vmatprep.mubr.bf16.mxu1 %v7174_v2 }
 0xf8d   :  { %3233 = vmatpush1.bf16.msra.mxu0 %v7658_v16  ;;  %3274 = vmatpush1.bf16.msra.mxu1 %v7659_v33 }
 0xf8e   :  { %3234 = vmatprep.subr.bf16.mxu0 %v7660_v10  ;;  %3275 = vmatprep.subr.bf16.mxu1 %v7661_v4 }
 0xf91   :  { %3235 = vmatpush1.bf16.msra.mxu0 %v7662_v1  ;;  %3276 = vmatpush1.bf16.msra.mxu1 %v7663_v38 }
 0xf92   :  { %3236 = vmatprep.subr.bf16.mxu0 %v7664_v27  ;;  %3277 = vmatprep.subr.bf16.mxu1 %v7665_v24 }
 0xf95   :  { %3237 = vmatpush1.bf16.msra.mxu0 %v7666_v54  ;;  %3278 = vmatpush1.bf16.msra.mxu1 %v7667_v14 }
 0xf96   :  { %3238 = vmatprep.subr.bf16.mxu0 %v7668_v18  ;;  %3279 = vmatprep.subr.bf16.mxu1 %v7669_v62 }
 0xf99   :  { %3239 = vmatpush1.bf16.msra.mxu0 %v7670_v3  ;;  %3280 = vmatpush1.bf16.msra.mxu1 %v7671_v60 }
 0xf9a   :  { %3240 = vmatprep.subr.bf16.mxu0 %v7672_v41  ;;  %3281 = vmatprep.subr.bf16.mxu1 %v7673_v26 }
 0xf9d   :  { %3241 = vmatpush1.bf16.msra.mxu0 %v7674_v8  ;;  %3282 = vmatpush1.bf16.msra.mxu1 %v7675_v42 }
 0xf9e   :  { %3242 = vmatprep.subr.bf16.mxu0 %v7676_v47  ;;  %3283 = vmatprep.subr.bf16.mxu1 %v7677_v25 }
 0xfa1   :  { %3243 = vmatpush1.bf16.msra.mxu0 %v7678_v23  ;;  %3284 = vmatpush1.bf16.msra.mxu1 %v7679_v31 }
 0xfa2   :  { %3244 = vmatprep.subr.bf16.mxu0 %v7680_v45  ;;  %3285 = vmatprep.subr.bf16.mxu1 %v7681_v20 }
 0xfa5   :  { %3245 = vmatpush1.bf16.msra.mxu0 %v7682_v34  ;;  %3286 = vmatpush1.bf16.msra.mxu1 %v7683_v44 }
0x103b   :  { %v6654_v40 = vpop.f32.mrb[100].mxu0  ;;  %v6656_v15 = vpop.f32.mrb[100].mxu1 }
0x103c   :  { %v6658_v46 = vpop.f32.mrb[101].mxu0  ;;  %v6660_v36 = vpop.f32.mrb[101].mxu1 }
0x103d   :  { %v3075_v13 = vpop.f32.mrb[102].mxu0  ;;  %v3116_v56 = vpop.f32.mrb[102].mxu1 }
0x103e   :  { %v3076_v5 = vpop.f32.mrb[103].mxu0  ;;  %v3117_v59 = vpop.f32.mrb[103].mxu1 }
0x105b   :  { %v3153_v29 = vpop.f32.mrb[104].mxu0  ;;  %v3194_v28 = vpop.f32.mrb[104].mxu1 }
0x105c   :  { %v3201_v48 = vadd.f32 %v3153_v29, %v7684_v19  ;;  %v3203_v55 = vadd.f32 %v3194_v28, %v7685_v35  ;;  %v3155_v21 = vpop.f32.mrb[105].mxu0  ;;  %v3196_v50 = vpop.f32.mrb[105].mxu1 }
0x105d   :  { %v3202_v0 = vadd.f32 %v3155_v21, %v7686_v39  ;;  %v3204_v43 = vadd.f32 %v3196_v50, %v7687_v17  ;;  %v3157_v53 = vpop.f32.mrb[106].mxu0  ;;  %v3198_v6 = vpop.f32.mrb[106].mxu1 }
0x105e   :  { %v4030_v52 = vmul.f32 -1.442695, %v3201_v48  ;;  %v3158_v57 = vpop.f32.mrb[107].mxu0  ;;  %v3199_v7 = vpop.f32.mrb[107].mxu1  ;;  %v4032_v49 = vmul.f32 -1.442695, %v3203_v55 }
0x105f   :  { %v4031_v61 = vmul.f32 -1.442695, %v3202_v0 }
0x1060   :  { %4515 = vpow2.f32 %v4030_v52 }
0x1061   :  { %4517 = vpow2.f32 %v4031_v61 }
0x1062   :  { %4519 = vtanh.f32 %v3204_v43 }
0x1063   :  { %4521 = vpow2.f32 %v4032_v49 }
0x106a   :  { %v4516_v37 = vpop.eup %4515 }
0x106b   :  { %v3214_v63 = vadd.f32 1.0, %v4516_v37  ;;  %v4518_v11 = vpop.eup %4517 }
0x106c   :  { %v3215_v58 = vadd.f32 1.0, %v4518_v11  ;;  %v4520_v16 = vpop.eup %4519 }
0x106d   :  { %4523 = vrcp.f32 %v3214_v63  ;;  %v4522_v33 = vpop.eup %4521 }
0x106e   :  { %4525 = vrcp.f32 %v3215_v58  ;;  %v3216_v38 = vadd.f32 1.0, %v4522_v33 }
0x1070   :  { %4527 = vrcp.f32 %v3216_v38 }
0x1077   :  { %v4524_v10 = vpop.eup %4523 }
0x1078   :  { %v3225_v4 = vmul.f32 %v4524_v10, %v4520_v16  ;;  %v4526_v1 = vpop.eup %4525 }
0x1079   :  { %v3224_v27 = vmul.f32 %v4526_v1, %v6533_v51 }
0x107a   :  { %v4528_v54 = vpop.eup %4527 }
0x107b   :  { %v3226_v24 = vadd.f32 %v3225_v4, %v3224_v27 }
0x107d   :  { %4529 = vtanh.f32 %v3226_v24 }
0x1087   :  { %v4530_v14 = vpop.eup %4529 }
0x1088   :  { %v3228_v18 = vmul.f32 %v4530_v14, %v4528_v54 }
0x108a   :  { %v3229_v62 = vpack.c.bf16 %v3228_v18, %v3228_v18 }
0x108c   :  { %3263 = vmatmul.mubr.bf16.vlgmr.msra.gmra.mrb[108].mxu0 %v3229_v62  ;;  %3304 = vmatmul.mubr.bf16.vlgmr.msra.gmra.mrb[108].mxu1 %v3229_v62 }
0x108d   :  { %4776 = shalt.err (!%p4773_p10)  }
0x108e   :  { %s4777_s1 = scalar_lea.vmem %s75_s30, 4096  ;;  %p4782_p12 = scmp.lt.s32.totalorder %s75_s30, %s75_s30 }
0x108f   :  { %p4778_p11 = scmp.ne.s32.totalorder %s75_s30, %s4777_s1  ;;  %p4783_p13 = scmp.lt.s32.totalorder %s4777_s1, %s4777_s1 }
0x1091   :  { %p4784_p0 = por %p4783_p13, %p4782_p12 }
0x1093   :  { %p4785_p1 = pnand %p4784_p0, %p4778_p11 }
0x1095   :  { %4788 = shalt.err (!%p4785_p1)  }
0x1096   :  { %77 = dma.hbm_to_vmem [thread:$0]  %s6773_s3, 4096, %s75_s30, [#allocation4 + $0x1] }
0x115f   :  { %v3264_v51 = vpop.f32.mrb[108].mxu0  ;;  %v3305_v3 = vpop.f32.mrb[108].mxu1 }
0x1160   :  { %v3265_v60 = vadd.f32 %v3264_v51, %v6654_v40  ;;  %v3306_v41 = vadd.f32 %v3305_v3, %v6656_v15  ;;  %v3266_v26 = vpop.f32.mrb[109].mxu0  ;;  %v3307_v8 = vpop.f32.mrb[109].mxu1 }
0x1161   :  { %v3267_v42 = vadd.f32 %v3266_v26, %v6658_v46  ;;  %v3308_v47 = vadd.f32 %v3307_v8, %v6660_v36  ;;  %v3268_v25 = vpop.f32.mrb[110].mxu0  ;;  %v3309_v23 = vpop.f32.mrb[110].mxu1 }
0x1162   :  { %v3312_v31 = vadd.f32 %v3265_v60, %v5362_v9  ;;  %v3269_v45 = vpop.f32.mrb[111].mxu0  ;;  %v3310_v20 = vpop.f32.mrb[111].mxu1  ;;  %v3314_v40 = vadd.f32 %v3306_v41, %v5375_v30 }
0x1163   :  { %v3313_v34 = vadd.f32 %v3267_v42, %v5365_v12  ;;  %v3315_v15 = vadd.f32 %v3308_v47, %v5379_v32 }
0x1164   :  { %v4033_v44 = vmul.f32 -1.442695, %v3312_v31  ;;  %v4035_v56 = vmul.f32 -1.442695, %v3314_v40 }
0x1165   :  { %v4034_v13 = vmul.f32 -1.442695, %v3313_v34 }
0x1166   :  { %4531 = vpow2.f32 %v4033_v44 }
0x1167   :  { %4533 = vpow2.f32 %v4034_v13 }
0x1168   :  { %4535 = vtanh.f32 %v3315_v15 }
0x1169   :  { %4537 = vpow2.f32 %v4035_v56 }
0x1170   :  { %v4532_v46 = vpop.eup %4531 }
0x1171   :  { %v3325_v5 = vadd.f32 1.0, %v4532_v46  ;;  %v4534_v36 = vpop.eup %4533 }
0x1172   :  { %v3326_v9 = vadd.f32 1.0, %v4534_v36  ;;  %v4536_v59 = vpop.eup %4535 }
0x1173   :  { %4539 = vrcp.f32 %v3325_v5  ;;  %v4538_v29 = vpop.eup %4537 }
0x1174   :  { %4541 = vrcp.f32 %v3326_v9  ;;  %v3327_v48 = vadd.f32 1.0, %v4538_v29 }
0x1176   :  { %4543 = vrcp.f32 %v3327_v48 }
0x117d   :  { %v4540_v12 = vpop.eup %4539 }
0x117e   :  { %v3336_v28 = vmul.f32 %v4540_v12, %v4536_v59  ;;  %v4542_v19 = vpop.eup %4541 }
0x117f   :  { %v3335_v35 = vmul.f32 %v4542_v19, %v6583_v22 }
0x1180   :  { %v4544_v32 = vpop.eup %4543 }
0x1181   :  { %v3337_v30 = vadd.f32 %v3336_v28, %v3335_v35 }
0x1183   :  { %4545 = vtanh.f32 %v3337_v30 }
0x118d   :  { %v4546_v55 = vpop.eup %4545 }
0x118e   :  { %v3339_v21 = vmul.f32 %v4546_v55, %v4544_v32 }
0x118f   :  { %4791 = dma.done.wait [#allocation4], 10240 }
0x1190   :  { %4792 = vsyncadd [#allocation4], 4294957056 }
0x1191   :  { %4793 = dma.done.wait [#allocation4 + $0x1], 4096 }
0x1192   :  { %4794 = vsyncadd [#allocation4 + $0x1], 4294963200  ;;  %3584 = vmatprep.mubr.bf16.mxu1 %v7174_v2  ;;  %v4807_v50 = vmov 0.0   ;;  %vm4808_vm1 = vmmov 0   ;;  %v3348_v22 = vld [vmem:[#allocation3] sm:$0xff]  ;;  %v3349_v39 = vld [vmem:[#allocation3 + $0x8] sm:$0xff]  ;;  %v3460_v52 = vpack.c.bf16 %v3339_v21, %v3339_v21 }
0x1193   :  { %4083 = vmatprep.subr.bf16.mxu0 %v4807_v50  ;;  %4099 = vmatprep.mubr.msk.bf16.mxu0 %vm4808_vm1, %v4807_v50  ;;  %v3350_v0 = vld [vmem:[#allocation3 + $0x10] sm:$0xff]  ;;  %v3351_v2 = vld [vmem:[#allocation3 + $0x18] sm:$0xff]  ;;  %v3352_v17 = vld [vmem:[#allocation3 + $0x20] sm:$0xff] }
0x1194   :  { %4084 = vmatpush3.bf16.msra.mxu0 %v3348_v22  ;;  %v3353_v43 = vld [vmem:[#allocation3 + $0x28] sm:$0xff]  ;;  %v3354_v53 = vld [vmem:[#allocation3 + $0x30] sm:$0xff]  ;;  %v3355_v6 = vld [vmem:[#allocation3 + $0x38] sm:$0xff] }
0x1195   :  { %4085 = vmatprep.subr.bf16.mxu0 %v4807_v50  ;;  %v3381_v57 = vld [vmem:[#allocation2 + $0x8] sm:$0xff]  ;;  %v3380_v16 = vld [vmem:[#allocation2] sm:$0xff]  ;;  %v3383_v33 = vld [vmem:[#allocation2 + $0x18] sm:$0xff] }
0x1196   :  { %3552 = vmatprep.subr.bf16.mxu1 %v3381_v57  ;;  %v4036_v7 = vld [vmem:[%s6774_s4 + $0x8] ss:$0 sm:$0xff]  ;;  %v3382_v10 = vld [vmem:[#allocation2 + $0x10] sm:$0xff]  ;;  %v3384_v1 = vld [vmem:[#allocation2 + $0x20] sm:$0xff] }
0x1197   :  { %3553 = vmatpush1.bf16.msra.mxu1 %v3380_v16  ;;  %v3385_v4 = vld [vmem:[#allocation2 + $0x28] sm:$0xff]  ;;  %v3387_v38 = vld [vmem:[#allocation2 + $0x38] sm:$0xff]  ;;  %v3386_v27 = vld [vmem:[#allocation2 + $0x30] sm:$0xff] }
0x1198   :  { %4086 = vmatpush3.bf16.msra.mxu0 %v3349_v39  ;;  %3554 = vmatprep.subr.bf16.mxu1 %v3383_v33  ;;  %v3389_v24 = vld [vmem:[#allocation2 + $0x48] sm:$0xff]  ;;  %v3388_v54 = vld [vmem:[#allocation2 + $0x40] sm:$0xff]  ;;  %v3391_v14 = vld [vmem:[#allocation2 + $0x58] sm:$0xff] }
0x1199   :  { %4087 = vmatprep.subr.bf16.mxu0 %v4807_v50  ;;  %v3390_v18 = vld [vmem:[#allocation2 + $0x50] sm:$0xff]  ;;  %v3393_v62 = vld [vmem:[#allocation2 + $0x68] sm:$0xff]  ;;  %v3392_v51 = vld [vmem:[#allocation2 + $0x60] sm:$0xff] }
0x119a   :  { %v3395_v3 = vld [vmem:[#allocation2 + $0x78] sm:$0xff]  ;;  %v3394_v60 = vld [vmem:[#allocation2 + $0x70] sm:$0xff]  ;;  %v3397_v41 = vld [vmem:[#allocation2 + $0x88] sm:$0xff] }
0x119b   :  { %3555 = vmatpush1.bf16.msra.mxu1 %v3382_v10  ;;  %v3396_v26 = vld [vmem:[#allocation2 + $0x80] sm:$0xff]  ;;  %v3399_v8 = vld [vmem:[#allocation2 + $0x98] sm:$0xff]  ;;  %v3398_v42 = vld [vmem:[#allocation2 + $0x90] sm:$0xff] }
0x119c   :  { %4088 = vmatpush3.bf16.msra.mxu0 %v3350_v0  ;;  %3556 = vmatprep.subr.bf16.mxu1 %v3385_v4  ;;  %v3401_v47 = vld [vmem:[#allocation2 + $0xa8] sm:$0xff]  ;;  %v3400_v25 = vld [vmem:[#allocation2 + $0xa0] sm:$0xff]  ;;  %v3403_v23 = vld [vmem:[#allocation2 + $0xb8] sm:$0xff] }
0x119d   :  { %4089 = vmatprep.subr.bf16.mxu0 %v4807_v50  ;;  %v3402_v31 = vld [vmem:[#allocation2 + $0xb0] sm:$0xff]  ;;  %v3405_v45 = vld [vmem:[#allocation2 + $0xc8] sm:$0xff]  ;;  %v3404_v20 = vld [vmem:[#allocation2 + $0xc0] sm:$0xff] }
0x119e   :  { %v3407_v34 = vld [vmem:[#allocation2 + $0xd8] sm:$0xff]  ;;  %v3406_v44 = vld [vmem:[#allocation2 + $0xd0] sm:$0xff]  ;;  %v3409_v13 = vld [vmem:[#allocation2 + $0xe8] sm:$0xff] }
0x119f   :  { %3557 = vmatpush1.bf16.msra.mxu1 %v3384_v1  ;;  %v3408_v40 = vld [vmem:[#allocation2 + $0xe0] sm:$0xff]  ;;  %v3411_v15 = vld [vmem:[#allocation2 + $0xf8] sm:$0xff]  ;;  %v3410_v56 = vld [vmem:[#allocation2 + $0xf0] sm:$0xff] }
0x11a0   :  { %4090 = vmatpush3.bf16.msra.mxu0 %v3351_v2  ;;  %3558 = vmatprep.subr.bf16.mxu1 %v3387_v38  ;;  %v3413_v46 = vld [vmem:[#allocation2 + $0x108] sm:$0xff]  ;;  %v3412_v5 = vld [vmem:[#allocation2 + $0x100] sm:$0xff]  ;;  %v3415_v36 = vld [vmem:[#allocation2 + $0x118] sm:$0xff] }
0x11a1   :  { %4091 = vmatprep.subr.bf16.mxu0 %v4807_v50  ;;  %v3414_v9 = vld [vmem:[#allocation2 + $0x110] sm:$0xff]  ;;  %v3417_v59 = vld [vmem:[#allocation2 + $0x128] sm:$0xff]  ;;  %v3416_v29 = vld [vmem:[#allocation2 + $0x120] sm:$0xff] }
0x11a2   :  { %v3419_v12 = vld [vmem:[#allocation2 + $0x138] sm:$0xff]  ;;  %v3418_v28 = vld [vmem:[#allocation2 + $0x130] sm:$0xff]  ;;  %v3421_v19 = vld [vmem:[#allocation2 + $0x148] sm:$0xff] }
0x11a3   :  { %3559 = vmatpush1.bf16.msra.mxu1 %v3386_v27  ;;  %v3420_v48 = vld [vmem:[#allocation2 + $0x140] sm:$0xff]  ;;  %v3423_v35 = vld [vmem:[#allocation2 + $0x158] sm:$0xff]  ;;  %v3422_v30 = vld [vmem:[#allocation2 + $0x150] sm:$0xff] }
0x11a4   :  { %4092 = vmatpush3.bf16.msra.mxu0 %v3352_v17  ;;  %3560 = vmatprep.subr.bf16.mxu1 %v3389_v24  ;;  %v3540_v16 = vld [vmem:[%s6774_s4 + $0xb] sm:$0x3]  ;;  %v7689_v4 = vld [vmem:[#allocation78_spill] sm:$0xff] }
0x11a5   :  { %4093 = vmatprep.subr.bf16.mxu0 %v4807_v50  ;;  %v7688_v33 = vld [vmem:[#allocation77_spill] sm:$0xff]  ;;  %v3549_v1 = vrot.slane %v3540_v16, %v7689_v4 }
0x11a6   :  { %v3545_v10 = vrot.slane %v3540_v16, %v7688_v33  ;;  %v3357_v16 = vld [vmem:[#allocation3 + $0x48] sm:$0xff] }
0x11a7   :  { %3561 = vmatpush1.bf16.msra.mxu1 %v3388_v54 }
0x11a8   :  { %4094 = vmatpush3.bf16.msra.mxu0 %v3353_v43  ;;  %3562 = vmatprep.subr.bf16.mxu1 %v3391_v14 }
0x11a9   :  { %4095 = vmatprep.subr.bf16.mxu0 %v4807_v50 }
0x11ab   :  { %3563 = vmatpush1.bf16.msra.mxu1 %v3390_v18 }
0x11ac   :  { %4096 = vmatpush3.bf16.msra.mxu0 %v3354_v53  ;;  %3564 = vmatprep.subr.bf16.mxu1 %v3393_v62  ;;  %v4037_v53 = vld [vmem:[%s6774_s4 + $0x9] ss:$0 sm:$0xff] }
0x11ad   :  { %4097 = vmatprep.subr.bf16.mxu0 %v4807_v50 }
0x11af   :  { %3565 = vmatpush1.bf16.msra.mxu1 %v3392_v51 }
0x11b0   :  { %4098 = vmatpush3.bf16.msra.mxu0 %v3355_v6  ;;  %3566 = vmatprep.subr.bf16.mxu1 %v3395_v3 }
0x11b1   :  { %3609 = vmatprep.subr.bf16.mxu0 %v3397_v41  ;;  %v3429_v41 = vld [vmem:[#allocation2 + $0x188] sm:$0xff] }
0x11b3   :  { %4100 = vmatmul.mubr.bf16.vlgmr.msra.gmra.mrb[112].mxu0 %v3460_v52  ;;  %3567 = vmatpush1.bf16.msra.mxu1 %v3394_v60  ;;  %v4038_v52 = vld [vmem:[%s6774_s4 + $0xa] ss:$0 sm:$0xff] }
0x11b4   :  { %3610 = vmatpush1.bf16.msra.mxu0 %v3396_v26  ;;  %v3428_v26 = vld [vmem:[#allocation2 + $0x180] sm:$0xff]  ;;  %3713 = vmatprep.subr.bf16.mxu1 %v3429_v41 }
0x11b5   :  { %3611 = vmatprep.subr.bf16.mxu0 %v3399_v8  ;;  %v3431_v8 = vld [vmem:[#allocation2 + $0x198] sm:$0xff] }
0x11b8   :  { %3612 = vmatpush1.bf16.msra.mxu0 %v3398_v42  ;;  %v3430_v42 = vld [vmem:[#allocation2 + $0x190] sm:$0xff] }
0x11b9   :  { %3613 = vmatprep.subr.bf16.mxu0 %v3401_v47  ;;  %v3433_v47 = vld [vmem:[#allocation2 + $0x1a8] sm:$0xff] }
0x11bc   :  { %3614 = vmatpush1.bf16.msra.mxu0 %v3400_v25  ;;  %v3432_v25 = vld [vmem:[#allocation2 + $0x1a0] sm:$0xff] }
0x11bd   :  { %3615 = vmatprep.subr.bf16.mxu0 %v3403_v23  ;;  %v3435_v23 = vld [vmem:[#allocation2 + $0x1b8] sm:$0xff] }
0x11c0   :  { %3616 = vmatpush1.bf16.msra.mxu0 %v3402_v31  ;;  %v3434_v31 = vld [vmem:[#allocation2 + $0x1b0] sm:$0xff] }
0x11c1   :  { %3617 = vmatprep.subr.bf16.mxu0 %v3405_v45  ;;  %v3437_v45 = vld [vmem:[#allocation2 + $0x1c8] sm:$0xff] }
0x11c4   :  { %3618 = vmatpush1.bf16.msra.mxu0 %v3404_v20  ;;  %v3436_v20 = vld [vmem:[#allocation2 + $0x1c0] sm:$0xff] }
0x11c5   :  { %3619 = vmatprep.subr.bf16.mxu0 %v3407_v34  ;;  %v3439_v34 = vld [vmem:[#allocation2 + $0x1d8] sm:$0xff] }
0x11c8   :  { %3620 = vmatpush1.bf16.msra.mxu0 %v3406_v44  ;;  %v3438_v44 = vld [vmem:[#allocation2 + $0x1d0] sm:$0xff] }
0x11c9   :  { %3621 = vmatprep.subr.bf16.mxu0 %v3409_v13  ;;  %v3441_v13 = vld [vmem:[#allocation2 + $0x1e8] sm:$0xff] }
0x11cc   :  { %3622 = vmatpush1.bf16.msra.mxu0 %v3408_v40  ;;  %v3440_v40 = vld [vmem:[#allocation2 + $0x1e0] sm:$0xff] }
0x11cd   :  { %3623 = vmatprep.subr.bf16.mxu0 %v3411_v15  ;;  %v3443_v15 = vld [vmem:[#allocation2 + $0x1f8] sm:$0xff] }
0x11d0   :  { %3624 = vmatpush1.bf16.msra.mxu0 %v3410_v56  ;;  %v3442_v56 = vld [vmem:[#allocation2 + $0x1f0] sm:$0xff] }
0x11d1   :  { %3625 = vmatprep.subr.bf16.mxu0 %v3413_v46  ;;  %v3597_v46 = vld [vmem:[%s6774_s4 + $0xd] sm:$0x3] }
0x11d4   :  { %3626 = vmatpush1.bf16.msra.mxu0 %v3412_v5  ;;  %v3602_v5 = vrot.slane %v3597_v46, %v7688_v33 }
0x11d5   :  { %3627 = vmatprep.subr.bf16.mxu0 %v3415_v36  ;;  %v3606_v36 = vrot.slane %v3597_v46, %v7689_v4 }
0x11d8   :  { %3628 = vmatpush1.bf16.msra.mxu0 %v3414_v9 }
0x11d9   :  { %3629 = vmatprep.subr.bf16.mxu0 %v3417_v59 }
0x11dc   :  { %3630 = vmatpush1.bf16.msra.mxu0 %v3416_v29 }
0x11dd   :  { %3631 = vmatprep.subr.bf16.mxu0 %v3419_v12 }
0x11e0   :  { %3632 = vmatpush1.bf16.msra.mxu0 %v3418_v28 }
0x11e1   :  { %3633 = vmatprep.subr.bf16.mxu0 %v3421_v19 }
0x11e4   :  { %3634 = vmatpush1.bf16.msra.mxu0 %v3420_v48 }
0x11e5   :  { %3635 = vmatprep.subr.bf16.mxu0 %v3423_v35 }
0x11e8   :  { %3636 = vmatpush1.bf16.msra.mxu0 %v3422_v30 }
0x1286   :  { %v3502_v61 = vpop.f32.mrb[112].mxu0 }
0x1287   :  { %v6702_v49 = vadd.f32 %v4036_v7, %v3502_v61  ;;  %v4101_v37 = vpop.f32.mrb[113].mxu0 }
0x1288   :  { %v3505_v63 = vpop.f32.mrb[114].mxu0 }
0x1289   :  { %3510 = vadd.xlane.f32.xlu0 %v6702_v49  ;;  %v4102_v11 = vpop.f32.mrb[115].mxu0  ;;  %v3514_v58 = vmul.f32 %v6702_v49, %v6702_v49  ;;  %v3425_v63 = vld [vmem:[#allocation2 + $0x168] sm:$0xff] }
0x128a   :  { %3637 = vmatprep.subr.bf16.mxu0 %v3425_v63  ;;  %v3424_v11 = vld [vmem:[#allocation2 + $0x160] sm:$0xff]  ;;  %v3458_v63 = vld [vmem:[#allocation2 + $0x270] sm:$0xff] }
0x128b   :  { %3638 = vmatpush1.bf16.msra.mxu0 %v3424_v11  ;;  %v3364_v11 = vld [vmem:[#allocation3 + $0x80] sm:$0xff] }
0x128d   :  { %3515 = vadd.xlane.f32.xlu0 %v3514_v58  ;;  %v3426_v58 = vld [vmem:[#allocation2 + $0x170] sm:$0xff] }
0x1316   :  { %v3511_v32 = vpop.xlane.xlu0 %3510 }
0x1317   :  { %v3513_v55 = vmul.f32 0.0078125, %v3511_v32 }
0x1319   :  { %v3518_v22 = vmul.f32 %v3513_v55, %v3513_v55  ;;  %v3520_v17 = vsub.f32 %v6702_v49, %v3513_v55  ;;  %v3427_v49 = vld [vmem:[#allocation2 + $0x178] sm:$0xff]  ;;  %v3445_v55 = vld [vmem:[#allocation2 + $0x208] sm:$0xff] }
0x131a   :  { %v3516_v21 = vpop.xlane.xlu0 %3515  ;;  %3639 = vmatprep.subr.bf16.mxu0 %v3427_v49  ;;  %v3356_v49 = vld [vmem:[#allocation3 + $0x40] sm:$0xff] }
0x131b   :  { %v3517_v39 = vmul.f32 0.0078125, %v3516_v21  ;;  %3640 = vmatpush1.bf16.msra.mxu0 %v3426_v58  ;;  %v3444_v21 = vld [vmem:[#allocation2 + $0x200] sm:$0xff]  ;;  %v3365_v58 = vld [vmem:[#allocation3 + $0x88] sm:$0xff] }
0x131c   :  { %4052 = vmatprep.subr.bf16.mxu0 %v3364_v11  ;;  %v3378_v11 = vld [vmem:[#allocation3 + $0xf0] sm:$0xff] }
0x131d   :  { %v3519_v0 = vsub.f32 %v3517_v39, %v3518_v22  ;;  %v3447_v22 = vld [vmem:[#allocation2 + $0x218] sm:$0xff]  ;;  %v3446_v39 = vld [vmem:[#allocation2 + $0x210] sm:$0xff] }
0x131f   :  { %v3521_v2 = vadd.f32 1e-05, %v3519_v0  ;;  %v3449_v0 = vld [vmem:[#allocation2 + $0x228] sm:$0xff] }
0x1321   :  { %4739 = vrsqrt.f32 %v3521_v2  ;;  %v3448_v2 = vld [vmem:[#allocation2 + $0x220] sm:$0xff] }
0x132b   :  { %v4740_v43 = vpop.eup %4739 }
0x132c   :  { %v3523_v6 = vmul.f32 %v4740_v43, %v3520_v17  ;;  %v3451_v17 = vld [vmem:[#allocation2 + $0x238] sm:$0xff]  ;;  %v3450_v43 = vld [vmem:[#allocation2 + $0x230] sm:$0xff] }
0x132e   :  { %v3530_v57 = vmul.f32 %v4037_v53, %v3523_v6  ;;  %v3453_v53 = vld [vmem:[#allocation2 + $0x248] sm:$0xff]  ;;  %v3452_v6 = vld [vmem:[#allocation2 + $0x240] sm:$0xff] }
0x1330   :  { %v3537_v7 = vadd.f32 %v4038_v52, %v3530_v57  ;;  %v3455_v52 = vld [vmem:[#allocation2 + $0x258] sm:$0xff]  ;;  %v3454_v57 = vld [vmem:[#allocation2 + $0x250] sm:$0xff] }
0x1332   :  { %v3538_v61 = vmax.f32 %v3537_v7, 0.0  ;;  %v3457_v7 = vld [vmem:[#allocation2 + $0x268] sm:$0xff] }
0x1334   :  { %v3539_v37 = vpack.c.bf16 %v3538_v61, %v3538_v61  ;;  %v3456_v61 = vld [vmem:[#allocation2 + $0x260] sm:$0xff] }
0x1336   :  { %3585 = vmatmul.mubr.bf16.vlgmr.msra.gmra.mrb[112].mxu1 %v3539_v37  ;;  %v3459_v37 = vld [vmem:[#allocation2 + $0x278] sm:$0xff] }
0x1337   :  { %3714 = vmatpush1.bf16.msra.mxu1 %v3428_v26 }
0x1338   :  { %3715 = vmatprep.subr.bf16.mxu1 %v3431_v8 }
0x133b   :  { %3716 = vmatpush1.bf16.msra.mxu1 %v3430_v42  ;;  %v3650_v42 = vld [vmem:[%s6774_s4 + $0xf] sm:$0x3] }
0x133c   :  { %3717 = vmatprep.subr.bf16.mxu1 %v3433_v47  ;;  %v3651_v47 = vld [vmem:[%s6774_s4 + $0x11] sm:$0x3] }
0x133f   :  { %3718 = vmatpush1.bf16.msra.mxu1 %v3432_v25 }
0x1340   :  { %3719 = vmatprep.subr.bf16.mxu1 %v3435_v23 }
0x1343   :  { %3720 = vmatpush1.bf16.msra.mxu1 %v3434_v31  ;;  %v3675_v31 = vrot.slane %v3650_v42, %v7688_v33 }
0x1344   :  { %3721 = vmatprep.subr.bf16.mxu1 %v3437_v45  ;;  %v3679_v45 = vrot.slane %v3650_v42, %v7689_v4 }
0x1347   :  { %3722 = vmatpush1.bf16.msra.mxu1 %v3436_v20 }
0x1348   :  { %3723 = vmatprep.subr.bf16.mxu1 %v3439_v34 }
0x134b   :  { %3724 = vmatpush1.bf16.msra.mxu1 %v3438_v44  ;;  %v3688_v44 = vrot.slane %v3651_v47, %v7688_v33 }
0x134c   :  { %3725 = vmatprep.subr.bf16.mxu1 %v3441_v13  ;;  %v3692_v13 = vrot.slane %v3651_v47, %v7689_v4 }
0x134f   :  { %3726 = vmatpush1.bf16.msra.mxu1 %v3440_v40 }
0x1350   :  { %3727 = vmatprep.subr.bf16.mxu1 %v3443_v15 }
0x1353   :  { %3728 = vmatpush1.bf16.msra.mxu1 %v3442_v56 }
0x1354   :  { %3729 = vmatprep.subr.bf16.mxu1 %v3445_v55  ;;  %v3375_v55 = vld [vmem:[#allocation3 + $0xd8] sm:$0xff] }
0x1357   :  { %3730 = vmatpush1.bf16.msra.mxu1 %v3444_v21  ;;  %v3376_v21 = vld [vmem:[#allocation3 + $0xe0] sm:$0xff] }
0x1358   :  { %3731 = vmatprep.subr.bf16.mxu1 %v3447_v22  ;;  %v3377_v22 = vld [vmem:[#allocation3 + $0xe8] sm:$0xff] }
0x135b   :  { %3732 = vmatpush1.bf16.msra.mxu1 %v3446_v39  ;;  %v3701_v39 = vld [vmem:[%s6774_s4 + $0x13] sm:$0x3] }
0x135c   :  { %3733 = vmatprep.subr.bf16.mxu1 %v3449_v0  ;;  %v3706_v0 = vrot.slane %v3701_v39, %v7688_v33 }
0x135f   :  { %3734 = vmatpush1.bf16.msra.mxu1 %v3448_v2  ;;  %v3710_v2 = vrot.slane %v3701_v39, %v7689_v4  ;;  %v4039_v4 = vld [vmem:[%s6774_s4 + $0x15] ss:$0 sm:$0xff] }
0x1360   :  { %3735 = vmatprep.subr.bf16.mxu1 %v3451_v17 }
0x1363   :  { %3736 = vmatpush1.bf16.msra.mxu1 %v3450_v43 }
0x1364   :  { %3737 = vmatprep.subr.bf16.mxu1 %v3453_v53 }
0x1367   :  { %3738 = vmatpush1.bf16.msra.mxu1 %v3452_v6 }
0x1368   :  { %3739 = vmatprep.subr.bf16.mxu1 %v3455_v52 }
0x136b   :  { %3740 = vmatpush1.bf16.msra.mxu1 %v3454_v57 }
0x136c   :  { %3741 = vmatprep.subr.bf16.mxu1 %v3457_v7 }
0x136f   :  { %3742 = vmatpush1.bf16.msra.mxu1 %v3456_v61 }
0x1370   :  { %3743 = vmatprep.subr.bf16.mxu1 %v3459_v37 }
0x1373   :  { %3744 = vmatpush1.bf16.msra.mxu1 %v3458_v63 }
0x1374   :  { %4103 = vmatprep.subr.bf16.mxu1 %v4807_v50 }
0x1409   :  { %v3586_v38 = vpop.f32.mrb[112].mxu1 }
0x140a   :  { %v3587_v27 = vadd.f32 %v3586_v38, %v3545_v10  ;;  %v3588_v24 = vpop.f32.mrb[113].mxu1  ;;  %v3366_v10 = vld [vmem:[#allocation3 + $0x90] sm:$0xff]  ;;  %v3367_v38 = vld [vmem:[#allocation3 + $0x98] sm:$0xff] }
0x140b   :  { %v3589_v54 = vadd.f32 %v3588_v24, %v3549_v1  ;;  %v3590_v14 = vpop.f32.mrb[114].mxu1  ;;  %v3358_v1 = vld [vmem:[#allocation3 + $0x50] sm:$0xff]  ;;  %v3368_v24 = vld [vmem:[#allocation3 + $0xa0] sm:$0xff] }
0x140c   :  { %v3593_v18 = vmax.f32 %v3587_v27, 0.0  ;;  %v3591_v62 = vpop.f32.mrb[115].mxu1  ;;  %v3359_v27 = vld [vmem:[#allocation3 + $0x58] sm:$0xff]  ;;  %v3369_v14 = vld [vmem:[#allocation3 + $0xa8] sm:$0xff] }
0x140d   :  { %v3594_v51 = vmax.f32 %v3589_v54, 0.0  ;;  %v3360_v54 = vld [vmem:[#allocation3 + $0x60] sm:$0xff] }
0x140e   :  { %v3595_v60 = vpack.c.bf16 %v3593_v18, %v3593_v18  ;;  %v3361_v18 = vld [vmem:[#allocation3 + $0x68] sm:$0xff] }
0x140f   :  { %v3596_v3 = vpack.c.bf16 %v3594_v51, %v3594_v51 }
0x1411   :  { %3641 = vmatprep.mubr.bf16.mxu0 %v3596_v3 }
0x1412   :  { %3642 = vmatmul.mubr.bf16.vlgmr.msra.gmra.mrb[116].mxu0 %v3595_v60 }
0x1413   :  { %4053 = vmatpush3.bf16.msra.mxu0 %v3356_v49  ;;  %v3379_v49 = vld [vmem:[#allocation3 + $0xf8] sm:$0xff] }
0x1414   :  { %4054 = vmatprep.subr.bf16.mxu0 %v3365_v58 }
0x1417   :  { %4055 = vmatpush3.bf16.msra.mxu0 %v3357_v16 }
0x1418   :  { %4056 = vmatprep.subr.bf16.mxu0 %v3366_v10 }
0x141b   :  { %4057 = vmatpush3.bf16.msra.mxu0 %v3358_v1 }
0x141c   :  { %4058 = vmatprep.subr.bf16.mxu0 %v3367_v38 }
0x141f   :  { %4059 = vmatpush3.bf16.msra.mxu0 %v3359_v27 }
0x1420   :  { %4060 = vmatprep.subr.bf16.mxu0 %v3368_v24 }
0x1423   :  { %4061 = vmatpush3.bf16.msra.mxu0 %v3360_v54  ;;  %v4040_v54 = vld [vmem:[%s6774_s4 + $0x16] ss:$0 sm:$0xff] }
0x1424   :  { %4062 = vmatprep.subr.bf16.mxu0 %v3369_v14 }
0x1427   :  { %4063 = vmatpush3.bf16.msra.mxu0 %v3361_v18 }
0x14e5   :  { %v3643_v9 = vpop.f32.mrb[116].mxu0 }
0x14e6   :  { %v6724_v59 = vadd.f32 %v3643_v9, %v3602_v5  ;;  %v3645_v29 = vpop.f32.mrb[117].mxu0 }
0x14e7   :  { %v6726_v12 = vadd.f32 %v3645_v29, %v3606_v36  ;;  %v3647_v28 = vpop.f32.mrb[118].mxu0 }
0x14e8   :  { %v3648_v19 = vpop.f32.mrb[119].mxu0  ;;  %v3657_v35 = vmul.f32 %v6724_v59, %v6724_v59  ;;  %v3362_v28 = vld [vmem:[#allocation3 + $0x70] sm:$0xff] }
0x14e9   :  { %v3652_v48 = vadd.f32 %v6726_v12, %v6724_v59  ;;  %v3658_v30 = vmul.f32 %v6726_v12, %v6726_v12  ;;  %v3371_v19 = vld [vmem:[#allocation3 + $0xb8] sm:$0xff] }
0x14eb   :  { %3653 = vadd.xlane.f32.xlu1 %v3652_v48  ;;  %v3659_v32 = vadd.f32 %v3658_v30, %v3657_v35  ;;  %v3363_v48 = vld [vmem:[#allocation3 + $0x78] sm:$0xff]  ;;  %v3372_v35 = vld [vmem:[#allocation3 + $0xc0] sm:$0xff]  ;;  %v3373_v30 = vld [vmem:[#allocation3 + $0xc8] sm:$0xff] }
0x14ef   :  { %3660 = vadd.xlane.f32.xlu1 %v3659_v32  ;;  %v3374_v32 = vld [vmem:[#allocation3 + $0xd0] sm:$0xff] }
0x1578   :  { %v3654_v62 = vpop.xlane.xlu1 %3653 }
0x1579   :  { %v3656_v51 = vmul.f32 0.00390625, %v3654_v62 }
0x157b   :  { %v3663_v60 = vmul.f32 %v3656_v51, %v3656_v51  ;;  %v3665_v25 = vsub.f32 %v6724_v59, %v3656_v51  ;;  %v3666_v23 = vsub.f32 %v6726_v12, %v3656_v51  ;;  %v3370_v12 = vld [vmem:[#allocation3 + $0xb0] sm:$0xff] }
0x157c   :  { %v3661_v3 = vpop.xlane.xlu1 %3660  ;;  %4064 = vmatprep.subr.bf16.mxu0 %v3370_v12 }
0x157d   :  { %v3662_v41 = vmul.f32 0.00390625, %v3661_v3  ;;  %4065 = vmatpush3.bf16.msra.mxu0 %v3362_v28 }
0x157e   :  { %4066 = vmatprep.subr.bf16.mxu0 %v3371_v19 }
0x157f   :  { %v3664_v26 = vsub.f32 %v3662_v41, %v3663_v60 }
0x1581   :  { %v3667_v8 = vadd.f32 1e-05, %v3664_v26  ;;  %4067 = vmatpush3.bf16.msra.mxu0 %v3363_v48 }
0x1583   :  { %4741 = vrsqrt.f32 %v3667_v8 }
0x158d   :  { %v4742_v20 = vpop.eup %4741 }
0x158e   :  { %v3670_v34 = vmul.f32 %v4742_v20, %v3666_v23  ;;  %v3669_v40 = vmul.f32 %v4742_v20, %v3665_v25 }
0x1590   :  { %v3683_v15 = vmul.f32 %v3679_v45, %v3670_v34  ;;  %v3682_v56 = vmul.f32 %v3675_v31, %v3669_v40 }
0x1592   :  { %v3696_v46 = vadd.f32 %v3692_v13, %v3683_v15  ;;  %v3695_v5 = vadd.f32 %v3688_v44, %v3682_v56 }
0x1594   :  { %v3698_v36 = vmax.f32 %v3696_v46, 0.0  ;;  %v3697_v9 = vmax.f32 %v3695_v5, 0.0 }
0x1596   :  { %v3700_v59 = vpack.c.bf16 %v3698_v36, %v3698_v36  ;;  %v3699_v29 = vpack.c.bf16 %v3697_v9, %v3697_v9 }
0x1598   :  { %3745 = vmatprep.mubr.bf16.mxu1 %v3700_v59 }
0x1599   :  { %3746 = vmatmul.mubr.bf16.vlgmr.msra.gmra.mrb[116].mxu1 %v3699_v29 }
0x159a   :  { %4119 = vmatprep.mubr.msk.bf16.mxu1 %vm4808_vm1, %v4807_v50  ;;  %4104 = vmatpush3.bf16.msra.mxu1 %v3372_v35 }
0x159b   :  { %4105 = vmatprep.subr.bf16.mxu1 %v4807_v50 }
0x159e   :  { %4106 = vmatpush3.bf16.msra.mxu1 %v3373_v30 }
0x159f   :  { %4107 = vmatprep.subr.bf16.mxu1 %v4807_v50 }
0x15a2   :  { %4108 = vmatpush3.bf16.msra.mxu1 %v3374_v32 }
0x15a3   :  { %4109 = vmatprep.subr.bf16.mxu1 %v4807_v50 }
0x15a6   :  { %4110 = vmatpush3.bf16.msra.mxu1 %v3375_v55 }
0x15a7   :  { %4111 = vmatprep.subr.bf16.mxu1 %v4807_v50 }
0x15aa   :  { %4112 = vmatpush3.bf16.msra.mxu1 %v3376_v21 }
0x15ab   :  { %4113 = vmatprep.subr.bf16.mxu1 %v4807_v50 }
0x15ae   :  { %4114 = vmatpush3.bf16.msra.mxu1 %v3377_v22 }
0x15af   :  { %4115 = vmatprep.subr.bf16.mxu1 %v4807_v50 }
0x15b2   :  { %4116 = vmatpush3.bf16.msra.mxu1 %v3378_v11 }
0x15b3   :  { %4117 = vmatprep.subr.bf16.mxu1 %v4807_v50 }
0x15b6   :  { %4118 = vmatpush3.bf16.msra.mxu1 %v3379_v49 }
0x166c   :  { %v3747_v17 = vpop.f32.mrb[116].mxu1 }
0x166d   :  { %v3748_v43 = vadd.f32 %v3747_v17, %v3706_v0  ;;  %v3749_v53 = vpop.f32.mrb[117].mxu1 }
0x166e   :  { %v3750_v6 = vadd.f32 %v3749_v53, %v3710_v2  ;;  %v3751_v52 = vpop.f32.mrb[118].mxu1 }
0x166f   :  { %v3754_v57 = vmax.f32 %v3748_v43, 0.0  ;;  %v3752_v7 = vpop.f32.mrb[119].mxu1 }
0x1670   :  { %v3755_v61 = vmax.f32 %v3750_v6, 0.0 }
0x1671   :  { %v3756_v63 = vpack.c.bf16 %v3754_v57, %v3754_v57 }
0x1672   :  { %v3757_v37 = vpack.c.bf16 %v3755_v61, %v3755_v61 }
0x1674   :  { %3797 = vmatprep.mubr.bf16.mxu0 %v3757_v37 }
0x1675   :  { %3798 = vmatmul.mubr.bf16.vlgmr.msra.gmra.mrb[120].mxu0 %v3756_v63 }
0x1748   :  { %v4068_v33 = vpop.f32.mrb[120].mxu0 }
0x1749   :  { %v4069_v58 = vpop.f32.mrb[121].mxu0 }
0x174a   :  { %v4070_v16 = vadd.f32 %v4069_v58, %v4068_v33  ;;  %v4071_v10 = vpop.f32.mrb[122].mxu0 }
0x174b   :  { %v4072_v1 = vpop.f32.mrb[123].mxu0 }
0x174c   :  { %v3800_v38 = vadd.f32 %v4070_v16, %v4039_v4 }
0x174e   :  { %v3805_v27 = vmax.f32 %v3800_v38, 0.0 }
0x1750   :  { %v3806_v24 = vpack.c.bf16 %v3805_v27, %v3805_v27 }
0x1752   :  { %4120 = vmatmul.mubr.bf16.vlgmr.msra.gmra.mrb[120].mxu1 %v3806_v24 }
0x1825   :  { %v3848_v50 = vpop.f32.mrb[120].mxu1 }
0x1826   :  { %v3849_v14 = vadd.f32 %v4040_v54, %v3848_v50  ;;  %v4121_v18 = vpop.f32.mrb[121].mxu1 }
0x1827   :  { %v3851_v62 = vpop.f32.mrb[122].mxu1 }
0x1828   :  { %4743 = vtanh.f32 %v3849_v14  ;;  %v4122_v51 = vpop.f32.mrb[123].mxu1 }
0x1832   :  { %v4744_v3 = vpop.eup %4743 }
0x1833   :  { %3855 = vst [vmem:[%s6775_s5] sm:$0xff] %v4744_v3 }
0x1834   :  { %3860 = vsyncpa [#allocation6], 1 }
0x1835   :  { %3861 = vsyncmov [#allocation4] }
0x1838   :  { %s3862_s9 = vpop.sfrf %3861 }
0x1839   :  { %p4041_p2 = scmp.ne.s32.totalorder %s3862_s9, 0 }
0x183b   :  { %3866 = shalt.err (%p4041_p2)  }
0x183c   :  { %3868 = vsyncmov [#allocation4 + $0x1] }
0x183f   :  { %s3869_s10 = vpop.sfrf %3868 }
0x1840   :  { %p4042_p3 = scmp.ne.s32.totalorder %s3869_s10, 0 }
0x1842   :  { %3873 = shalt.err (%p4042_p3)  }

</bundles_post_ra>
